<compile_context>
chip_gen: v7x
topology: tpu7x:2x2x1
jax: 0.10.0
libtpu: 0.0.40
codegen_flags: <defaults>
</compile_context>

<pallas_src>
import functools

import jax
import jax.numpy as jnp
from jax import lax
from jax.experimental import pallas as pl
from jax.experimental.pallas import tpu as pltpu


# ----------------------------- config ---------------------------------------
CFG = dict(vocab=50, d_model=32, n_head=4, d_head=8, d_inner=64, n_layer=2,
           n_labels=2)

BF16 = jnp.bfloat16
F32 = jnp.float32


# ----------------------------- shared helpers --------------------------------
def _layernorm(x, g, b, eps):
    mu = jnp.mean(x, axis=-1, keepdims=True)
    var = jnp.mean((x - mu) ** 2, axis=-1, keepdims=True)
    return (x - mu) * lax.rsqrt(var + eps) * g + b


def _rel_shift(bd_full, L, rel_roll):
    """XLNet relative shift: out[b, i, j] = bd_full[b, i, L - i + j]."""
    if rel_roll is not None:
        shift, stride = rel_roll
        # One strided lane rotate (XLU slot) for the whole [B, L, 2L] tile.
        rolled = pltpu.roll(bd_full, shift, 2, stride=stride, stride_axis=1)
        return rolled[:, :, 0:L]
    # Fallback: per-row static slices (correct everywhere, O(L) ops).
    return jnp.concatenate(
        [bd_full[:, i:i + 1, L - i:2 * L - i] for i in range(L)], axis=1)


# ------------------- rel-shift roll-convention probe -------------------------
def _probe_kernel(x_ref, o_ref, *, L, shift, stride):
    o_ref[...] = pltpu.roll(x_ref[...], shift, 2, stride=stride,
                            stride_axis=1)[:, :, 0:L]


def detect_rel_roll(B, L):
    """Find (shift, stride) s.t. strided pltpu.roll implements the XLNet
    rel-shift on a [B, L, 2L] tile; returns None to use the slice fallback."""
    x = jnp.arange(B * L * 2 * L, dtype=jnp.float32).reshape(B, L, 2 * L)
    want = jnp.stack([x[:, i, L - i:2 * L - i] for i in range(L)], axis=1)
    for shift, stride in ((L, 1), (L, -1)):
        try:
            got = pl.pallas_call(
                functools.partial(_probe_kernel, L=L, shift=shift, stride=stride),
                out_shape=jax.ShapeDtypeStruct((B, L, L), jnp.float32),
            )(x)
            if bool(jnp.all(got == want)):
                return (shift, stride)
        except Exception:
            continue
    return None


# ----------------------- fused per-layer compute ------------------------------
def _layer_compute(h32, pos_b, maskb, segdiff, qkv_w, r_w, o_w, ff1_w, ff2_w,
                   slab, *, B, L, N, DH, D, DI, scale, eps, rel_roll):
    NH = N * DH
    rwb = slab[0:1, 0:NH]
    rrb = slab[1:2, 0:NH]
    efb = slab[2:3, 0:2 * N]
    ln1g, ln1b = slab[3:4, 0:D], slab[4:5, 0:D]
    ff1b = slab[5:6, 0:DI]
    ff2b = slab[6:7, 0:D]
    ln2g, ln2b = slab[7:8, 0:D], slab[8:9, 0:D]

    h_b = h32.astype(BF16)
    # Fused projection: q | k | v | folded segment scores in ONE MXU matmul.
    qkv = jnp.dot(h_b, qkv_w, preferred_element_type=F32)     # [B*L, 3NH+2N]
    kr = jnp.dot(pos_b, r_w, preferred_element_type=F32)      # [2L, NH]

    q = qkv[:, 0:NH]
    k = qkv[:, NH:2 * NH]
    v = qkv[:, 2 * NH:3 * NH]
    ef_all = qkv[:, 3 * NH:3 * NH + 2 * N] + efb              # [B*L, 2N]

    qw = q + rwb      # content-bias query (broadcasts hoisted out of head loop)
    qr = q + rrb      # position-bias query

    head_outs = []
    for n in range(N):            # heads unrolled; a grid axis at real sizes
        sl = slice(n * DH, (n + 1) * DH)
        k_n = k[:, sl].reshape(B, L, DH).astype(BF16)
        v_n = v[:, sl].reshape(B, L, DH).astype(BF16)
        qw_n = qw[:, sl].reshape(B, L, DH).astype(BF16)
        qr_n = qr[:, sl].astype(BF16)                          # [B*L, DH]
        kr_n = kr[:, sl].astype(BF16)                          # [2L, DH]

        # AC: content attention score (batched MXU matmul).
        ac = jnp.einsum("bid,bjd->bij", qw_n, k_n,
                        preferred_element_type=F32)            # [B, L, L]

        # BD: positional score vs. all 2L relative positions on the MXU, then
        # the XLNet rel-shift as one strided roll (or slice fallback).
        bd_full = jnp.einsum("md,pd->mp", qr_n, kr_n,
                             preferred_element_type=F32).reshape(B, L, 2 * L)
        bd = _rel_shift(bd_full, L, rel_roll)                  # [B, L, L]

        # EF: segment score, already produced by the folded qkv matmul.
        ef0 = ef_all[:, n:n + 1].reshape(B, L, 1)
        ef1 = ef_all[:, N + n:N + n + 1].reshape(B, L, 1)
        ef = ef0 + segdiff * (ef1 - ef0)                       # [B, L, L]

        score = (ac + bd + ef) * scale + maskb
        score = score - jnp.max(score, axis=-1, keepdims=True)
        p = jnp.exp(score)
        p = p * pl.reciprocal(jnp.sum(p, axis=-1, keepdims=True), approx=True)

        attn_n = jnp.einsum("bij,bjd->bid", p.astype(BF16), v_n,
                            preferred_element_type=F32)        # [B, L, DH]
        head_outs.append(attn_n.reshape(B * L, DH))

    # Single output projection for all heads: [B*L, NH] x [NH, D].
    attn_cat = jnp.concatenate(head_outs, axis=-1).astype(BF16)
    attn_out = jnp.dot(attn_cat, o_w, preferred_element_type=F32)

    h1 = _layernorm(attn_out + h32, ln1g, ln1b, eps)

    # FFN: dense -> GELU -> dense -> residual + LayerNorm.
    # TODO(synk): HF XLNet uses exact erf-GELU; tanh approximation used here.
    ff = jnp.dot(h1.astype(BF16), ff1_w, preferred_element_type=F32)
    ff = jax.nn.gelu(ff + ff1b, approximate=True)
    ff = jnp.dot(ff.astype(BF16), ff2_w, preferred_element_type=F32) + ff2b
    return _layernorm(ff + h1, ln2g, ln2b, eps)


# ----------------------- whole-model fused kernel -----------------------------
def _xlnet_fused_kernel(h_ref, pos_ref, amask_ref, ttype_ref, labels_ref,
                        qkv_w_ref, r_w_ref, o_w_ref, ff1_w_ref, ff2_w_ref,
                        slab_ref, sum_w_ref, proj_w_ref, head_b_ref,
                        p1_ref, preds_ref, loss_ref,
                        *, B, L, N, DH, D, DI, NL, n_layer, scale, eps,
                        rel_roll, loss_kind):
    # ---- rebuild [B, L, L] mask / segment tensors from [B, L] inputs --------
    am = amask_ref[...]                                       # [B, L] f32
    tt = ttype_ref[...]                                       # [B, L] f32
    ii = lax.broadcasted_iota(jnp.int32, (L, L), 0)
    jj = lax.broadcasted_iota(jnp.int32, (L, L), 1)
    not_diag = (ii != jj).astype(F32)                         # [L, L]
    key_pad = (am == 0.0).astype(F32)                         # [B, L]
    # key j masked when padded, except the diagonal (HF XLNet non_tgt_mask).
    maskb = key_pad[:, None, :] * not_diag[None, :, :] * (-1e9)   # [B, L, L]
    segdiff = (tt[:, :, None] != tt[:, None, :]).astype(F32)      # [B, L, L]

    pos_b = pos_ref[...]                                      # [2L, D] bf16
    h32 = h_ref[...].astype(F32)                              # [B*L, D]

    for l in range(n_layer):                                  # layers unrolled
        h32 = _layer_compute(
            h32, pos_b, maskb, segdiff,
            qkv_w_ref[l], r_w_ref[l], o_w_ref[l], ff1_w_ref[l], ff2_w_ref[l],
            slab_ref[l],
            B=B, L=L, N=N, DH=DH, D=D, DI=DI, scale=scale, eps=eps,
            rel_roll=rel_roll)

    # ---- classification head: SequenceSummary("last") -> tanh -> proj -------
    last = h32.reshape(B, L, D)[:, L - 1, :]                  # [B, D]
    sum_b = head_b_ref[0:1, 0:D]
    proj_b = head_b_ref[1:2, 0:NL]
    summary = jnp.tanh(jnp.dot(last.astype(BF16), sum_w_ref[...],
                               preferred_element_type=F32) + sum_b)
    logits = jnp.dot(summary.astype(BF16), proj_w_ref[...],
                     preferred_element_type=F32) + proj_b     # [B, NL]

    z = logits - jnp.max(logits, axis=-1, keepdims=True)
    e = jnp.exp(z)
    p = e / jnp.sum(e, axis=-1, keepdims=True)
    p0, p1 = p[:, 0:1], p[:, 1:2]
    p1_ref[...] = p1
    preds_ref[...] = (p1 > p0).astype(jnp.int32)   # argmax over 2 classes

    y = labels_ref[...]                            # [B, 1]
    if loss_kind == "BCELoss":
        pc = jnp.clip(p1, 1e-7, 1.0 - 1e-7)
        loss = -jnp.sum(y * jnp.log(pc) + (1.0 - y) * jnp.log(1.0 - pc),
                        axis=0, keepdims=True) / B
    else:   # MSELoss (module default)
        # TODO(synk): the reference's CrossEntropyLoss branch on p[:, 1] is
        # ill-typed (float prob vs class-index loss); not implemented.
        loss = jnp.sum((p1 - y) ** 2, axis=0, keepdims=True) / B
    loss_ref[...] = loss


# ----------------------------- model forward ---------------------------------
def xlnet_forward(packed, input_ids, attention_mask, token_type_ids, labels,
                  fct_loss="MSELoss", rel_roll=None):
    cfg = CFG
    B, L = input_ids.shape
    D, N, DH, DI = cfg["d_model"], cfg["n_head"], cfg["d_head"], cfg["d_inner"]

    # Embedding gather (plain JAX glue); activations enter the kernel as bf16.
    h = packed["word_emb"][input_ids].reshape(B * L, D).astype(BF16)

    # Relative sinusoidal positional encoding (bi-directional, bi_data=False).
    pos_seq = jnp.arange(L, -L, -1.0, dtype=jnp.float32)                 # [2L]
    inv_freq = 1.0 / (10000.0 ** (jnp.arange(0, D, 2, dtype=jnp.float32) / D))
    sinusoid = pos_seq[:, None] * inv_freq[None, :]
    pos_emb = jnp.concatenate([jnp.sin(sinusoid), jnp.cos(sinusoid)],
                              axis=-1).astype(BF16)                      # [2L, D]

    labels2 = jnp.asarray(labels, jnp.float32).reshape(B, 1)
    am = jnp.asarray(attention_mask, jnp.float32)
    tt = jnp.asarray(token_type_ids, jnp.float32)

    kernel = functools.partial(
        _xlnet_fused_kernel, B=B, L=L, N=N, DH=DH, D=D, DI=DI,
        NL=cfg["n_labels"], n_layer=cfg["n_layer"], scale=1.0 / (DH ** 0.5),
        eps=1e-12, rel_roll=rel_roll, loss_kind=fct_loss)

    p1, preds, loss = pl.pallas_call(
        kernel,
        out_shape=(jax.ShapeDtypeStruct((B, 1), jnp.float32),
                   jax.ShapeDtypeStruct((B, 1), jnp.int32),
                   jax.ShapeDtypeStruct((1, 1), jnp.float32)),
        # Explicit scoped-VMEM budget (review: set explicitly when scaling).
        compiler_params=pltpu.CompilerParams(vmem_limit_bytes=32 * 1024 * 1024),
    )(h, pos_emb, am, tt, labels2,
      packed["qkv_w"], packed["r_w"], packed["o_w"],
      packed["ff1_w"], packed["ff2_w"], packed["slab"],
      packed["summary_w"], packed["proj_w"], packed["head_b"])

    return {"loss": loss[0, 0], "logits": p1[:, 0], "preds": preds[:, 0]}


# ----------------------------- parameters ------------------------------------
def init_params(key, cfg):
    """Logical (HF-style) parameters, all f32."""
    D, N, DH, DI = cfg["d_model"], cfg["n_head"], cfg["d_head"], cfg["d_inner"]
    NH = N * DH
    ks = iter(jax.random.split(key, 256))

    def nrm(shape, s=0.02):
        return s * jax.random.normal(next(ks), shape, jnp.float32)

    params = {
        "word_emb": nrm((cfg["vocab"], D)),
        "summary_w": nrm((D, D)),
        "summary_b": nrm((D,)),
        "proj_w": nrm((D, cfg["n_labels"])),
        "proj_b": nrm((cfg["n_labels"],)),
        "layers": [],
    }
    for _ in range(cfg["n_layer"]):
        params["layers"].append({
            "q_w": nrm((D, NH)), "k_w": nrm((D, NH)), "v_w": nrm((D, NH)),
            "r_w": nrm((D, NH)),
            "o_w": nrm((NH, D)),
            "r_w_bias": nrm((NH,)), "r_r_bias": nrm((NH,)), "r_s_bias": nrm((NH,)),
            "seg_embed": nrm((2, NH)),
            "ln1_g": 1.0 + nrm((D,)), "ln1_b": nrm((D,)),
            "ff1_w": nrm((D, DI)), "ff1_b": nrm((DI,)),
            "ff2_w": nrm((DI, D)), "ff2_b": nrm((D,)),
            "ln2_g": 1.0 + nrm((D,)), "ln2_b": nrm((D,)),
        })
    return params


def pack_params(params, cfg):
    """Kernel operands: stacked bf16 weights, folded EF columns, param slabs."""
    D, N, DH, DI = cfg["d_model"], cfg["n_head"], cfg["d_head"], cfg["d_inner"]
    NH = N * DH
    SLW = max(DI, NH, D, 2 * N)

    qkv_w, r_w, o_w, ff1_w, ff2_w, slabs = [], [], [], [], [], []
    eye_n = jnp.eye(N, dtype=jnp.float32)
    for lp in params["layers"]:
        seg = lp["seg_embed"].reshape(2, N, DH)
        # Block-diagonal fold:  W_ef[(n,d), s*N + n'] = seg[s, n, d] * (n == n')
        w_ef = (seg.transpose(1, 2, 0)[:, :, :, None]
                * eye_n[:, None, None, :]).reshape(NH, 2 * N)
        ef_cols = lp["q_w"] @ w_ef                          # [D, 2N]
        ef_bias = lp["r_s_bias"].reshape(1, NH) @ w_ef      # [1, 2N]

        qkv_w.append(jnp.concatenate(
            [lp["q_w"], lp["k_w"], lp["v_w"], ef_cols], axis=1).astype(BF16))
        r_w.append(lp["r_w"].astype(BF16))
        o_w.append(lp["o_w"].astype(BF16))
        ff1_w.append(lp["ff1_w"].astype(BF16))
        ff2_w.append(lp["ff2_w"].astype(BF16))

        slab = jnp.zeros((9, SLW), jnp.float32)
        slab = slab.at[0, :NH].set(lp["r_w_bias"])
        slab = slab.at[1, :NH].set(lp["r_r_bias"])
        slab = slab.at[2, :2 * N].set(ef_bias.reshape(-1))
        slab = slab.at[3, :D].set(lp["ln1_g"])
        slab = slab.at[4, :D].set(lp["ln1_b"])
        slab = slab.at[5, :DI].set(lp["ff1_b"])
        slab = slab.at[6, :D].set(lp["ff2_b"])
        slab = slab.at[7, :D].set(lp["ln2_g"])
        slab = slab.at[8, :D].set(lp["ln2_b"])
        slabs.append(slab)

    head_b = jnp.zeros((2, D), jnp.float32)
    head_b = head_b.at[0, :D].set(params["summary_b"])
    head_b = head_b.at[1, :cfg["n_labels"]].set(params["proj_b"])

    return {
        "word_emb": params["word_emb"],
        "qkv_w": jnp.stack(qkv_w), "r_w": jnp.stack(r_w), "o_w": jnp.stack(o_w),
        "ff1_w": jnp.stack(ff1_w), "ff2_w": jnp.stack(ff2_w),
        "slab": jnp.stack(slabs),
        "summary_w": params["summary_w"].astype(BF16),
        "proj_w": params["proj_w"].astype(BF16),
        "head_b": head_b,
    }


# ----------------------- pure-JAX f32 reference -------------------------------
def xlnet_reference(params, input_ids, attention_mask, token_type_ids, labels,
                    fct_loss="MSELoss"):
    cfg = CFG
    B, L = input_ids.shape
    D, N, DH = cfg["d_model"], cfg["n_head"], cfg["d_head"]
    NH = N * DH
    scale = 1.0 / (DH ** 0.5)

    h = params["word_emb"][input_ids]                              # [B, L, D]
    pos_seq = jnp.arange(L, -L, -1.0, dtype=jnp.float32)
    inv_freq = 1.0 / (10000.0 ** (jnp.arange(0, D, 2, dtype=jnp.float32) / D))
    sinusoid = pos_seq[:, None] * inv_freq[None, :]
    pos_emb = jnp.concatenate([jnp.sin(sinusoid), jnp.cos(sinusoid)], -1)

    key_pad = attention_mask == 0
    eye = jnp.eye(L, dtype=bool)
    maskb = jnp.where(key_pad[:, None, :] & ~eye[None], -1e9, 0.0)
    segdiff = (token_type_ids[:, :, None]
               != token_type_ids[:, None, :]).astype(jnp.float32)

    for lp in params["layers"]:
        q = (h @ lp["q_w"]).reshape(B, L, N, DH)
        k = (h @ lp["k_w"]).reshape(B, L, N, DH)
        v = (h @ lp["v_w"]).reshape(B, L, N, DH)
        kr = (pos_emb @ lp["r_w"]).reshape(2 * L, N, DH)
        rwb = lp["r_w_bias"].reshape(N, DH)
        rrb = lp["r_r_bias"].reshape(N, DH)
        rsb = lp["r_s_bias"].reshape(N, DH)
        seg = lp["seg_embed"].reshape(2, N, DH)

        ac = jnp.einsum("bind,bjnd->bnij", q + rwb, k)
        bd_full = jnp.einsum("bind,pnd->bnip", q + rrb, kr)        # [B,N,L,2L]
        bd = jnp.stack([bd_full[:, :, i, L - i:2 * L - i] for i in range(L)],
                       axis=2)
        ef_s = jnp.einsum("bind,snd->bnis", q + rsb, seg)          # [B,N,L,2]
        ef = ef_s[..., 0:1] + segdiff[:, None] * (ef_s[..., 1:2] - ef_s[..., 0:1])

        score = (ac + bd + ef) * scale + maskb[:, None]
        p = jax.nn.softmax(score, axis=-1)
        attn = jnp.einsum("bnij,bjnd->bind", p, v).reshape(B, L, NH)
        h1 = _layernorm(attn @ lp["o_w"] + h, lp["ln1_g"], lp["ln1_b"], 1e-12)
        ff = jax.nn.gelu(h1 @ lp["ff1_w"] + lp["ff1_b"], approximate=True)
        ff = ff @ lp["ff2_w"] + lp["ff2_b"]
        h = _layernorm(ff + h1, lp["ln2_g"], lp["ln2_b"], 1e-12)

    last = h[:, -1]
    summary = jnp.tanh(last @ params["summary_w"] + params["summary_b"])
    logits = summary @ params["proj_w"] + params["proj_b"]
    p = jax.nn.softmax(logits, axis=-1)
    p1 = p[:, 1]
    y = jnp.asarray(labels, jnp.float32).reshape(-1)
    if fct_loss == "BCELoss":
        pc = jnp.clip(p1, 1e-7, 1.0 - 1e-7)
        loss = -jnp.mean(y * jnp.log(pc) + (1.0 - y) * jnp.log(1.0 - pc))
    else:
        loss = jnp.mean((p1 - y) ** 2)
    return {"loss": loss, "logits": p1, "preds": jnp.argmax(p, axis=-1)}


# ----------------------------- main -------------------------------------------
if __name__ == "__main__":
    key = jax.random.PRNGKey(0)
    B, L = 2, 8

    params = init_params(key, CFG)
    packed = pack_params(params, CFG)

    input_ids = jax.random.randint(jax.random.fold_in(key, 1), (B, L), 0,
                                   CFG["vocab"], dtype=jnp.int32)
    attention_mask = jnp.array([[1] * L, [1] * (L - 2) + [0, 0]],
                               dtype=jnp.float32)
    token_type_ids = jnp.array([[0] * (L // 2) + [1] * (L // 2), [0] * L],
                               dtype=jnp.int32)
    labels = jnp.array([1.0, 0.0], dtype=jnp.float32)

    # Probe the strided-roll convention once (falls back to slices if needed).
    rel_roll = detect_rel_roll(B, L)

    fwd = jax.jit(xlnet_forward, static_argnames=("fct_loss", "rel_roll"))
    out = fwd(packed, input_ids, attention_mask, token_type_ids, labels,
              fct_loss="MSELoss", rel_roll=rel_roll)
    jax.block_until_ready(out)

    ref = xlnet_reference(params, input_ids, attention_mask, token_type_ids,
                          labels, fct_loss="MSELoss")

    assert out["logits"].shape == (B,) and out["preds"].shape == (B,)
    assert bool(jnp.isfinite(out["loss"]))
    assert bool(jnp.all(jnp.isfinite(out["logits"])))
    assert jnp.allclose(out["logits"], ref["logits"], atol=5e-2)
    assert jnp.allclose(out["loss"], ref["loss"], atol=5e-2)
    print("KERNEL_OK")
</pallas_src>

<mosaic_0001>
module attributes {stable_mosaic.version = 11 : i64} {
  func.func @_probe_kernel(%arg0: memref<2x8x16xf32, #tpu.memory_space<vmem>>, %arg1: memref<2x8x8xf32, #tpu.memory_space<vmem>>) attributes {dimension_semantics = [], scalar_prefetch = 0 : i64, scratch_operands = 0 : i64, tpu.core_type = #tpu.core_type<tc>} {
    %c0 = arith.constant 0 : index
    %c0_0 = arith.constant 0 : index
    %c0_1 = arith.constant 0 : index
    %0 = vector.load %arg0[%c0, %c0_0, %c0_1] : memref<2x8x16xf32, #tpu.memory_space<vmem>>, vector<2x8x16xf32>
    %c8_i32 = arith.constant 8 : i32
    %1 = tpu.dynamic_rotate %0 by %c8_i32 dim 2 {stride = 1 : si32, stride_dimension = 1 : si32} : vector<2x8x16xf32>, i32 -> vector<2x8x16xf32>
    %2 = vector.extract_strided_slice %1 {offsets = [0, 0, 0], sizes = [2, 8, 8], strides = [1, 1, 1]} : vector<2x8x16xf32> to vector<2x8x8xf32>
    %c0_2 = arith.constant 0 : index
    %c0_3 = arith.constant 0 : index
    %c0_4 = arith.constant 0 : index
    %3 = vector.load %arg1[%c0_2, %c0_3, %c0_4] : memref<2x8x8xf32, #tpu.memory_space<vmem>>, vector<2x8x8xf32>
    tpu.vector_store %arg1[%c0_2, %c0_3, %c0_4], %2 {strides = array<i32>} : memref<2x8x8xf32, #tpu.memory_space<vmem>>, vector<2x8x8xf32>,
    return
  }
}

module attributes {stable_mosaic.version = 11 : i64} {
  func.func @_xlnet_fused_kernel(%arg0: memref<16x32xbf16, #tpu.memory_space<vmem>>, %arg1: memref<16x32xbf16, #tpu.memory_space<vmem>>, %arg2: memref<2x8xf32, #tpu.memory_space<vmem>>, %arg3: memref<2x8xf32, #tpu.memory_space<vmem>>, %arg4: memref<2x1xf32, #tpu.memory_space<vmem>>, %arg5: memref<2x32x104xbf16, #tpu.memory_space<vmem>>, %arg6: memref<2x32x32xbf16, #tpu.memory_space<vmem>>, %arg7: memref<2x32x32xbf16, #tpu.memory_space<vmem>>, %arg8: memref<2x32x64xbf16, #tpu.memory_space<vmem>>, %arg9: memref<2x64x32xbf16, #tpu.memory_space<vmem>>, %arg10: memref<2x9x64xf32, #tpu.memory_space<vmem>>, %arg11: memref<32x32xbf16, #tpu.memory_space<vmem>>, %arg12: memref<32x2xbf16, #tpu.memory_space<vmem>>, %arg13: memref<2x32xf32, #tpu.memory_space<vmem>>, %arg14: memref<2x1xf32, #tpu.memory_space<vmem>>, %arg15: memref<2x1xi32, #tpu.memory_space<vmem>>, %arg16: memref<1x1xf32, #tpu.memory_space<vmem>>) attributes {dimension_semantics = [], scalar_prefetch = 0 : i64, scratch_operands = 0 : i64, tpu.core_type = #tpu.core_type<tc>} {
    %c0 = arith.constant 0 : index
    %c0_0 = arith.constant 0 : index
    %0 = vector.load %arg2[%c0, %c0_0] : memref<2x8xf32, #tpu.memory_space<vmem>>, vector<2x8xf32>
    %c0_1 = arith.constant 0 : index
    %c0_2 = arith.constant 0 : index
    %1 = vector.load %arg3[%c0_1, %c0_2] : memref<2x8xf32, #tpu.memory_space<vmem>>, vector<2x8xf32>
    %2 = tpu.iota {dimensions = array<i32: 0>} : vector<8x8xi32>
    %3 = tpu.iota {dimensions = array<i32: 1>} : vector<8x8xi32>
    %4 = arith.cmpi ne, %2, %3 : vector<8x8xi32>
    %5 = arith.extui %4 : vector<8x8xi1> to vector<8x8xi32>
    %6 = arith.sitofp %5 : vector<8x8xi32> to vector<8x8xf32>
    %cst = arith.constant 0.000000e+00 : f32
    %7 = vector.broadcast %cst : f32 to vector<2x8xf32>
    %8 = arith.cmpf oeq, %0, %7 : vector<2x8xf32>
    %9 = arith.extui %8 : vector<2x8xi1> to vector<2x8xi32>
    %10 = arith.sitofp %9 : vector<2x8xi32> to vector<2x8xf32>
    %11 = vector.shape_cast %10 : vector<2x8xf32> to vector<2x1x8xf32>
    %12 = vector.shape_cast %6 : vector<8x8xf32> to vector<1x8x8xf32>
    %13 = vector.broadcast %11 : vector<2x1x8xf32> to vector<2x8x8xf32>
    %14 = vector.broadcast %12 : vector<1x8x8xf32> to vector<2x8x8xf32>
    %15 = arith.mulf %13, %14 : vector<2x8x8xf32>
    %cst_3 = arith.constant -1.000000e+09 : f32
    %16 = vector.broadcast %cst_3 : f32 to vector<2x8x8xf32>
    %17 = arith.mulf %15, %16 : vector<2x8x8xf32>
    %18 = vector.shape_cast %1 : vector<2x8xf32> to vector<2x8x1xf32>
    %19 = vector.shape_cast %1 : vector<2x8xf32> to vector<2x1x8xf32>
    %20 = vector.broadcast %18 : vector<2x8x1xf32> to vector<2x8x8xf32>
    %21 = vector.broadcast %19 : vector<2x1x8xf32> to vector<2x8x8xf32>
    %22 = arith.cmpf one, %20, %21 : vector<2x8x8xf32>
    %23 = arith.extui %22 : vector<2x8x8xi1> to vector<2x8x8xi32>
    %24 = arith.sitofp %23 : vector<2x8x8xi32> to vector<2x8x8xf32>
    %c0_4 = arith.constant 0 : index
    %c0_5 = arith.constant 0 : index
    %25 = vector.load %arg1[%c0_4, %c0_5] : memref<16x32xbf16, #tpu.memory_space<vmem>>, vector<16x32xbf16>
    %c0_6 = arith.constant 0 : index
    %c0_7 = arith.constant 0 : index
    %26 = vector.load %arg0[%c0_6, %c0_7] : memref<16x32xbf16, #tpu.memory_space<vmem>>, vector<16x32xbf16>
    %27 = arith.extf %26 : vector<16x32xbf16> to vector<16x32xf32>
    %c0_8 = arith.constant 0 : index
    %c0_9 = arith.constant 0 : index
    %c0_10 = arith.constant 0 : index
    %28 = vector.load %arg5[%c0_8, %c0_9, %c0_10] : memref<2x32x104xbf16, #tpu.memory_space<vmem>>, vector<1x32x104xbf16>
    %29 = vector.shape_cast %28 : vector<1x32x104xbf16> to vector<32x104xbf16>
    %c0_11 = arith.constant 0 : index
    %c0_12 = arith.constant 0 : index
    %c0_13 = arith.constant 0 : index
    %30 = vector.load %arg6[%c0_11, %c0_12, %c0_13] : memref<2x32x32xbf16, #tpu.memory_space<vmem>>, vector<1x32x32xbf16>
    %31 = vector.shape_cast %30 : vector<1x32x32xbf16> to vector<32x32xbf16>
    %c0_14 = arith.constant 0 : index
    %c0_15 = arith.constant 0 : index
    %c0_16 = arith.constant 0 : index
    %32 = vector.load %arg7[%c0_14, %c0_15, %c0_16] : memref<2x32x32xbf16, #tpu.memory_space<vmem>>, vector<1x32x32xbf16>
    %33 = vector.shape_cast %32 : vector<1x32x32xbf16> to vector<32x32xbf16>
    %c0_17 = arith.constant 0 : index
    %c0_18 = arith.constant 0 : index
    %c0_19 = arith.constant 0 : index
    %34 = vector.load %arg8[%c0_17, %c0_18, %c0_19] : memref<2x32x64xbf16, #tpu.memory_space<vmem>>, vector<1x32x64xbf16>
    %35 = vector.shape_cast %34 : vector<1x32x64xbf16> to vector<32x64xbf16>
    %c0_20 = arith.constant 0 : index
    %c0_21 = arith.constant 0 : index
    %c0_22 = arith.constant 0 : index
    %36 = vector.load %arg9[%c0_20, %c0_21, %c0_22] : memref<2x64x32xbf16, #tpu.memory_space<vmem>>, vector<1x64x32xbf16>
    %37 = vector.shape_cast %36 : vector<1x64x32xbf16> to vector<64x32xbf16>
    %c0_23 = arith.constant 0 : index
    %c0_24 = arith.constant 0 : index
    %c0_25 = arith.constant 0 : index
    %38 = vector.load %arg10[%c0_23, %c0_24, %c0_25] : memref<2x9x64xf32, #tpu.memory_space<vmem>>, vector<1x9x64xf32>
    %39 = vector.shape_cast %38 : vector<1x9x64xf32> to vector<9x64xf32>
    %40 = vector.extract_strided_slice %39 {offsets = [0, 0], sizes = [1, 32], strides = [1, 1]} : vector<9x64xf32> to vector<1x32xf32>
    %41 = vector.extract_strided_slice %39 {offsets = [1, 0], sizes = [1, 32], strides = [1, 1]} : vector<9x64xf32> to vector<1x32xf32>
    %42 = vector.extract_strided_slice %39 {offsets = [2, 0], sizes = [1, 8], strides = [1, 1]} : vector<9x64xf32> to vector<1x8xf32>
    %43 = vector.extract_strided_slice %39 {offsets = [3, 0], sizes = [1, 32], strides = [1, 1]} : vector<9x64xf32> to vector<1x32xf32>
    %44 = vector.extract_strided_slice %39 {offsets = [4, 0], sizes = [1, 32], strides = [1, 1]} : vector<9x64xf32> to vector<1x32xf32>
    %45 = vector.extract_strided_slice %39 {offsets = [5, 0], sizes = [1, 64], strides = [1, 1]} : vector<9x64xf32> to vector<1x64xf32>
    %46 = vector.extract_strided_slice %39 {offsets = [6, 0], sizes = [1, 32], strides = [1, 1]} : vector<9x64xf32> to vector<1x32xf32>
    %47 = vector.extract_strided_slice %39 {offsets = [7, 0], sizes = [1, 32], strides = [1, 1]} : vector<9x64xf32> to vector<1x32xf32>
    %48 = vector.extract_strided_slice %39 {offsets = [8, 0], sizes = [1, 32], strides = [1, 1]} : vector<9x64xf32> to vector<1x32xf32>
    %49 = arith.truncf %27 : vector<16x32xf32> to vector<16x32xbf16>
    %cst_26 = arith.constant dense<0.000000e+00> : vector<16x104xf32>
    %50 = tpu.matmul %49, %29, %cst_26 {dimension_numbers = #tpu.dot_dimension_numbers<[1], [0], [0], [1], [0, 0, 1, 1], [], []>} : vector<16x32xbf16>, vector<32x104xbf16>, vector<16x104xf32> -> vector<16x104xf32>
    %cst_27 = arith.constant dense<0.000000e+00> : vector<16x32xf32>
    %51 = tpu.matmul %25, %31, %cst_27 {dimension_numbers = #tpu.dot_dimension_numbers<[1], [0], [0], [1], [0, 0, 1, 1], [], []>} : vector<16x32xbf16>, vector<32x32xbf16>, vector<16x32xf32> -> vector<16x32xf32>
    %52 = vector.extract_strided_slice %50 {offsets = [0, 0], sizes = [16, 32], strides = [1, 1]} : vector<16x104xf32> to vector<16x32xf32>
    %53 = vector.extract_strided_slice %50 {offsets = [0, 32], sizes = [16, 32], strides = [1, 1]} : vector<16x104xf32> to vector<16x32xf32>
    %54 = vector.extract_strided_slice %50 {offsets = [0, 64], sizes = [16, 32], strides = [1, 1]} : vector<16x104xf32> to vector<16x32xf32>
    %55 = vector.extract_strided_slice %50 {offsets = [0, 96], sizes = [16, 8], strides = [1, 1]} : vector<16x104xf32> to vector<16x8xf32>
    %56 = vector.broadcast %42 : vector<1x8xf32> to vector<16x8xf32>
    %57 = arith.addf %55, %56 : vector<16x8xf32>
    %58 = vector.broadcast %40 : vector<1x32xf32> to vector<16x32xf32>
    %59 = arith.addf %52, %58 : vector<16x32xf32>
    %60 = vector.broadcast %41 : vector<1x32xf32> to vector<16x32xf32>
    %61 = arith.addf %52, %60 : vector<16x32xf32>
    %62 = vector.extract_strided_slice %53 {offsets = [0, 0], sizes = [16, 8], strides = [1, 1]} : vector<16x32xf32> to vector<16x8xf32>
    %63 = vector.shape_cast %62 : vector<16x8xf32> to vector<2x8x8xf32>
    %64 = arith.truncf %63 : vector<2x8x8xf32> to vector<2x8x8xbf16>
    %65 = vector.extract_strided_slice %54 {offsets = [0, 0], sizes = [16, 8], strides = [1, 1]} : vector<16x32xf32> to vector<16x8xf32>
    %66 = vector.shape_cast %65 : vector<16x8xf32> to vector<2x8x8xf32>
    %67 = arith.truncf %66 : vector<2x8x8xf32> to vector<2x8x8xbf16>
    %68 = vector.extract_strided_slice %59 {offsets = [0, 0], sizes = [16, 8], strides = [1, 1]} : vector<16x32xf32> to vector<16x8xf32>
    %69 = vector.shape_cast %68 : vector<16x8xf32> to vector<2x8x8xf32>
    %70 = arith.truncf %69 : vector<2x8x8xf32> to vector<2x8x8xbf16>
    %71 = vector.extract_strided_slice %61 {offsets = [0, 0], sizes = [16, 8], strides = [1, 1]} : vector<16x32xf32> to vector<16x8xf32>
    %72 = arith.truncf %71 : vector<16x8xf32> to vector<16x8xbf16>
    %73 = vector.extract_strided_slice %51 {offsets = [0, 0], sizes = [16, 8], strides = [1, 1]} : vector<16x32xf32> to vector<16x8xf32>
    %74 = arith.truncf %73 : vector<16x8xf32> to vector<16x8xbf16>
    "tpu.trace_start"() <{level = 10 : i32, message = "bid,bjd->bij"}> : () -> ()
    %cst_28 = arith.constant dense<0.000000e+00> : vector<2x8x8xf32>
    %75 = tpu.matmul %70, %64, %cst_28 {dimension_numbers = #tpu.dot_dimension_numbers<[2], [2], [1], [1], [0, 0, 0, 1, 1, 1], [0], [0]>} : vector<2x8x8xbf16>, vector<2x8x8xbf16>, vector<2x8x8xf32> -> vector<2x8x8xf32>
    "tpu.trace_stop"() : () -> ()
    "tpu.trace_start"() <{level = 10 : i32, message = "md,pd->mp"}> : () -> ()
    %cst_29 = arith.constant dense<0.000000e+00> : vector<16x16xf32>
    %76 = tpu.matmul %72, %74, %cst_29 {dimension_numbers = #tpu.dot_dimension_numbers<[1], [1], [0], [0], [0, 0, 1, 0], [], []>} : vector<16x8xbf16>, vector<16x8xbf16>, vector<16x16xf32> -> vector<16x16xf32>
    "tpu.trace_stop"() : () -> ()
    %77 = vector.shape_cast %76 : vector<16x16xf32> to vector<2x8x16xf32>
    %78 = vector.extract_strided_slice %77 {offsets = [0, 0, 8], sizes = [2, 1, 8], strides = [1, 1, 1]} : vector<2x8x16xf32> to vector<2x1x8xf32>
    %79 = vector.extract_strided_slice %77 {offsets = [0, 1, 7], sizes = [2, 1, 8], strides = [1, 1, 1]} : vector<2x8x16xf32> to vector<2x1x8xf32>
    %80 = vector.extract_strided_slice %77 {offsets = [0, 2, 6], sizes = [2, 1, 8], strides = [1, 1, 1]} : vector<2x8x16xf32> to vector<2x1x8xf32>
    %81 = vector.extract_strided_slice %77 {offsets = [0, 3, 5], sizes = [2, 1, 8], strides = [1, 1, 1]} : vector<2x8x16xf32> to vector<2x1x8xf32>
    %82 = vector.extract_strided_slice %77 {offsets = [0, 4, 4], sizes = [2, 1, 8], strides = [1, 1, 1]} : vector<2x8x16xf32> to vector<2x1x8xf32>
    %83 = vector.extract_strided_slice %77 {offsets = [0, 5, 3], sizes = [2, 1, 8], strides = [1, 1, 1]} : vector<2x8x16xf32> to vector<2x1x8xf32>
    %84 = vector.extract_strided_slice %77 {offsets = [0, 6, 2], sizes = [2, 1, 8], strides = [1, 1, 1]} : vector<2x8x16xf32> to vector<2x1x8xf32>
    %85 = vector.extract_strided_slice %77 {offsets = [0, 7, 1], sizes = [2, 1, 8], strides = [1, 1, 1]} : vector<2x8x16xf32> to vector<2x1x8xf32>
    %86 = tpu.concatenate %78, %79, %80, %81, %82, %83, %84, %85 in 1 : vector<2x1x8xf32>, vector<2x1x8xf32>, vector<2x1x8xf32>, vector<2x1x8xf32>, vector<2x1x8xf32>, vector<2x1x8xf32>, vector<2x1x8xf32>, vector<2x1x8xf32> -> vector<2x8x8xf32>
    %87 = vector.extract_strided_slice %57 {offsets = [0, 0], sizes = [16, 1], strides = [1, 1]} : vector<16x8xf32> to vector<16x1xf32>
    %88 = vector.shape_cast %87 : vector<16x1xf32> to vector<2x8x1xf32>
    %89 = vector.extract_strided_slice %57 {offsets = [0, 4], sizes = [16, 1], strides = [1, 1]} : vector<16x8xf32> to vector<16x1xf32>
    %90 = vector.shape_cast %89 : vector<16x1xf32> to vector<2x8x1xf32>
    %91 = arith.subf %90, %88 : vector<2x8x1xf32>
    %92 = vector.broadcast %91 : vector<2x8x1xf32> to vector<2x8x8xf32>
    %93 = arith.mulf %24, %92 : vector<2x8x8xf32>
    %94 = vector.broadcast %88 : vector<2x8x1xf32> to vector<2x8x8xf32>
    %95 = arith.addf %94, %93 : vector<2x8x8xf32>
    %96 = arith.addf %75, %86 : vector<2x8x8xf32>
    %97 = arith.addf %96, %95 : vector<2x8x8xf32>
    %cst_30 = arith.constant 0.353553385 : f32
    %98 = vector.broadcast %cst_30 : f32 to vector<2x8x8xf32>
    %99 = arith.mulf %97, %98 : vector<2x8x8xf32>
    %100 = arith.addf %99, %17 : vector<2x8x8xf32>
    %cst_31 = arith.constant dense<0xFF800000> : vector<2x8xf32>
    %101 = vector.multi_reduction <maximumf>, %100, %cst_31 [2] : vector<2x8x8xf32> to vector<2x8xf32>
    %102 = vector.shape_cast %101 : vector<2x8xf32> to vector<2x8x1xf32>
    %103 = vector.broadcast %102 : vector<2x8x1xf32> to vector<2x8x8xf32>
    %104 = arith.subf %100, %103 : vector<2x8x8xf32>
    %105 = math.exp %104 : vector<2x8x8xf32>
    %cst_32 = arith.constant dense<0.000000e+00> : vector<2x8xf32>
    %106 = vector.multi_reduction <add>, %105, %cst_32 [2] : vector<2x8x8xf32> to vector<2x8xf32>
    %107 = vector.shape_cast %106 : vector<2x8xf32> to vector<2x8x1xf32>
    %108 = tpu.reciprocal %107 {approx = true} : vector<2x8x1xf32> -> vector<2x8x1xf32>
    %109 = vector.broadcast %108 : vector<2x8x1xf32> to vector<2x8x8xf32>
    %110 = arith.mulf %105, %109 : vector<2x8x8xf32>
    %111 = arith.truncf %110 : vector<2x8x8xf32> to vector<2x8x8xbf16>
    "tpu.trace_start"() <{level = 10 : i32, message = "bij,bjd->bid"}> : () -> ()
    %cst_33 = arith.constant dense<0.000000e+00> : vector<2x8x8xf32>
    %112 = tpu.matmul %111, %67, %cst_33 {dimension_numbers = #tpu.dot_dimension_numbers<[2], [1], [1], [2], [0, 0, 0, 1, 1, 2], [0], [0]>} : vector<2x8x8xbf16>, vector<2x8x8xbf16>, vector<2x8x8xf32> -> vector<2x8x8xf32>
    "tpu.trace_stop"() : () -> ()
    %113 = vector.shape_cast %112 : vector<2x8x8xf32> to vector<16x8xf32>
    %114 = vector.extract_strided_slice %53 {offsets = [0, 8], sizes = [16, 8], strides = [1, 1]} : vector<16x32xf32> to vector<16x8xf32>
    %115 = vector.shape_cast %114 : vector<16x8xf32> to vector<2x8x8xf32>
    %116 = arith.truncf %115 : vector<2x8x8xf32> to vector<2x8x8xbf16>
    %117 = vector.extract_strided_slice %54 {offsets = [0, 8], sizes = [16, 8], strides = [1, 1]} : vector<16x32xf32> to vector<16x8xf32>
    %118 = vector.shape_cast %117 : vector<16x8xf32> to vector<2x8x8xf32>
    %119 = arith.truncf %118 : vector<2x8x8xf32> to vector<2x8x8xbf16>
    %120 = vector.extract_strided_slice %59 {offsets = [0, 8], sizes = [16, 8], strides = [1, 1]} : vector<16x32xf32> to vector<16x8xf32>
    %121 = vector.shape_cast %120 : vector<16x8xf32> to vector<2x8x8xf32>
    %122 = arith.truncf %121 : vector<2x8x8xf32> to vector<2x8x8xbf16>
    %123 = vector.extract_strided_slice %61 {offsets = [0, 8], sizes = [16, 8], strides = [1, 1]} : vector<16x32xf32> to vector<16x8xf32>
    %124 = arith.truncf %123 : vector<16x8xf32> to vector<16x8xbf16>
    %125 = vector.extract_strided_slice %51 {offsets = [0, 8], sizes = [16, 8], strides = [1, 1]} : vector<16x32xf32> to vector<16x8xf32>
    %126 = arith.truncf %125 : vector<16x8xf32> to vector<16x8xbf16>
    "tpu.trace_start"() <{level = 10 : i32, message = "bid,bjd->bij"}> : () -> ()
    %cst_34 = arith.constant dense<0.000000e+00> : vector<2x8x8xf32>
    %127 = tpu.matmul %122, %116, %cst_34 {dimension_numbers = #tpu.dot_dimension_numbers<[2], [2], [1], [1], [0, 0, 0, 1, 1, 1], [0], [0]>} : vector<2x8x8xbf16>, vector<2x8x8xbf16>, vector<2x8x8xf32> -> vector<2x8x8xf32>
    "tpu.trace_stop"() : () -> ()
    "tpu.trace_start"() <{level = 10 : i32, message = "md,pd->mp"}> : () -> ()
    %cst_35 = arith.constant dense<0.000000e+00> : vector<16x16xf32>
    %128 = tpu.matmul %124, %126, %cst_35 {dimension_numbers = #tpu.dot_dimension_numbers<[1], [1], [0], [0], [0, 0, 1, 0], [], []>} : vector<16x8xbf16>, vector<16x8xbf16>, vector<16x16xf32> -> vector<16x16xf32>
    "tpu.trace_stop"() : () -> ()
    %129 = vector.shape_cast %128 : vector<16x16xf32> to vector<2x8x16xf32>
    %130 = vector.extract_strided_slice %129 {offsets = [0, 0, 8], sizes = [2, 1, 8], strides = [1, 1, 1]} : vector<2x8x16xf32> to vector<2x1x8xf32>
    %131 = vector.extract_strided_slice %129 {offsets = [0, 1, 7], sizes = [2, 1, 8], strides = [1, 1, 1]} : vector<2x8x16xf32> to vector<2x1x8xf32>
    %132 = vector.extract_strided_slice %129 {offsets = [0, 2, 6], sizes = [2, 1, 8], strides = [1, 1, 1]} : vector<2x8x16xf32> to vector<2x1x8xf32>
    %133 = vector.extract_strided_slice %129 {offsets = [0, 3, 5], sizes = [2, 1, 8], strides = [1, 1, 1]} : vector<2x8x16xf32> to vector<2x1x8xf32>
    %134 = vector.extract_strided_slice %129 {offsets = [0, 4, 4], sizes = [2, 1, 8], strides = [1, 1, 1]} : vector<2x8x16xf32> to vector<2x1x8xf32>
    %135 = vector.extract_strided_slice %129 {offsets = [0, 5, 3], sizes = [2, 1, 8], strides = [1, 1, 1]} : vector<2x8x16xf32> to vector<2x1x8xf32>
    %136 = vector.extract_strided_slice %129 {offsets = [0, 6, 2], sizes = [2, 1, 8], strides = [1, 1, 1]} : vector<2x8x16xf32> to vector<2x1x8xf32>
    %137 = vector.extract_strided_slice %129 {offsets = [0, 7, 1], sizes = [2, 1, 8], strides = [1, 1, 1]} : vector<2x8x16xf32> to vector<2x1x8xf32>
    %138 = tpu.concatenate %130, %131, %132, %133, %134, %135, %136, %137 in 1 : vector<2x1x8xf32>, vector<2x1x8xf32>, vector<2x1x8xf32>, vector<2x1x8xf32>, vector<2x1x8xf32>, vector<2x1x8xf32>, vector<2x1x8xf32>, vector<2x1x8xf32> -> vector<2x8x8xf32>
    %139 = vector.extract_strided_slice %57 {offsets = [0, 1], sizes = [16, 1], strides = [1, 1]} : vector<16x8xf32> to vector<16x1xf32>
    %140 = vector.shape_cast %139 : vector<16x1xf32> to vector<2x8x1xf32>
    %141 = vector.extract_strided_slice %57 {offsets = [0, 5], sizes = [16, 1], strides = [1, 1]} : vector<16x8xf32> to vector<16x1xf32>
    %142 = vector.shape_cast %141 : vector<16x1xf32> to vector<2x8x1xf32>
    %143 = arith.subf %142, %140 : vector<2x8x1xf32>
    %144 = vector.broadcast %143 : vector<2x8x1xf32> to vector<2x8x8xf32>
    %145 = arith.mulf %24, %144 : vector<2x8x8xf32>
    %146 = vector.broadcast %140 : vector<2x8x1xf32> to vector<2x8x8xf32>
    %147 = arith.addf %146, %145 : vector<2x8x8xf32>
    %148 = arith.addf %127, %138 : vector<2x8x8xf32>
    %149 = arith.addf %148, %147 : vector<2x8x8xf32>
    %cst_36 = arith.constant 0.353553385 : f32
    %150 = vector.broadcast %cst_36 : f32 to vector<2x8x8xf32>
    %151 = arith.mulf %149, %150 : vector<2x8x8xf32>
    %152 = arith.addf %151, %17 : vector<2x8x8xf32>
    %cst_37 = arith.constant dense<0xFF800000> : vector<2x8xf32>
    %153 = vector.multi_reduction <maximumf>, %152, %cst_37 [2] : vector<2x8x8xf32> to vector<2x8xf32>
    %154 = vector.shape_cast %153 : vector<2x8xf32> to vector<2x8x1xf32>
    %155 = vector.broadcast %154 : vector<2x8x1xf32> to vector<2x8x8xf32>
    %156 = arith.subf %152, %155 : vector<2x8x8xf32>
    %157 = math.exp %156 : vector<2x8x8xf32>
    %cst_38 = arith.constant dense<0.000000e+00> : vector<2x8xf32>
    %158 = vector.multi_reduction <add>, %157, %cst_38 [2] : vector<2x8x8xf32> to vector<2x8xf32>
    %159 = vector.shape_cast %158 : vector<2x8xf32> to vector<2x8x1xf32>
    %160 = tpu.reciprocal %159 {approx = true} : vector<2x8x1xf32> -> vector<2x8x1xf32>
    %161 = vector.broadcast %160 : vector<2x8x1xf32> to vector<2x8x8xf32>
    %162 = arith.mulf %157, %161 : vector<2x8x8xf32>
    %163 = arith.truncf %162 : vector<2x8x8xf32> to vector<2x8x8xbf16>
    "tpu.trace_start"() <{level = 10 : i32, message = "bij,bjd->bid"}> : () -> ()
    %cst_39 = arith.constant dense<0.000000e+00> : vector<2x8x8xf32>
    %164 = tpu.matmul %163, %119, %cst_39 {dimension_numbers = #tpu.dot_dimension_numbers<[2], [1], [1], [2], [0, 0, 0, 1, 1, 2], [0], [0]>} : vector<2x8x8xbf16>, vector<2x8x8xbf16>, vector<2x8x8xf32> -> vector<2x8x8xf32>
    "tpu.trace_stop"() : () -> ()
    %165 = vector.shape_cast %164 : vector<2x8x8xf32> to vector<16x8xf32>
    %166 = vector.extract_strided_slice %53 {offsets = [0, 16], sizes = [16, 8], strides = [1, 1]} : vector<16x32xf32> to vector<16x8xf32>
    %167 = vector.shape_cast %166 : vector<16x8xf32> to vector<2x8x8xf32>
    %168 = arith.truncf %167 : vector<2x8x8xf32> to vector<2x8x8xbf16>
    %169 = vector.extract_strided_slice %54 {offsets = [0, 16], sizes = [16, 8], strides = [1, 1]} : vector<16x32xf32> to vector<16x8xf32>
    %170 = vector.shape_cast %169 : vector<16x8xf32> to vector<2x8x8xf32>
    %171 = arith.truncf %170 : vector<2x8x8xf32> to vector<2x8x8xbf16>
    %172 = vector.extract_strided_slice %59 {offsets = [0, 16], sizes = [16, 8], strides = [1, 1]} : vector<16x32xf32> to vector<16x8xf32>
    %173 = vector.shape_cast %172 : vector<16x8xf32> to vector<2x8x8xf32>
    %174 = arith.truncf %173 : vector<2x8x8xf32> to vector<2x8x8xbf16>
    %175 = vector.extract_strided_slice %61 {offsets = [0, 16], sizes = [16, 8], strides = [1, 1]} : vector<16x32xf32> to vector<16x8xf32>
    %176 = arith.truncf %175 : vector<16x8xf32> to vector<16x8xbf16>
    %177 = vector.extract_strided_slice %51 {offsets = [0, 16], sizes = [16, 8], strides = [1, 1]} : vector<16x32xf32> to vector<16x8xf32>
    %178 = arith.truncf %177 : vector<16x8xf32> to vector<16x8xbf16>
    "tpu.trace_start"() <{level = 10 : i32, message = "bid,bjd->bij"}> : () -> ()
    %cst_40 = arith.constant dense<0.000000e+00> : vector<2x8x8xf32>
    %179 = tpu.matmul %174, %168, %cst_40 {dimension_numbers = #tpu.dot_dimension_numbers<[2], [2], [1], [1], [0, 0, 0, 1, 1, 1], [0], [0]>} : vector<2x8x8xbf16>, vector<2x8x8xbf16>, vector<2x8x8xf32> -> vector<2x8x8xf32>
    "tpu.trace_stop"() : () -> ()
    "tpu.trace_start"() <{level = 10 : i32, message = "md,pd->mp"}> : () -> ()
    %cst_41 = arith.constant dense<0.000000e+00> : vector<16x16xf32>
    %180 = tpu.matmul %176, %178, %cst_41 {dimension_numbers = #tpu.dot_dimension_numbers<[1], [1], [0], [0], [0, 0, 1, 0], [], []>} : vector<16x8xbf16>, vector<16x8xbf16>, vector<16x16xf32> -> vector<16x16xf32>
    "tpu.trace_stop"() : () -> ()
    %181 = vector.shape_cast %180 : vector<16x16xf32> to vector<2x8x16xf32>
    %182 = vector.extract_strided_slice %181 {offsets = [0, 0, 8], sizes = [2, 1, 8], strides = [1, 1, 1]} : vector<2x8x16xf32> to vector<2x1x8xf32>
    %183 = vector.extract_strided_slice %181 {offsets = [0, 1, 7], sizes = [2, 1, 8], strides = [1, 1, 1]} : vector<2x8x16xf32> to vector<2x1x8xf32>
    %184 = vector.extract_strided_slice %181 {offsets = [0, 2, 6], sizes = [2, 1, 8], strides = [1, 1, 1]} : vector<2x8x16xf32> to vector<2x1x8xf32>
    %185 = vector.extract_strided_slice %181 {offsets = [0, 3, 5], sizes = [2, 1, 8], strides = [1, 1, 1]} : vector<2x8x16xf32> to vector<2x1x8xf32>
    %186 = vector.extract_strided_slice %181 {offsets = [0, 4, 4], sizes = [2, 1, 8], strides = [1, 1, 1]} : vector<2x8x16xf32> to vector<2x1x8xf32>
    %187 = vector.extract_strided_slice %181 {offsets = [0, 5, 3], sizes = [2, 1, 8], strides = [1, 1, 1]} : vector<2x8x16xf32> to vector<2x1x8xf32>
    %188 = vector.extract_strided_slice %181 {offsets = [0, 6, 2], sizes = [2, 1, 8], strides = [1, 1, 1]} : vector<2x8x16xf32> to vector<2x1x8xf32>
    %189 = vector.extract_strided_slice %181 {offsets = [0, 7, 1], sizes = [2, 1, 8], strides = [1, 1, 1]} : vector<2x8x16xf32> to vector<2x1x8xf32>
    %190 = tpu.concatenate %182, %183, %184, %185, %186, %187, %188, %189 in 1 : vector<2x1x8xf32>, vector<2x1x8xf32>, vector<2x1x8xf32>, vector<2x1x8xf32>, vector<2x1x8xf32>, vector<2x1x8xf32>, vector<2x1x8xf32>, vector<2x1x8xf32> -> vector<2x8x8xf32>
    %191 = vector.extract_strided_slice %57 {offsets = [0, 2], sizes = [16, 1], strides = [1, 1]} : vector<16x8xf32> to vector<16x1xf32>
    %192 = vector.shape_cast %191 : vector<16x1xf32> to vector<2x8x1xf32>
    %193 = vector.extract_strided_slice %57 {offsets = [0, 6], sizes = [16, 1], strides = [1, 1]} : vector<16x8xf32> to vector<16x1xf32>
    %194 = vector.shape_cast %193 : vector<16x1xf32> to vector<2x8x1xf32>
    %195 = arith.subf %194, %192 : vector<2x8x1xf32>
    %196 = vector.broadcast %195 : vector<2x8x1xf32> to vector<2x8x8xf32>
    %197 = arith.mulf %24, %196 : vector<2x8x8xf32>
    %198 = vector.broadcast %192 : vector<2x8x1xf32> to vector<2x8x8xf32>
    %199 = arith.addf %198, %197 : vector<2x8x8xf32>
    %200 = arith.addf %179, %190 : vector<2x8x8xf32>
    %201 = arith.addf %200, %199 : vector<2x8x8xf32>
    %cst_42 = arith.constant 0.353553385 : f32
    %202 = vector.broadcast %cst_42 : f32 to vector<2x8x8xf32>
    %203 = arith.mulf %201, %202 : vector<2x8x8xf32>
    %204 = arith.addf %203, %17 : vector<2x8x8xf32>
    %cst_43 = arith.constant dense<0xFF800000> : vector<2x8xf32>
    %205 = vector.multi_reduction <maximumf>, %204, %cst_43 [2] : vector<2x8x8xf32> to vector<2x8xf32>
    %206 = vector.shape_cast %205 : vector<2x8xf32> to vector<2x8x1xf32>
    %207 = vector.broadcast %206 : vector<2x8x1xf32> to vector<2x8x8xf32>
    %208 = arith.subf %204, %207 : vector<2x8x8xf32>
    %209 = math.exp %208 : vector<2x8x8xf32>
    %cst_44 = arith.constant dense<0.000000e+00> : vector<2x8xf32>
    %210 = vector.multi_reduction <add>, %209, %cst_44 [2] : vector<2x8x8xf32> to vector<2x8xf32>
    %211 = vector.shape_cast %210 : vector<2x8xf32> to vector<2x8x1xf32>
    %212 = tpu.reciprocal %211 {approx = true} : vector<2x8x1xf32> -> vector<2x8x1xf32>
    %213 = vector.broadcast %212 : vector<2x8x1xf32> to vector<2x8x8xf32>
    %214 = arith.mulf %209, %213 : vector<2x8x8xf32>
    %215 = arith.truncf %214 : vector<2x8x8xf32> to vector<2x8x8xbf16>
    "tpu.trace_start"() <{level = 10 : i32, message = "bij,bjd->bid"}> : () -> ()
    %cst_45 = arith.constant dense<0.000000e+00> : vector<2x8x8xf32>
    %216 = tpu.matmul %215, %171, %cst_45 {dimension_numbers = #tpu.dot_dimension_numbers<[2], [1], [1], [2], [0, 0, 0, 1, 1, 2], [0], [0]>} : vector<2x8x8xbf16>, vector<2x8x8xbf16>, vector<2x8x8xf32> -> vector<2x8x8xf32>
    "tpu.trace_stop"() : () -> ()
    %217 = vector.shape_cast %216 : vector<2x8x8xf32> to vector<16x8xf32>
    %218 = vector.extract_strided_slice %53 {offsets = [0, 24], sizes = [16, 8], strides = [1, 1]} : vector<16x32xf32> to vector<16x8xf32>
    %219 = vector.shape_cast %218 : vector<16x8xf32> to vector<2x8x8xf32>
    %220 = arith.truncf %219 : vector<2x8x8xf32> to vector<2x8x8xbf16>
    %221 = vector.extract_strided_slice %54 {offsets = [0, 24], sizes = [16, 8], strides = [1, 1]} : vector<16x32xf32> to vector<16x8xf32>
    %222 = vector.shape_cast %221 : vector<16x8xf32> to vector<2x8x8xf32>
    %223 = arith.truncf %222 : vector<2x8x8xf32> to vector<2x8x8xbf16>
    %224 = vector.extract_strided_slice %59 {offsets = [0, 24], sizes = [16, 8], strides = [1, 1]} : vector<16x32xf32> to vector<16x8xf32>
    %225 = vector.shape_cast %224 : vector<16x8xf32> to vector<2x8x8xf32>
    %226 = arith.truncf %225 : vector<2x8x8xf32> to vector<2x8x8xbf16>
    %227 = vector.extract_strided_slice %61 {offsets = [0, 24], sizes = [16, 8], strides = [1, 1]} : vector<16x32xf32> to vector<16x8xf32>
    %228 = arith.truncf %227 : vector<16x8xf32> to vector<16x8xbf16>
    %229 = vector.extract_strided_slice %51 {offsets = [0, 24], sizes = [16, 8], strides = [1, 1]} : vector<16x32xf32> to vector<16x8xf32>
    %230 = arith.truncf %229 : vector<16x8xf32> to vector<16x8xbf16>
    "tpu.trace_start"() <{level = 10 : i32, message = "bid,bjd->bij"}> : () -> ()
    %cst_46 = arith.constant dense<0.000000e+00> : vector<2x8x8xf32>
    %231 = tpu.matmul %226, %220, %cst_46 {dimension_numbers = #tpu.dot_dimension_numbers<[2], [2], [1], [1], [0, 0, 0, 1, 1, 1], [0], [0]>} : vector<2x8x8xbf16>, vector<2x8x8xbf16>, vector<2x8x8xf32> -> vector<2x8x8xf32>
    "tpu.trace_stop"() : () -> ()
    "tpu.trace_start"() <{level = 10 : i32, message = "md,pd->mp"}> : () -> ()
    %cst_47 = arith.constant dense<0.000000e+00> : vector<16x16xf32>
    %232 = tpu.matmul %228, %230, %cst_47 {dimension_numbers = #tpu.dot_dimension_numbers<[1], [1], [0], [0], [0, 0, 1, 0], [], []>} : vector<16x8xbf16>, vector<16x8xbf16>, vector<16x16xf32> -> vector<16x16xf32>
    "tpu.trace_stop"() : () -> ()
    %233 = vector.shape_cast %232 : vector<16x16xf32> to vector<2x8x16xf32>
    %234 = vector.extract_strided_slice %233 {offsets = [0, 0, 8], sizes = [2, 1, 8], strides = [1, 1, 1]} : vector<2x8x16xf32> to vector<2x1x8xf32>
    %235 = vector.extract_strided_slice %233 {offsets = [0, 1, 7], sizes = [2, 1, 8], strides = [1, 1, 1]} : vector<2x8x16xf32> to vector<2x1x8xf32>
    %236 = vector.extract_strided_slice %233 {offsets = [0, 2, 6], sizes = [2, 1, 8], strides = [1, 1, 1]} : vector<2x8x16xf32> to vector<2x1x8xf32>
    %237 = vector.extract_strided_slice %233 {offsets = [0, 3, 5], sizes = [2, 1, 8], strides = [1, 1, 1]} : vector<2x8x16xf32> to vector<2x1x8xf32>
    %238 = vector.extract_strided_slice %233 {offsets = [0, 4, 4], sizes = [2, 1, 8], strides = [1, 1, 1]} : vector<2x8x16xf32> to vector<2x1x8xf32>
    %239 = vector.extract_strided_slice %233 {offsets = [0, 5, 3], sizes = [2, 1, 8], strides = [1, 1, 1]} : vector<2x8x16xf32> to vector<2x1x8xf32>
    %240 = vector.extract_strided_slice %233 {offsets = [0, 6, 2], sizes = [2, 1, 8], strides = [1, 1, 1]} : vector<2x8x16xf32> to vector<2x1x8xf32>
    %241 = vector.extract_strided_slice %233 {offsets = [0, 7, 1], sizes = [2, 1, 8], strides = [1, 1, 1]} : vector<2x8x16xf32> to vector<2x1x8xf32>
    %242 = tpu.concatenate %234, %235, %236, %237, %238, %239, %240, %241 in 1 : vector<2x1x8xf32>, vector<2x1x8xf32>, vector<2x1x8xf32>, vector<2x1x8xf32>, vector<2x1x8xf32>, vector<2x1x8xf32>, vector<2x1x8xf32>, vector<2x1x8xf32> -> vector<2x8x8xf32>
    %243 = vector.extract_strided_slice %57 {offsets = [0, 3], sizes = [16, 1], strides = [1, 1]} : vector<16x8xf32> to vector<16x1xf32>
    %244 = vector.shape_cast %243 : vector<16x1xf32> to vector<2x8x1xf32>
    %245 = vector.extract_strided_slice %57 {offsets = [0, 7], sizes = [16, 1], strides = [1, 1]} : vector<16x8xf32> to vector<16x1xf32>
    %246 = vector.shape_cast %245 : vector<16x1xf32> to vector<2x8x1xf32>
    %247 = arith.subf %246, %244 : vector<2x8x1xf32>
    %248 = vector.broadcast %247 : vector<2x8x1xf32> to vector<2x8x8xf32>
    %249 = arith.mulf %24, %248 : vector<2x8x8xf32>
    %250 = vector.broadcast %244 : vector<2x8x1xf32> to vector<2x8x8xf32>
    %251 = arith.addf %250, %249 : vector<2x8x8xf32>
    %252 = arith.addf %231, %242 : vector<2x8x8xf32>
    %253 = arith.addf %252, %251 : vector<2x8x8xf32>
    %cst_48 = arith.constant 0.353553385 : f32
    %254 = vector.broadcast %cst_48 : f32 to vector<2x8x8xf32>
    %255 = arith.mulf %253, %254 : vector<2x8x8xf32>
    %256 = arith.addf %255, %17 : vector<2x8x8xf32>
    %cst_49 = arith.constant dense<0xFF800000> : vector<2x8xf32>
    %257 = vector.multi_reduction <maximumf>, %256, %cst_49 [2] : vector<2x8x8xf32> to vector<2x8xf32>
    %258 = vector.shape_cast %257 : vector<2x8xf32> to vector<2x8x1xf32>
    %259 = vector.broadcast %258 : vector<2x8x1xf32> to vector<2x8x8xf32>
    %260 = arith.subf %256, %259 : vector<2x8x8xf32>
    %261 = math.exp %260 : vector<2x8x8xf32>
    %cst_50 = arith.constant dense<0.000000e+00> : vector<2x8xf32>
    %262 = vector.multi_reduction <add>, %261, %cst_50 [2] : vector<2x8x8xf32> to vector<2x8xf32>
    %263 = vector.shape_cast %262 : vector<2x8xf32> to vector<2x8x1xf32>
    %264 = tpu.reciprocal %263 {approx = true} : vector<2x8x1xf32> -> vector<2x8x1xf32>
    %265 = vector.broadcast %264 : vector<2x8x1xf32> to vector<2x8x8xf32>
    %266 = arith.mulf %261, %265 : vector<2x8x8xf32>
    %267 = arith.truncf %266 : vector<2x8x8xf32> to vector<2x8x8xbf16>
    "tpu.trace_start"() <{level = 10 : i32, message = "bij,bjd->bid"}> : () -> ()
    %cst_51 = arith.constant dense<0.000000e+00> : vector<2x8x8xf32>
    %268 = tpu.matmul %267, %223, %cst_51 {dimension_numbers = #tpu.dot_dimension_numbers<[2], [1], [1], [2], [0, 0, 0, 1, 1, 2], [0], [0]>} : vector<2x8x8xbf16>, vector<2x8x8xbf16>, vector<2x8x8xf32> -> vector<2x8x8xf32>
    "tpu.trace_stop"() : () -> ()
    %269 = vector.shape_cast %268 : vector<2x8x8xf32> to vector<16x8xf32>
    %270 = tpu.concatenate %113, %165, %217, %269 in 1 : vector<16x8xf32>, vector<16x8xf32>, vector<16x8xf32>, vector<16x8xf32> -> vector<16x32xf32>
    %271 = arith.truncf %270 : vector<16x32xf32> to vector<16x32xbf16>
    %cst_52 = arith.constant dense<0.000000e+00> : vector<16x32xf32>
    %272 = tpu.matmul %271, %33, %cst_52 {dimension_numbers = #tpu.dot_dimension_numbers<[1], [0], [0], [1], [0, 0, 1, 1], [], []>} : vector<16x32xbf16>, vector<32x32xbf16>, vector<16x32xf32> -> vector<16x32xf32>
    %273 = arith.addf %272, %27 : vector<16x32xf32>
    %cst_53 = arith.constant dense<0.000000e+00> : vector<16xf32>
    %274 = vector.multi_reduction <add>, %273, %cst_53 [1] : vector<16x32xf32> to vector<16xf32>
    %275 = vector.shape_cast %274 : vector<16xf32> to vector<16x1xf32>
    %cst_54 = arith.constant 3.200000e+01 : f32
    %276 = vector.broadcast %cst_54 : f32 to vector<16x1xf32>
    %277 = arith.divf %275, %276 : vector<16x1xf32>
    %278 = vector.broadcast %277 : vector<16x1xf32> to vector<16x32xf32>
    %279 = arith.subf %273, %278 : vector<16x32xf32>
    %280 = arith.mulf %279, %279 : vector<16x32xf32>
    %cst_55 = arith.constant dense<0.000000e+00> : vector<16xf32>
    %281 = vector.multi_reduction <add>, %280, %cst_55 [1] : vector<16x32xf32> to vector<16xf32>
    %282 = vector.shape_cast %281 : vector<16xf32> to vector<16x1xf32>
    %cst_56 = arith.constant 3.200000e+01 : f32
    %283 = vector.broadcast %cst_56 : f32 to vector<16x1xf32>
    %284 = arith.divf %282, %283 : vector<16x1xf32>
    %285 = vector.broadcast %277 : vector<16x1xf32> to vector<16x32xf32>
    %286 = arith.subf %273, %285 : vector<16x32xf32>
    %cst_57 = arith.constant 9.99999996E-13 : f32
    %287 = vector.broadcast %cst_57 : f32 to vector<16x1xf32>
    %288 = arith.addf %284, %287 : vector<16x1xf32>
    %289 = math.rsqrt %288 : vector<16x1xf32>
    %290 = vector.broadcast %289 : vector<16x1xf32> to vector<16x32xf32>
    %291 = arith.mulf %286, %290 : vector<16x32xf32>
    %292 = vector.broadcast %43 : vector<1x32xf32> to vector<16x32xf32>
    %293 = arith.mulf %291, %292 : vector<16x32xf32>
    %294 = vector.broadcast %44 : vector<1x32xf32> to vector<16x32xf32>
    %295 = arith.addf %293, %294 : vector<16x32xf32>
    %296 = arith.truncf %295 : vector<16x32xf32> to vector<16x32xbf16>
    %cst_58 = arith.constant dense<0.000000e+00> : vector<16x64xf32>
    %297 = tpu.matmul %296, %35, %cst_58 {dimension_numbers = #tpu.dot_dimension_numbers<[1], [0], [0], [1], [0, 0, 1, 1], [], []>} : vector<16x32xbf16>, vector<32x64xbf16>, vector<16x64xf32> -> vector<16x64xf32>
    %298 = vector.broadcast %45 : vector<1x64xf32> to vector<16x64xf32>
    %299 = arith.addf %297, %298 : vector<16x64xf32>
    %300 = arith.mulf %299, %299 : vector<16x64xf32>
    %301 = arith.mulf %299, %300 : vector<16x64xf32>
    %cst_59 = arith.constant 4.471500e-02 : f32
    %302 = vector.broadcast %cst_59 : f32 to vector<16x64xf32>
    %303 = arith.mulf %302, %301 : vector<16x64xf32>
    %304 = arith.addf %299, %303 : vector<16x64xf32>
    %cst_60 = arith.constant 0.797884583 : f32
    %305 = vector.broadcast %cst_60 : f32 to vector<16x64xf32>
    %306 = arith.mulf %305, %304 : vector<16x64xf32>
    %307 = math.tanh %306 : vector<16x64xf32>
    %cst_61 = arith.constant 1.000000e+00 : f32
    %308 = vector.broadcast %cst_61 : f32 to vector<16x64xf32>
    %309 = arith.addf %308, %307 : vector<16x64xf32>
    %cst_62 = arith.constant 5.000000e-01 : f32
    %310 = vector.broadcast %cst_62 : f32 to vector<16x64xf32>
    %311 = arith.mulf %310, %309 : vector<16x64xf32>
    %312 = arith.mulf %299, %311 : vector<16x64xf32>
    %313 = arith.truncf %312 : vector<16x64xf32> to vector<16x64xbf16>
    %cst_63 = arith.constant dense<0.000000e+00> : vector<16x32xf32>
    %314 = tpu.matmul %313, %37, %cst_63 {dimension_numbers = #tpu.dot_dimension_numbers<[1], [0], [0], [1], [0, 0, 1, 1], [], []>} : vector<16x64xbf16>, vector<64x32xbf16>, vector<16x32xf32> -> vector<16x32xf32>
    %315 = vector.broadcast %46 : vector<1x32xf32> to vector<16x32xf32>
    %316 = arith.addf %314, %315 : vector<16x32xf32>
    %317 = arith.addf %316, %295 : vector<16x32xf32>
    %cst_64 = arith.constant dense<0.000000e+00> : vector<16xf32>
    %318 = vector.multi_reduction <add>, %317, %cst_64 [1] : vector<16x32xf32> to vector<16xf32>
    %319 = vector.shape_cast %318 : vector<16xf32> to vector<16x1xf32>
    %cst_65 = arith.constant 3.200000e+01 : f32
    %320 = vector.broadcast %cst_65 : f32 to vector<16x1xf32>
    %321 = arith.divf %319, %320 : vector<16x1xf32>
    %322 = vector.broadcast %321 : vector<16x1xf32> to vector<16x32xf32>
    %323 = arith.subf %317, %322 : vector<16x32xf32>
    %324 = arith.mulf %323, %323 : vector<16x32xf32>
    %cst_66 = arith.constant dense<0.000000e+00> : vector<16xf32>
    %325 = vector.multi_reduction <add>, %324, %cst_66 [1] : vector<16x32xf32> to vector<16xf32>
    %326 = vector.shape_cast %325 : vector<16xf32> to vector<16x1xf32>
    %cst_67 = arith.constant 3.200000e+01 : f32
    %327 = vector.broadcast %cst_67 : f32 to vector<16x1xf32>
    %328 = arith.divf %326, %327 : vector<16x1xf32>
    %329 = vector.broadcast %321 : vector<16x1xf32> to vector<16x32xf32>
    %330 = arith.subf %317, %329 : vector<16x32xf32>
    %cst_68 = arith.constant 9.99999996E-13 : f32
    %331 = vector.broadcast %cst_68 : f32 to vector<16x1xf32>
    %332 = arith.addf %328, %331 : vector<16x1xf32>
    %333 = math.rsqrt %332 : vector<16x1xf32>
    %334 = vector.broadcast %333 : vector<16x1xf32> to vector<16x32xf32>
    %335 = arith.mulf %330, %334 : vector<16x32xf32>
    %336 = vector.broadcast %47 : vector<1x32xf32> to vector<16x32xf32>
    %337 = arith.mulf %335, %336 : vector<16x32xf32>
    %338 = vector.broadcast %48 : vector<1x32xf32> to vector<16x32xf32>
    %339 = arith.addf %337, %338 : vector<16x32xf32>
    %c1 = arith.constant 1 : index
    %c0_69 = arith.constant 0 : index
    %c0_70 = arith.constant 0 : index
    %340 = vector.load %arg5[%c1, %c0_69, %c0_70] : memref<2x32x104xbf16, #tpu.memory_space<vmem>>, vector<1x32x104xbf16>
    %341 = vector.shape_cast %340 : vector<1x32x104xbf16> to vector<32x104xbf16>
    %c1_71 = arith.constant 1 : index
    %c0_72 = arith.constant 0 : index
    %c0_73 = arith.constant 0 : index
    %342 = vector.load %arg6[%c1_71, %c0_72, %c0_73] : memref<2x32x32xbf16, #tpu.memory_space<vmem>>, vector<1x32x32xbf16>
    %343 = vector.shape_cast %342 : vector<1x32x32xbf16> to vector<32x32xbf16>
    %c1_74 = arith.constant 1 : index
    %c0_75 = arith.constant 0 : index
    %c0_76 = arith.constant 0 : index
    %344 = vector.load %arg7[%c1_74, %c0_75, %c0_76] : memref<2x32x32xbf16, #tpu.memory_space<vmem>>, vector<1x32x32xbf16>
    %345 = vector.shape_cast %344 : vector<1x32x32xbf16> to vector<32x32xbf16>
    %c1_77 = arith.constant 1 : index
    %c0_78 = arith.constant 0 : index
    %c0_79 = arith.constant 0 : index
    %346 = vector.load %arg8[%c1_77, %c0_78, %c0_79] : memref<2x32x64xbf16, #tpu.memory_space<vmem>>, vector<1x32x64xbf16>
    %347 = vector.shape_cast %346 : vector<1x32x64xbf16> to vector<32x64xbf16>
    %c1_80 = arith.constant 1 : index
    %c0_81 = arith.constant 0 : index
    %c0_82 = arith.constant 0 : index
    %348 = vector.load %arg9[%c1_80, %c0_81, %c0_82] : memref<2x64x32xbf16, #tpu.memory_space<vmem>>, vector<1x64x32xbf16>
    %349 = vector.shape_cast %348 : vector<1x64x32xbf16> to vector<64x32xbf16>
    %c1_83 = arith.constant 1 : index
    %c0_84 = arith.constant 0 : index
    %c0_85 = arith.constant 0 : index
    %350 = vector.load %arg10[%c1_83, %c0_84, %c0_85] : memref<2x9x64xf32, #tpu.memory_space<vmem>>, vector<1x9x64xf32>
    %351 = vector.shape_cast %350 : vector<1x9x64xf32> to vector<9x64xf32>
    %352 = vector.extract_strided_slice %351 {offsets = [0, 0], sizes = [1, 32], strides = [1, 1]} : vector<9x64xf32> to vector<1x32xf32>
    %353 = vector.extract_strided_slice %351 {offsets = [1, 0], sizes = [1, 32], strides = [1, 1]} : vector<9x64xf32> to vector<1x32xf32>
    %354 = vector.extract_strided_slice %351 {offsets = [2, 0], sizes = [1, 8], strides = [1, 1]} : vector<9x64xf32> to vector<1x8xf32>
    %355 = vector.extract_strided_slice %351 {offsets = [3, 0], sizes = [1, 32], strides = [1, 1]} : vector<9x64xf32> to vector<1x32xf32>
    %356 = vector.extract_strided_slice %351 {offsets = [4, 0], sizes = [1, 32], strides = [1, 1]} : vector<9x64xf32> to vector<1x32xf32>
    %357 = vector.extract_strided_slice %351 {offsets = [5, 0], sizes = [1, 64], strides = [1, 1]} : vector<9x64xf32> to vector<1x64xf32>
    %358 = vector.extract_strided_slice %351 {offsets = [6, 0], sizes = [1, 32], strides = [1, 1]} : vector<9x64xf32> to vector<1x32xf32>
    %359 = vector.extract_strided_slice %351 {offsets = [7, 0], sizes = [1, 32], strides = [1, 1]} : vector<9x64xf32> to vector<1x32xf32>
    %360 = vector.extract_strided_slice %351 {offsets = [8, 0], sizes = [1, 32], strides = [1, 1]} : vector<9x64xf32> to vector<1x32xf32>
    %361 = arith.truncf %339 : vector<16x32xf32> to vector<16x32xbf16>
    %cst_86 = arith.constant dense<0.000000e+00> : vector<16x104xf32>
    %362 = tpu.matmul %361, %341, %cst_86 {dimension_numbers = #tpu.dot_dimension_numbers<[1], [0], [0], [1], [0, 0, 1, 1], [], []>} : vector<16x32xbf16>, vector<32x104xbf16>, vector<16x104xf32> -> vector<16x104xf32>
    %cst_87 = arith.constant dense<0.000000e+00> : vector<16x32xf32>
    %363 = tpu.matmul %25, %343, %cst_87 {dimension_numbers = #tpu.dot_dimension_numbers<[1], [0], [0], [1], [0, 0, 1, 1], [], []>} : vector<16x32xbf16>, vector<32x32xbf16>, vector<16x32xf32> -> vector<16x32xf32>
    %364 = vector.extract_strided_slice %362 {offsets = [0, 0], sizes = [16, 32], strides = [1, 1]} : vector<16x104xf32> to vector<16x32xf32>
    %365 = vector.extract_strided_slice %362 {offsets = [0, 32], sizes = [16, 32], strides = [1, 1]} : vector<16x104xf32> to vector<16x32xf32>
    %366 = vector.extract_strided_slice %362 {offsets = [0, 64], sizes = [16, 32], strides = [1, 1]} : vector<16x104xf32> to vector<16x32xf32>
    %367 = vector.extract_strided_slice %362 {offsets = [0, 96], sizes = [16, 8], strides = [1, 1]} : vector<16x104xf32> to vector<16x8xf32>
    %368 = vector.broadcast %354 : vector<1x8xf32> to vector<16x8xf32>
    %369 = arith.addf %367, %368 : vector<16x8xf32>
    %370 = vector.broadcast %352 : vector<1x32xf32> to vector<16x32xf32>
    %371 = arith.addf %364, %370 : vector<16x32xf32>
    %372 = vector.broadcast %353 : vector<1x32xf32> to vector<16x32xf32>
    %373 = arith.addf %364, %372 : vector<16x32xf32>
    %374 = vector.extract_strided_slice %365 {offsets = [0, 0], sizes = [16, 8], strides = [1, 1]} : vector<16x32xf32> to vector<16x8xf32>
    %375 = vector.shape_cast %374 : vector<16x8xf32> to vector<2x8x8xf32>
    %376 = arith.truncf %375 : vector<2x8x8xf32> to vector<2x8x8xbf16>
    %377 = vector.extract_strided_slice %366 {offsets = [0, 0], sizes = [16, 8], strides = [1, 1]} : vector<16x32xf32> to vector<16x8xf32>
    %378 = vector.shape_cast %377 : vector<16x8xf32> to vector<2x8x8xf32>
    %379 = arith.truncf %378 : vector<2x8x8xf32> to vector<2x8x8xbf16>
    %380 = vector.extract_strided_slice %371 {offsets = [0, 0], sizes = [16, 8], strides = [1, 1]} : vector<16x32xf32> to vector<16x8xf32>
    %381 = vector.shape_cast %380 : vector<16x8xf32> to vector<2x8x8xf32>
    %382 = arith.truncf %381 : vector<2x8x8xf32> to vector<2x8x8xbf16>
    %383 = vector.extract_strided_slice %373 {offsets = [0, 0], sizes = [16, 8], strides = [1, 1]} : vector<16x32xf32> to vector<16x8xf32>
    %384 = arith.truncf %383 : vector<16x8xf32> to vector<16x8xbf16>
    %385 = vector.extract_strided_slice %363 {offsets = [0, 0], sizes = [16, 8], strides = [1, 1]} : vector<16x32xf32> to vector<16x8xf32>
    %386 = arith.truncf %385 : vector<16x8xf32> to vector<16x8xbf16>
    "tpu.trace_start"() <{level = 10 : i32, message = "bid,bjd->bij"}> : () -> ()
    %cst_88 = arith.constant dense<0.000000e+00> : vector<2x8x8xf32>
    %387 = tpu.matmul %382, %376, %cst_88 {dimension_numbers = #tpu.dot_dimension_numbers<[2], [2], [1], [1], [0, 0, 0, 1, 1, 1], [0], [0]>} : vector<2x8x8xbf16>, vector<2x8x8xbf16>, vector<2x8x8xf32> -> vector<2x8x8xf32>
    "tpu.trace_stop"() : () -> ()
    "tpu.trace_start"() <{level = 10 : i32, message = "md,pd->mp"}> : () -> ()
    %cst_89 = arith.constant dense<0.000000e+00> : vector<16x16xf32>
    %388 = tpu.matmul %384, %386, %cst_89 {dimension_numbers = #tpu.dot_dimension_numbers<[1], [1], [0], [0], [0, 0, 1, 0], [], []>} : vector<16x8xbf16>, vector<16x8xbf16>, vector<16x16xf32> -> vector<16x16xf32>
    "tpu.trace_stop"() : () -> ()
    %389 = vector.shape_cast %388 : vector<16x16xf32> to vector<2x8x16xf32>
    %390 = vector.extract_strided_slice %389 {offsets = [0, 0, 8], sizes = [2, 1, 8], strides = [1, 1, 1]} : vector<2x8x16xf32> to vector<2x1x8xf32>
    %391 = vector.extract_strided_slice %389 {offsets = [0, 1, 7], sizes = [2, 1, 8], strides = [1, 1, 1]} : vector<2x8x16xf32> to vector<2x1x8xf32>
    %392 = vector.extract_strided_slice %389 {offsets = [0, 2, 6], sizes = [2, 1, 8], strides = [1, 1, 1]} : vector<2x8x16xf32> to vector<2x1x8xf32>
    %393 = vector.extract_strided_slice %389 {offsets = [0, 3, 5], sizes = [2, 1, 8], strides = [1, 1, 1]} : vector<2x8x16xf32> to vector<2x1x8xf32>
    %394 = vector.extract_strided_slice %389 {offsets = [0, 4, 4], sizes = [2, 1, 8], strides = [1, 1, 1]} : vector<2x8x16xf32> to vector<2x1x8xf32>
    %395 = vector.extract_strided_slice %389 {offsets = [0, 5, 3], sizes = [2, 1, 8], strides = [1, 1, 1]} : vector<2x8x16xf32> to vector<2x1x8xf32>
    %396 = vector.extract_strided_slice %389 {offsets = [0, 6, 2], sizes = [2, 1, 8], strides = [1, 1, 1]} : vector<2x8x16xf32> to vector<2x1x8xf32>
    %397 = vector.extract_strided_slice %389 {offsets = [0, 7, 1], sizes = [2, 1, 8], strides = [1, 1, 1]} : vector<2x8x16xf32> to vector<2x1x8xf32>
    %398 = tpu.concatenate %390, %391, %392, %393, %394, %395, %396, %397 in 1 : vector<2x1x8xf32>, vector<2x1x8xf32>, vector<2x1x8xf32>, vector<2x1x8xf32>, vector<2x1x8xf32>, vector<2x1x8xf32>, vector<2x1x8xf32>, vector<2x1x8xf32> -> vector<2x8x8xf32>
    %399 = vector.extract_strided_slice %369 {offsets = [0, 0], sizes = [16, 1], strides = [1, 1]} : vector<16x8xf32> to vector<16x1xf32>
    %400 = vector.shape_cast %399 : vector<16x1xf32> to vector<2x8x1xf32>
    %401 = vector.extract_strided_slice %369 {offsets = [0, 4], sizes = [16, 1], strides = [1, 1]} : vector<16x8xf32> to vector<16x1xf32>
    %402 = vector.shape_cast %401 : vector<16x1xf32> to vector<2x8x1xf32>
    %403 = arith.subf %402, %400 : vector<2x8x1xf32>
    %404 = vector.broadcast %403 : vector<2x8x1xf32> to vector<2x8x8xf32>
    %405 = arith.mulf %24, %404 : vector<2x8x8xf32>
    %406 = vector.broadcast %400 : vector<2x8x1xf32> to vector<2x8x8xf32>
    %407 = arith.addf %406, %405 : vector<2x8x8xf32>
    %408 = arith.addf %387, %398 : vector<2x8x8xf32>
    %409 = arith.addf %408, %407 : vector<2x8x8xf32>
    %cst_90 = arith.constant 0.353553385 : f32
    %410 = vector.broadcast %cst_90 : f32 to vector<2x8x8xf32>
    %411 = arith.mulf %409, %410 : vector<2x8x8xf32>
    %412 = arith.addf %411, %17 : vector<2x8x8xf32>
    %cst_91 = arith.constant dense<0xFF800000> : vector<2x8xf32>
    %413 = vector.multi_reduction <maximumf>, %412, %cst_91 [2] : vector<2x8x8xf32> to vector<2x8xf32>
    %414 = vector.shape_cast %413 : vector<2x8xf32> to vector<2x8x1xf32>
    %415 = vector.broadcast %414 : vector<2x8x1xf32> to vector<2x8x8xf32>
    %416 = arith.subf %412, %415 : vector<2x8x8xf32>
    %417 = math.exp %416 : vector<2x8x8xf32>
    %cst_92 = arith.constant dense<0.000000e+00> : vector<2x8xf32>
    %418 = vector.multi_reduction <add>, %417, %cst_92 [2] : vector<2x8x8xf32> to vector<2x8xf32>
    %419 = vector.shape_cast %418 : vector<2x8xf32> to vector<2x8x1xf32>
    %420 = tpu.reciprocal %419 {approx = true} : vector<2x8x1xf32> -> vector<2x8x1xf32>
    %421 = vector.broadcast %420 : vector<2x8x1xf32> to vector<2x8x8xf32>
    %422 = arith.mulf %417, %421 : vector<2x8x8xf32>
    %423 = arith.truncf %422 : vector<2x8x8xf32> to vector<2x8x8xbf16>
    "tpu.trace_start"() <{level = 10 : i32, message = "bij,bjd->bid"}> : () -> ()
    %cst_93 = arith.constant dense<0.000000e+00> : vector<2x8x8xf32>
    %424 = tpu.matmul %423, %379, %cst_93 {dimension_numbers = #tpu.dot_dimension_numbers<[2], [1], [1], [2], [0, 0, 0, 1, 1, 2], [0], [0]>} : vector<2x8x8xbf16>, vector<2x8x8xbf16>, vector<2x8x8xf32> -> vector<2x8x8xf32>
    "tpu.trace_stop"() : () -> ()
    %425 = vector.shape_cast %424 : vector<2x8x8xf32> to vector<16x8xf32>
    %426 = vector.extract_strided_slice %365 {offsets = [0, 8], sizes = [16, 8], strides = [1, 1]} : vector<16x32xf32> to vector<16x8xf32>
    %427 = vector.shape_cast %426 : vector<16x8xf32> to vector<2x8x8xf32>
    %428 = arith.truncf %427 : vector<2x8x8xf32> to vector<2x8x8xbf16>
    %429 = vector.extract_strided_slice %366 {offsets = [0, 8], sizes = [16, 8], strides = [1, 1]} : vector<16x32xf32> to vector<16x8xf32>
    %430 = vector.shape_cast %429 : vector<16x8xf32> to vector<2x8x8xf32>
    %431 = arith.truncf %430 : vector<2x8x8xf32> to vector<2x8x8xbf16>
    %432 = vector.extract_strided_slice %371 {offsets = [0, 8], sizes = [16, 8], strides = [1, 1]} : vector<16x32xf32> to vector<16x8xf32>
    %433 = vector.shape_cast %432 : vector<16x8xf32> to vector<2x8x8xf32>
    %434 = arith.truncf %433 : vector<2x8x8xf32> to vector<2x8x8xbf16>
    %435 = vector.extract_strided_slice %373 {offsets = [0, 8], sizes = [16, 8], strides = [1, 1]} : vector<16x32xf32> to vector<16x8xf32>
    %436 = arith.truncf %435 : vector<16x8xf32> to vector<16x8xbf16>
    %437 = vector.extract_strided_slice %363 {offsets = [0, 8], sizes = [16, 8], strides = [1, 1]} : vector<16x32xf32> to vector<16x8xf32>
    %438 = arith.truncf %437 : vector<16x8xf32> to vector<16x8xbf16>
    "tpu.trace_start"() <{level = 10 : i32, message = "bid,bjd->bij"}> : () -> ()
    %cst_94 = arith.constant dense<0.000000e+00> : vector<2x8x8xf32>
    %439 = tpu.matmul %434, %428, %cst_94 {dimension_numbers = #tpu.dot_dimension_numbers<[2], [2], [1], [1], [0, 0, 0, 1, 1, 1], [0], [0]>} : vector<2x8x8xbf16>, vector<2x8x8xbf16>, vector<2x8x8xf32> -> vector<2x8x8xf32>
    "tpu.trace_stop"() : () -> ()
    "tpu.trace_start"() <{level = 10 : i32, message = "md,pd->mp"}> : () -> ()
    %cst_95 = arith.constant dense<0.000000e+00> : vector<16x16xf32>
    %440 = tpu.matmul %436, %438, %cst_95 {dimension_numbers = #tpu.dot_dimension_numbers<[1], [1], [0], [0], [0, 0, 1, 0], [], []>} : vector<16x8xbf16>, vector<16x8xbf16>, vector<16x16xf32> -> vector<16x16xf32>
    "tpu.trace_stop"() : () -> ()
    %441 = vector.shape_cast %440 : vector<16x16xf32> to vector<2x8x16xf32>
    %442 = vector.extract_strided_slice %441 {offsets = [0, 0, 8], sizes = [2, 1, 8], strides = [1, 1, 1]} : vector<2x8x16xf32> to vector<2x1x8xf32>
    %443 = vector.extract_strided_slice %441 {offsets = [0, 1, 7], sizes = [2, 1, 8], strides = [1, 1, 1]} : vector<2x8x16xf32> to vector<2x1x8xf32>
    %444 = vector.extract_strided_slice %441 {offsets = [0, 2, 6], sizes = [2, 1, 8], strides = [1, 1, 1]} : vector<2x8x16xf32> to vector<2x1x8xf32>
    %445 = vector.extract_strided_slice %441 {offsets = [0, 3, 5], sizes = [2, 1, 8], strides = [1, 1, 1]} : vector<2x8x16xf32> to vector<2x1x8xf32>
    %446 = vector.extract_strided_slice %441 {offsets = [0, 4, 4], sizes = [2, 1, 8], strides = [1, 1, 1]} : vector<2x8x16xf32> to vector<2x1x8xf32>
    %447 = vector.extract_strided_slice %441 {offsets = [0, 5, 3], sizes = [2, 1, 8], strides = [1, 1, 1]} : vector<2x8x16xf32> to vector<2x1x8xf32>
    %448 = vector.extract_strided_slice %441 {offsets = [0, 6, 2], sizes = [2, 1, 8], strides = [1, 1, 1]} : vector<2x8x16xf32> to vector<2x1x8xf32>
    %449 = vector.extract_strided_slice %441 {offsets = [0, 7, 1], sizes = [2, 1, 8], strides = [1, 1, 1]} : vector<2x8x16xf32> to vector<2x1x8xf32>
    %450 = tpu.concatenate %442, %443, %444, %445, %446, %447, %448, %449 in 1 : vector<2x1x8xf32>, vector<2x1x8xf32>, vector<2x1x8xf32>, vector<2x1x8xf32>, vector<2x1x8xf32>, vector<2x1x8xf32>, vector<2x1x8xf32>, vector<2x1x8xf32> -> vector<2x8x8xf32>
    %451 = vector.extract_strided_slice %369 {offsets = [0, 1], sizes = [16, 1], strides = [1, 1]} : vector<16x8xf32> to vector<16x1xf32>
    %452 = vector.shape_cast %451 : vector<16x1xf32> to vector<2x8x1xf32>
    %453 = vector.extract_strided_slice %369 {offsets = [0, 5], sizes = [16, 1], strides = [1, 1]} : vector<16x8xf32> to vector<16x1xf32>
    %454 = vector.shape_cast %453 : vector<16x1xf32> to vector<2x8x1xf32>
    %455 = arith.subf %454, %452 : vector<2x8x1xf32>
    %456 = vector.broadcast %455 : vector<2x8x1xf32> to vector<2x8x8xf32>
    %457 = arith.mulf %24, %456 : vector<2x8x8xf32>
    %458 = vector.broadcast %452 : vector<2x8x1xf32> to vector<2x8x8xf32>
    %459 = arith.addf %458, %457 : vector<2x8x8xf32>
    %460 = arith.addf %439, %450 : vector<2x8x8xf32>
    %461 = arith.addf %460, %459 : vector<2x8x8xf32>
    %cst_96 = arith.constant 0.353553385 : f32
    %462 = vector.broadcast %cst_96 : f32 to vector<2x8x8xf32>
    %463 = arith.mulf %461, %462 : vector<2x8x8xf32>
    %464 = arith.addf %463, %17 : vector<2x8x8xf32>
    %cst_97 = arith.constant dense<0xFF800000> : vector<2x8xf32>
    %465 = vector.multi_reduction <maximumf>, %464, %cst_97 [2] : vector<2x8x8xf32> to vector<2x8xf32>
    %466 = vector.shape_cast %465 : vector<2x8xf32> to vector<2x8x1xf32>
    %467 = vector.broadcast %466 : vector<2x8x1xf32> to vector<2x8x8xf32>
    %468 = arith.subf %464, %467 : vector<2x8x8xf32>
    %469 = math.exp %468 : vector<2x8x8xf32>
    %cst_98 = arith.constant dense<0.000000e+00> : vector<2x8xf32>
    %470 = vector.multi_reduction <add>, %469, %cst_98 [2] : vector<2x8x8xf32> to vector<2x8xf32>
    %471 = vector.shape_cast %470 : vector<2x8xf32> to vector<2x8x1xf32>
    %472 = tpu.reciprocal %471 {approx = true} : vector<2x8x1xf32> -> vector<2x8x1xf32>
    %473 = vector.broadcast %472 : vector<2x8x1xf32> to vector<2x8x8xf32>
    %474 = arith.mulf %469, %473 : vector<2x8x8xf32>
    %475 = arith.truncf %474 : vector<2x8x8xf32> to vector<2x8x8xbf16>
    "tpu.trace_start"() <{level = 10 : i32, message = "bij,bjd->bid"}> : () -> ()
    %cst_99 = arith.constant dense<0.000000e+00> : vector<2x8x8xf32>
    %476 = tpu.matmul %475, %431, %cst_99 {dimension_numbers = #tpu.dot_dimension_numbers<[2], [1], [1], [2], [0, 0, 0, 1, 1, 2], [0], [0]>} : vector<2x8x8xbf16>, vector<2x8x8xbf16>, vector<2x8x8xf32> -> vector<2x8x8xf32>
    "tpu.trace_stop"() : () -> ()
    %477 = vector.shape_cast %476 : vector<2x8x8xf32> to vector<16x8xf32>
    %478 = vector.extract_strided_slice %365 {offsets = [0, 16], sizes = [16, 8], strides = [1, 1]} : vector<16x32xf32> to vector<16x8xf32>
    %479 = vector.shape_cast %478 : vector<16x8xf32> to vector<2x8x8xf32>
    %480 = arith.truncf %479 : vector<2x8x8xf32> to vector<2x8x8xbf16>
    %481 = vector.extract_strided_slice %366 {offsets = [0, 16], sizes = [16, 8], strides = [1, 1]} : vector<16x32xf32> to vector<16x8xf32>
    %482 = vector.shape_cast %481 : vector<16x8xf32> to vector<2x8x8xf32>
    %483 = arith.truncf %482 : vector<2x8x8xf32> to vector<2x8x8xbf16>
    %484 = vector.extract_strided_slice %371 {offsets = [0, 16], sizes = [16, 8], strides = [1, 1]} : vector<16x32xf32> to vector<16x8xf32>
    %485 = vector.shape_cast %484 : vector<16x8xf32> to vector<2x8x8xf32>
    %486 = arith.truncf %485 : vector<2x8x8xf32> to vector<2x8x8xbf16>
    %487 = vector.extract_strided_slice %373 {offsets = [0, 16], sizes = [16, 8], strides = [1, 1]} : vector<16x32xf32> to vector<16x8xf32>
    %488 = arith.truncf %487 : vector<16x8xf32> to vector<16x8xbf16>
    %489 = vector.extract_strided_slice %363 {offsets = [0, 16], sizes = [16, 8], strides = [1, 1]} : vector<16x32xf32> to vector<16x8xf32>
    %490 = arith.truncf %489 : vector<16x8xf32> to vector<16x8xbf16>
    "tpu.trace_start"() <{level = 10 : i32, message = "bid,bjd->bij"}> : () -> ()
    %cst_100 = arith.constant dense<0.000000e+00> : vector<2x8x8xf32>
    %491 = tpu.matmul %486, %480, %cst_100 {dimension_numbers = #tpu.dot_dimension_numbers<[2], [2], [1], [1], [0, 0, 0, 1, 1, 1], [0], [0]>} : vector<2x8x8xbf16>, vector<2x8x8xbf16>, vector<2x8x8xf32> -> vector<2x8x8xf32>
    "tpu.trace_stop"() : () -> ()
    "tpu.trace_start"() <{level = 10 : i32, message = "md,pd->mp"}> : () -> ()
    %cst_101 = arith.constant dense<0.000000e+00> : vector<16x16xf32>
    %492 = tpu.matmul %488, %490, %cst_101 {dimension_numbers = #tpu.dot_dimension_numbers<[1], [1], [0], [0], [0, 0, 1, 0], [], []>} : vector<16x8xbf16>, vector<16x8xbf16>, vector<16x16xf32> -> vector<16x16xf32>
    "tpu.trace_stop"() : () -> ()
    %493 = vector.shape_cast %492 : vector<16x16xf32> to vector<2x8x16xf32>
    %494 = vector.extract_strided_slice %493 {offsets = [0, 0, 8], sizes = [2, 1, 8], strides = [1, 1, 1]} : vector<2x8x16xf32> to vector<2x1x8xf32>
    %495 = vector.extract_strided_slice %493 {offsets = [0, 1, 7], sizes = [2, 1, 8], strides = [1, 1, 1]} : vector<2x8x16xf32> to vector<2x1x8xf32>
    %496 = vector.extract_strided_slice %493 {offsets = [0, 2, 6], sizes = [2, 1, 8], strides = [1, 1, 1]} : vector<2x8x16xf32> to vector<2x1x8xf32>
    %497 = vector.extract_strided_slice %493 {offsets = [0, 3, 5], sizes = [2, 1, 8], strides = [1, 1, 1]} : vector<2x8x16xf32> to vector<2x1x8xf32>
    %498 = vector.extract_strided_slice %493 {offsets = [0, 4, 4], sizes = [2, 1, 8], strides = [1, 1, 1]} : vector<2x8x16xf32> to vector<2x1x8xf32>
    %499 = vector.extract_strided_slice %493 {offsets = [0, 5, 3], sizes = [2, 1, 8], strides = [1, 1, 1]} : vector<2x8x16xf32> to vector<2x1x8xf32>
    %500 = vector.extract_strided_slice %493 {offsets = [0, 6, 2], sizes = [2, 1, 8], strides = [1, 1, 1]} : vector<2x8x16xf32> to vector<2x1x8xf32>
    %501 = vector.extract_strided_slice %493 {offsets = [0, 7, 1], sizes = [2, 1, 8], strides = [1, 1, 1]} : vector<2x8x16xf32> to vector<2x1x8xf32>
    %502 = tpu.concatenate %494, %495, %496, %497, %498, %499, %500, %501 in 1 : vector<2x1x8xf32>, vector<2x1x8xf32>, vector<2x1x8xf32>, vector<2x1x8xf32>, vector<2x1x8xf32>, vector<2x1x8xf32>, vector<2x1x8xf32>, vector<2x1x8xf32> -> vector<2x8x8xf32>
    %503 = vector.extract_strided_slice %369 {offsets = [0, 2], sizes = [16, 1], strides = [1, 1]} : vector<16x8xf32> to vector<16x1xf32>
    %504 = vector.shape_cast %503 : vector<16x1xf32> to vector<2x8x1xf32>
    %505 = vector.extract_strided_slice %369 {offsets = [0, 6], sizes = [16, 1], strides = [1, 1]} : vector<16x8xf32> to vector<16x1xf32>
    %506 = vector.shape_cast %505 : vector<16x1xf32> to vector<2x8x1xf32>
    %507 = arith.subf %506, %504 : vector<2x8x1xf32>
    %508 = vector.broadcast %507 : vector<2x8x1xf32> to vector<2x8x8xf32>
    %509 = arith.mulf %24, %508 : vector<2x8x8xf32>
    %510 = vector.broadcast %504 : vector<2x8x1xf32> to vector<2x8x8xf32>
    %511 = arith.addf %510, %509 : vector<2x8x8xf32>
    %512 = arith.addf %491, %502 : vector<2x8x8xf32>
    %513 = arith.addf %512, %511 : vector<2x8x8xf32>
    %cst_102 = arith.constant 0.353553385 : f32
    %514 = vector.broadcast %cst_102 : f32 to vector<2x8x8xf32>
    %515 = arith.mulf %513, %514 : vector<2x8x8xf32>
    %516 = arith.addf %515, %17 : vector<2x8x8xf32>
    %cst_103 = arith.constant dense<0xFF800000> : vector<2x8xf32>
    %517 = vector.multi_reduction <maximumf>, %516, %cst_103 [2] : vector<2x8x8xf32> to vector<2x8xf32>
    %518 = vector.shape_cast %517 : vector<2x8xf32> to vector<2x8x1xf32>
    %519 = vector.broadcast %518 : vector<2x8x1xf32> to vector<2x8x8xf32>
    %520 = arith.subf %516, %519 : vector<2x8x8xf32>
    %521 = math.exp %520 : vector<2x8x8xf32>
    %cst_104 = arith.constant dense<0.000000e+00> : vector<2x8xf32>
    %522 = vector.multi_reduction <add>, %521, %cst_104 [2] : vector<2x8x8xf32> to vector<2x8xf32>
    %523 = vector.shape_cast %522 : vector<2x8xf32> to vector<2x8x1xf32>
    %524 = tpu.reciprocal %523 {approx = true} : vector<2x8x1xf32> -> vector<2x8x1xf32>
    %525 = vector.broadcast %524 : vector<2x8x1xf32> to vector<2x8x8xf32>
    %526 = arith.mulf %521, %525 : vector<2x8x8xf32>
    %527 = arith.truncf %526 : vector<2x8x8xf32> to vector<2x8x8xbf16>
    "tpu.trace_start"() <{level = 10 : i32, message = "bij,bjd->bid"}> : () -> ()
    %cst_105 = arith.constant dense<0.000000e+00> : vector<2x8x8xf32>
    %528 = tpu.matmul %527, %483, %cst_105 {dimension_numbers = #tpu.dot_dimension_numbers<[2], [1], [1], [2], [0, 0, 0, 1, 1, 2], [0], [0]>} : vector<2x8x8xbf16>, vector<2x8x8xbf16>, vector<2x8x8xf32> -> vector<2x8x8xf32>
    "tpu.trace_stop"() : () -> ()
    %529 = vector.shape_cast %528 : vector<2x8x8xf32> to vector<16x8xf32>
    %530 = vector.extract_strided_slice %365 {offsets = [0, 24], sizes = [16, 8], strides = [1, 1]} : vector<16x32xf32> to vector<16x8xf32>
    %531 = vector.shape_cast %530 : vector<16x8xf32> to vector<2x8x8xf32>
    %532 = arith.truncf %531 : vector<2x8x8xf32> to vector<2x8x8xbf16>
    %533 = vector.extract_strided_slice %366 {offsets = [0, 24], sizes = [16, 8], strides = [1, 1]} : vector<16x32xf32> to vector<16x8xf32>
    %534 = vector.shape_cast %533 : vector<16x8xf32> to vector<2x8x8xf32>
    %535 = arith.truncf %534 : vector<2x8x8xf32> to vector<2x8x8xbf16>
    %536 = vector.extract_strided_slice %371 {offsets = [0, 24], sizes = [16, 8], strides = [1, 1]} : vector<16x32xf32> to vector<16x8xf32>
    %537 = vector.shape_cast %536 : vector<16x8xf32> to vector<2x8x8xf32>
    %538 = arith.truncf %537 : vector<2x8x8xf32> to vector<2x8x8xbf16>
    %539 = vector.extract_strided_slice %373 {offsets = [0, 24], sizes = [16, 8], strides = [1, 1]} : vector<16x32xf32> to vector<16x8xf32>
    %540 = arith.truncf %539 : vector<16x8xf32> to vector<16x8xbf16>
    %541 = vector.extract_strided_slice %363 {offsets = [0, 24], sizes = [16, 8], strides = [1, 1]} : vector<16x32xf32> to vector<16x8xf32>
    %542 = arith.truncf %541 : vector<16x8xf32> to vector<16x8xbf16>
    "tpu.trace_start"() <{level = 10 : i32, message = "bid,bjd->bij"}> : () -> ()
    %cst_106 = arith.constant dense<0.000000e+00> : vector<2x8x8xf32>
    %543 = tpu.matmul %538, %532, %cst_106 {dimension_numbers = #tpu.dot_dimension_numbers<[2], [2], [1], [1], [0, 0, 0, 1, 1, 1], [0], [0]>} : vector<2x8x8xbf16>, vector<2x8x8xbf16>, vector<2x8x8xf32> -> vector<2x8x8xf32>
    "tpu.trace_stop"() : () -> ()
    "tpu.trace_start"() <{level = 10 : i32, message = "md,pd->mp"}> : () -> ()
    %cst_107 = arith.constant dense<0.000000e+00> : vector<16x16xf32>
    %544 = tpu.matmul %540, %542, %cst_107 {dimension_numbers = #tpu.dot_dimension_numbers<[1], [1], [0], [0], [0, 0, 1, 0], [], []>} : vector<16x8xbf16>, vector<16x8xbf16>, vector<16x16xf32> -> vector<16x16xf32>
    "tpu.trace_stop"() : () -> ()
    %545 = vector.shape_cast %544 : vector<16x16xf32> to vector<2x8x16xf32>
    %546 = vector.extract_strided_slice %545 {offsets = [0, 0, 8], sizes = [2, 1, 8], strides = [1, 1, 1]} : vector<2x8x16xf32> to vector<2x1x8xf32>
    %547 = vector.extract_strided_slice %545 {offsets = [0, 1, 7], sizes = [2, 1, 8], strides = [1, 1, 1]} : vector<2x8x16xf32> to vector<2x1x8xf32>
    %548 = vector.extract_strided_slice %545 {offsets = [0, 2, 6], sizes = [2, 1, 8], strides = [1, 1, 1]} : vector<2x8x16xf32> to vector<2x1x8xf32>
    %549 = vector.extract_strided_slice %545 {offsets = [0, 3, 5], sizes = [2, 1, 8], strides = [1, 1, 1]} : vector<2x8x16xf32> to vector<2x1x8xf32>
    %550 = vector.extract_strided_slice %545 {offsets = [0, 4, 4], sizes = [2, 1, 8], strides = [1, 1, 1]} : vector<2x8x16xf32> to vector<2x1x8xf32>
    %551 = vector.extract_strided_slice %545 {offsets = [0, 5, 3], sizes = [2, 1, 8], strides = [1, 1, 1]} : vector<2x8x16xf32> to vector<2x1x8xf32>
    %552 = vector.extract_strided_slice %545 {offsets = [0, 6, 2], sizes = [2, 1, 8], strides = [1, 1, 1]} : vector<2x8x16xf32> to vector<2x1x8xf32>
    %553 = vector.extract_strided_slice %545 {offsets = [0, 7, 1], sizes = [2, 1, 8], strides = [1, 1, 1]} : vector<2x8x16xf32> to vector<2x1x8xf32>
    %554 = tpu.concatenate %546, %547, %548, %549, %550, %551, %552, %553 in 1 : vector<2x1x8xf32>, vector<2x1x8xf32>, vector<2x1x8xf32>, vector<2x1x8xf32>, vector<2x1x8xf32>, vector<2x1x8xf32>, vector<2x1x8xf32>, vector<2x1x8xf32> -> vector<2x8x8xf32>
    %555 = vector.extract_strided_slice %369 {offsets = [0, 3], sizes = [16, 1], strides = [1, 1]} : vector<16x8xf32> to vector<16x1xf32>
    %556 = vector.shape_cast %555 : vector<16x1xf32> to vector<2x8x1xf32>
    %557 = vector.extract_strided_slice %369 {offsets = [0, 7], sizes = [16, 1], strides = [1, 1]} : vector<16x8xf32> to vector<16x1xf32>
    %558 = vector.shape_cast %557 : vector<16x1xf32> to vector<2x8x1xf32>
    %559 = arith.subf %558, %556 : vector<2x8x1xf32>
    %560 = vector.broadcast %559 : vector<2x8x1xf32> to vector<2x8x8xf32>
    %561 = arith.mulf %24, %560 : vector<2x8x8xf32>
    %562 = vector.broadcast %556 : vector<2x8x1xf32> to vector<2x8x8xf32>
    %563 = arith.addf %562, %561 : vector<2x8x8xf32>
    %564 = arith.addf %543, %554 : vector<2x8x8xf32>
    %565 = arith.addf %564, %563 : vector<2x8x8xf32>
    %cst_108 = arith.constant 0.353553385 : f32
    %566 = vector.broadcast %cst_108 : f32 to vector<2x8x8xf32>
    %567 = arith.mulf %565, %566 : vector<2x8x8xf32>
    %568 = arith.addf %567, %17 : vector<2x8x8xf32>
    %cst_109 = arith.constant dense<0xFF800000> : vector<2x8xf32>
    %569 = vector.multi_reduction <maximumf>, %568, %cst_109 [2] : vector<2x8x8xf32> to vector<2x8xf32>
    %570 = vector.shape_cast %569 : vector<2x8xf32> to vector<2x8x1xf32>
    %571 = vector.broadcast %570 : vector<2x8x1xf32> to vector<2x8x8xf32>
    %572 = arith.subf %568, %571 : vector<2x8x8xf32>
    %573 = math.exp %572 : vector<2x8x8xf32>
    %cst_110 = arith.constant dense<0.000000e+00> : vector<2x8xf32>
    %574 = vector.multi_reduction <add>, %573, %cst_110 [2] : vector<2x8x8xf32> to vector<2x8xf32>
    %575 = vector.shape_cast %574 : vector<2x8xf32> to vector<2x8x1xf32>
    %576 = tpu.reciprocal %575 {approx = true} : vector<2x8x1xf32> -> vector<2x8x1xf32>
    %577 = vector.broadcast %576 : vector<2x8x1xf32> to vector<2x8x8xf32>
    %578 = arith.mulf %573, %577 : vector<2x8x8xf32>
    %579 = arith.truncf %578 : vector<2x8x8xf32> to vector<2x8x8xbf16>
    "tpu.trace_start"() <{level = 10 : i32, message = "bij,bjd->bid"}> : () -> ()
    %cst_111 = arith.constant dense<0.000000e+00> : vector<2x8x8xf32>
    %580 = tpu.matmul %579, %535, %cst_111 {dimension_numbers = #tpu.dot_dimension_numbers<[2], [1], [1], [2], [0, 0, 0, 1, 1, 2], [0], [0]>} : vector<2x8x8xbf16>, vector<2x8x8xbf16>, vector<2x8x8xf32> -> vector<2x8x8xf32>
    "tpu.trace_stop"() : () -> ()
    %581 = vector.shape_cast %580 : vector<2x8x8xf32> to vector<16x8xf32>
    %582 = tpu.concatenate %425, %477, %529, %581 in 1 : vector<16x8xf32>, vector<16x8xf32>, vector<16x8xf32>, vector<16x8xf32> -> vector<16x32xf32>
    %583 = arith.truncf %582 : vector<16x32xf32> to vector<16x32xbf16>
    %cst_112 = arith.constant dense<0.000000e+00> : vector<16x32xf32>
    %584 = tpu.matmul %583, %345, %cst_112 {dimension_numbers = #tpu.dot_dimension_numbers<[1], [0], [0], [1], [0, 0, 1, 1], [], []>} : vector<16x32xbf16>, vector<32x32xbf16>, vector<16x32xf32> -> vector<16x32xf32>
    %585 = arith.addf %584, %339 : vector<16x32xf32>
    %cst_113 = arith.constant dense<0.000000e+00> : vector<16xf32>
    %586 = vector.multi_reduction <add>, %585, %cst_113 [1] : vector<16x32xf32> to vector<16xf32>
    %587 = vector.shape_cast %586 : vector<16xf32> to vector<16x1xf32>
    %cst_114 = arith.constant 3.200000e+01 : f32
    %588 = vector.broadcast %cst_114 : f32 to vector<16x1xf32>
    %589 = arith.divf %587, %588 : vector<16x1xf32>
    %590 = vector.broadcast %589 : vector<16x1xf32> to vector<16x32xf32>
    %591 = arith.subf %585, %590 : vector<16x32xf32>
    %592 = arith.mulf %591, %591 : vector<16x32xf32>
    %cst_115 = arith.constant dense<0.000000e+00> : vector<16xf32>
    %593 = vector.multi_reduction <add>, %592, %cst_115 [1] : vector<16x32xf32> to vector<16xf32>
    %594 = vector.shape_cast %593 : vector<16xf32> to vector<16x1xf32>
    %cst_116 = arith.constant 3.200000e+01 : f32
    %595 = vector.broadcast %cst_116 : f32 to vector<16x1xf32>
    %596 = arith.divf %594, %595 : vector<16x1xf32>
    %597 = vector.broadcast %589 : vector<16x1xf32> to vector<16x32xf32>
    %598 = arith.subf %585, %597 : vector<16x32xf32>
    %cst_117 = arith.constant 9.99999996E-13 : f32
    %599 = vector.broadcast %cst_117 : f32 to vector<16x1xf32>
    %600 = arith.addf %596, %599 : vector<16x1xf32>
    %601 = math.rsqrt %600 : vector<16x1xf32>
    %602 = vector.broadcast %601 : vector<16x1xf32> to vector<16x32xf32>
    %603 = arith.mulf %598, %602 : vector<16x32xf32>
    %604 = vector.broadcast %355 : vector<1x32xf32> to vector<16x32xf32>
    %605 = arith.mulf %603, %604 : vector<16x32xf32>
    %606 = vector.broadcast %356 : vector<1x32xf32> to vector<16x32xf32>
    %607 = arith.addf %605, %606 : vector<16x32xf32>
    %608 = arith.truncf %607 : vector<16x32xf32> to vector<16x32xbf16>
    %cst_118 = arith.constant dense<0.000000e+00> : vector<16x64xf32>
    %609 = tpu.matmul %608, %347, %cst_118 {dimension_numbers = #tpu.dot_dimension_numbers<[1], [0], [0], [1], [0, 0, 1, 1], [], []>} : vector<16x32xbf16>, vector<32x64xbf16>, vector<16x64xf32> -> vector<16x64xf32>
    %610 = vector.broadcast %357 : vector<1x64xf32> to vector<16x64xf32>
    %611 = arith.addf %609, %610 : vector<16x64xf32>
    %612 = arith.mulf %611, %611 : vector<16x64xf32>
    %613 = arith.mulf %611, %612 : vector<16x64xf32>
    %cst_119 = arith.constant 4.471500e-02 : f32
    %614 = vector.broadcast %cst_119 : f32 to vector<16x64xf32>
    %615 = arith.mulf %614, %613 : vector<16x64xf32>
    %616 = arith.addf %611, %615 : vector<16x64xf32>
    %cst_120 = arith.constant 0.797884583 : f32
    %617 = vector.broadcast %cst_120 : f32 to vector<16x64xf32>
    %618 = arith.mulf %617, %616 : vector<16x64xf32>
    %619 = math.tanh %618 : vector<16x64xf32>
    %cst_121 = arith.constant 1.000000e+00 : f32
    %620 = vector.broadcast %cst_121 : f32 to vector<16x64xf32>
    %621 = arith.addf %620, %619 : vector<16x64xf32>
    %cst_122 = arith.constant 5.000000e-01 : f32
    %622 = vector.broadcast %cst_122 : f32 to vector<16x64xf32>
    %623 = arith.mulf %622, %621 : vector<16x64xf32>
    %624 = arith.mulf %611, %623 : vector<16x64xf32>
    %625 = arith.truncf %624 : vector<16x64xf32> to vector<16x64xbf16>
    %cst_123 = arith.constant dense<0.000000e+00> : vector<16x32xf32>
    %626 = tpu.matmul %625, %349, %cst_123 {dimension_numbers = #tpu.dot_dimension_numbers<[1], [0], [0], [1], [0, 0, 1, 1], [], []>} : vector<16x64xbf16>, vector<64x32xbf16>, vector<16x32xf32> -> vector<16x32xf32>
    %627 = vector.broadcast %358 : vector<1x32xf32> to vector<16x32xf32>
    %628 = arith.addf %626, %627 : vector<16x32xf32>
    %629 = arith.addf %628, %607 : vector<16x32xf32>
    %cst_124 = arith.constant dense<0.000000e+00> : vector<16xf32>
    %630 = vector.multi_reduction <add>, %629, %cst_124 [1] : vector<16x32xf32> to vector<16xf32>
    %631 = vector.shape_cast %630 : vector<16xf32> to vector<16x1xf32>
    %cst_125 = arith.constant 3.200000e+01 : f32
    %632 = vector.broadcast %cst_125 : f32 to vector<16x1xf32>
    %633 = arith.divf %631, %632 : vector<16x1xf32>
    %634 = vector.broadcast %633 : vector<16x1xf32> to vector<16x32xf32>
    %635 = arith.subf %629, %634 : vector<16x32xf32>
    %636 = arith.mulf %635, %635 : vector<16x32xf32>
    %cst_126 = arith.constant dense<0.000000e+00> : vector<16xf32>
    %637 = vector.multi_reduction <add>, %636, %cst_126 [1] : vector<16x32xf32> to vector<16xf32>
    %638 = vector.shape_cast %637 : vector<16xf32> to vector<16x1xf32>
    %cst_127 = arith.constant 3.200000e+01 : f32
    %639 = vector.broadcast %cst_127 : f32 to vector<16x1xf32>
    %640 = arith.divf %638, %639 : vector<16x1xf32>
    %641 = vector.broadcast %633 : vector<16x1xf32> to vector<16x32xf32>
    %642 = arith.subf %629, %641 : vector<16x32xf32>
    %cst_128 = arith.constant 9.99999996E-13 : f32
    %643 = vector.broadcast %cst_128 : f32 to vector<16x1xf32>
    %644 = arith.addf %640, %643 : vector<16x1xf32>
    %645 = math.rsqrt %644 : vector<16x1xf32>
    %646 = vector.broadcast %645 : vector<16x1xf32> to vector<16x32xf32>
    %647 = arith.mulf %642, %646 : vector<16x32xf32>
    %648 = vector.broadcast %359 : vector<1x32xf32> to vector<16x32xf32>
    %649 = arith.mulf %647, %648 : vector<16x32xf32>
    %650 = vector.broadcast %360 : vector<1x32xf32> to vector<16x32xf32>
    %651 = arith.addf %649, %650 : vector<16x32xf32>
    %652 = vector.shape_cast %651 : vector<16x32xf32> to vector<2x8x32xf32>
    %653 = vector.extract_strided_slice %652 {offsets = [0, 7, 0], sizes = [2, 1, 32], strides = [1, 1, 1]} : vector<2x8x32xf32> to vector<2x1x32xf32>
    %654 = vector.shape_cast %653 : vector<2x1x32xf32> to vector<2x32xf32>
    %c0_129 = arith.constant 0 : index
    %c0_130 = arith.constant 0 : index
    %655 = vector.load %arg13[%c0_129, %c0_130] : memref<2x32xf32, #tpu.memory_space<vmem>>, vector<1x32xf32>
    %c1_131 = arith.constant 1 : index
    %c0_132 = arith.constant 0 : index
    %656 = vector.load %arg13[%c1_131, %c0_132] : memref<2x32xf32, #tpu.memory_space<vmem>>, vector<1x2xf32>
    %657 = arith.truncf %654 : vector<2x32xf32> to vector<2x32xbf16>
    %c0_133 = arith.constant 0 : index
    %c0_134 = arith.constant 0 : index
    %658 = vector.load %arg11[%c0_133, %c0_134] : memref<32x32xbf16, #tpu.memory_space<vmem>>, vector<32x32xbf16>
    %cst_135 = arith.constant dense<0.000000e+00> : vector<2x32xf32>
    %659 = tpu.matmul %657, %658, %cst_135 {dimension_numbers = #tpu.dot_dimension_numbers<[1], [0], [0], [1], [0, 0, 1, 1], [], []>} : vector<2x32xbf16>, vector<32x32xbf16>, vector<2x32xf32> -> vector<2x32xf32>
    %660 = vector.broadcast %655 : vector<1x32xf32> to vector<2x32xf32>
    %661 = arith.addf %659, %660 : vector<2x32xf32>
    %662 = math.tanh %661 : vector<2x32xf32>
    %663 = arith.truncf %662 : vector<2x32xf32> to vector<2x32xbf16>
    %c0_136 = arith.constant 0 : index
    %c0_137 = arith.constant 0 : index
    %664 = vector.load %arg12[%c0_136, %c0_137] : memref<32x2xbf16, #tpu.memory_space<vmem>>, vector<32x2xbf16>
    %cst_138 = arith.constant dense<0.000000e+00> : vector<2x2xf32>
    %665 = tpu.matmul %663, %664, %cst_138 {dimension_numbers = #tpu.dot_dimension_numbers<[1], [0], [0], [1], [0, 0, 1, 1], [], []>} : vector<2x32xbf16>, vector<32x2xbf16>, vector<2x2xf32> -> vector<2x2xf32>
    %666 = vector.broadcast %656 : vector<1x2xf32> to vector<2x2xf32>
    %667 = arith.addf %665, %666 : vector<2x2xf32>
    %cst_139 = arith.constant dense<0xFF800000> : vector<2xf32>
    %668 = vector.multi_reduction <maximumf>, %667, %cst_139 [1] : vector<2x2xf32> to vector<2xf32>
    %669 = vector.shape_cast %668 : vector<2xf32> to vector<2x1xf32>
    %670 = vector.broadcast %669 : vector<2x1xf32> to vector<2x2xf32>
    %671 = arith.subf %667, %670 : vector<2x2xf32>
    %672 = math.exp %671 : vector<2x2xf32>
    %cst_140 = arith.constant dense<0.000000e+00> : vector<2xf32>
    %673 = vector.multi_reduction <add>, %672, %cst_140 [1] : vector<2x2xf32> to vector<2xf32>
    %674 = vector.shape_cast %673 : vector<2xf32> to vector<2x1xf32>
    %675 = vector.broadcast %674 : vector<2x1xf32> to vector<2x2xf32>
    %676 = arith.divf %672, %675 : vector<2x2xf32>
    %677 = vector.extract_strided_slice %676 {offsets = [0, 0], sizes = [2, 1], strides = [1, 1]} : vector<2x2xf32> to vector<2x1xf32>
    %678 = vector.extract_strided_slice %676 {offsets = [0, 1], sizes = [2, 1], strides = [1, 1]} : vector<2x2xf32> to vector<2x1xf32>
    %c0_141 = arith.constant 0 : index
    %c0_142 = arith.constant 0 : index
    %679 = vector.load %arg14[%c0_141, %c0_142] : memref<2x1xf32, #tpu.memory_space<vmem>>, vector<2x1xf32>
    tpu.vector_store %arg14[%c0_141, %c0_142], %678 {strides = array<i32>} : memref<2x1xf32, #tpu.memory_space<vmem>>, vector<2x1xf32>,
    %680 = arith.cmpf ogt, %678, %677 : vector<2x1xf32>
    %681 = arith.extui %680 : vector<2x1xi1> to vector<2x1xi32>
    %c0_143 = arith.constant 0 : index
    %c0_144 = arith.constant 0 : index
    %682 = vector.load %arg15[%c0_143, %c0_144] : memref<2x1xi32, #tpu.memory_space<vmem>>, vector<2x1xi32>
    tpu.vector_store %arg15[%c0_143, %c0_144], %681 {strides = array<i32>} : memref<2x1xi32, #tpu.memory_space<vmem>>, vector<2x1xi32>,
    %c0_145 = arith.constant 0 : index
    %c0_146 = arith.constant 0 : index
    %683 = vector.load %arg4[%c0_145, %c0_146] : memref<2x1xf32, #tpu.memory_space<vmem>>, vector<2x1xf32>
    %684 = arith.subf %678, %683 : vector<2x1xf32>
    %685 = arith.mulf %684, %684 : vector<2x1xf32>
    %cst_147 = arith.constant dense<0.000000e+00> : vector<1xf32>
    %686 = vector.multi_reduction <add>, %685, %cst_147 [0] : vector<2x1xf32> to vector<1xf32>
    %687 = vector.shape_cast %686 : vector<1xf32> to vector<1x1xf32>
    %cst_148 = arith.constant 2.000000e+00 : f32
    %688 = vector.broadcast %cst_148 : f32 to vector<1x1xf32>
    %689 = arith.divf %687, %688 : vector<1x1xf32>
    %c0_149 = arith.constant 0 : index
    %c0_150 = arith.constant 0 : index
    %690 = vector.load %arg16[%c0_149, %c0_150] : memref<1x1xf32, #tpu.memory_space<vmem>>, vector<1x1xf32>
    tpu.vector_store %arg16[%c0_149, %c0_150], %689 {strides = array<i32>} : memref<1x1xf32, #tpu.memory_space<vmem>>, vector<1x1xf32>,
    return
  }
}

</mosaic_0001>

<bundles_post_ra>
// kernel: xlnet_forward.1
= control target key start
LH: loop header
LB: loop body
LE: loop exit
PB: predicated region body
PF: predicated region fallthrough
CT: control target
= control target key end

     0   :  { %s6378_s0 = inlined_call_operand.vmem [shape: bf16[16,32], index: 0, kind: input, shape index: {}]   ;;  %s6379_s1 = inlined_call_operand.vmem [shape: bf16[16,32], index: 1, kind: input, shape index: {}]   ;;  %s6380_s2 = inlined_call_operand.vmem [shape: f32[2,8], index: 2, kind: input, shape index: {}]   ;;  %s6381_s3 = inlined_call_operand.vmem [shape: f32[2,8], index: 3, kind: input, shape index: {}]   ;;  %s6382_s4 = inlined_call_operand.vmem [shape: f32[2,1], index: 4, kind: input, shape index: {}]   ;;  %s6383_s5 = inlined_call_operand.vmem [shape: bf16[2,32,104], index: 5, kind: input, shape index: {}]   ;;  %s6384_s6 = inlined_call_operand.vmem [shape: bf16[2,32,32], index: 6, kind: input, shape index: {}]   ;;  %s6385_s7 = inlined_call_operand.vmem [shape: bf16[2,32,32], index: 7, kind: input, shape index: {}]   ;;  %s6386_s8 = inlined_call_operand.vmem [shape: bf16[2,32,64], index: 8, kind: input, shape index: {}]   ;;  %s6387_s9 = inlined_call_operand.vmem [shape: bf16[2,64,32], index: 9, kind: input, shape index: {}]   ;;  %s6388_s10 = inlined_call_operand.vmem [shape: f32[2,9,64], index: 10, kind: input, shape index: {}]   ;;  %s6389_s11 = inlined_call_operand.vmem [shape: bf16[32,32], index: 11, kind: input, shape index: {}]   ;;  %s6390_s12 = inlined_call_operand.vmem [shape: bf16[32,2], index: 12, kind: input, shape index: {}]   ;;  %s6391_s13 = inlined_call_operand.vmem [shape: f32[2,32], index: 13, kind: input, shape index: {}]   ;;  %s6392_s14 = inlined_call_operand.vmem [shape: f32[2,1], index: 14, kind: output, shape index: {0}]   ;;  %s6393_s15 = inlined_call_operand.vmem [shape: s32[2,1], index: 15, kind: output, shape index: {1}]   ;;  %s6394_s16 = inlined_call_operand.hbm [shape: f32[1,1], index: 16, kind: output, shape index: {2}]  }
   0x1   :  { %6415 = sst [smem:[#allocation5_spill]] %s6378_s0 }
   0x2   :  { %v4960_v0 = vld [vmem:[%s6383_s5] sm:$0xff]   ;;  %v5113_v1 = vmov 0.0   ;;  %v4962_v3 = vld [vmem:[%s6383_s5 + $0x8] sm:$0xff]   ;;  %vm5114_vm0 = vmmov 0   ;;  %s6416_s0 = sld [smem:[#allocation5_spill]]  ;;  %vm203_vm1 = vcmask 261120  }
   0x3   :  { %4525 = vmatprep.subr.bf16.mxu0 %v5113_v1  ;;  %4533 = vmatprep.subr.bf16.mxu1 %v5113_v1  ;;  %v4961_v2 = vld [vmem:[%s6384_s6] sm:$0xff]   ;;  %v4963_v4 = vld [vmem:[%s6384_s6 + $0x8] sm:$0xff]  }
   0x4   :  { %4526 = vmatpush3.bf16.msra.mxu0 %v4960_v0  ;;  %4529 = vmatprep.mubr.msk.bf16.mxu0 %vm5114_vm0, %v5113_v1  ;;  %v4965_v6 = vld [vmem:[%s6379_s1] sm:$0xff]  }
   0x5   :  { %4534 = vmatpush3.bf16.msra.mxu1 %v4961_v2  ;;  %4527 = vmatprep.subr.bf16.mxu0 %v5113_v1 }
   0x6   :  { %4535 = vmatprep.subr.bf16.mxu1 %v5113_v1  ;;  %4537 = vmatprep.mubr.msk.bf16.mxu1 %vm5114_vm0, %v5113_v1 }
   0x8   :  { %v156_v5 = vld [vmem:[%s6416_s0] sm:$0xff]   ;;  %4528 = vmatpush3.bf16.msra.mxu0 %v4962_v3 }
   0x9   :  { %4536 = vmatpush3.bf16.msra.mxu1 %v4963_v4  ;;  %4541 = vmatprep.subr.bf16.mxu0 %v5113_v1 }
   0xa   :  { %4547 = vmatprep.subr.bf16.mxu1 %v5113_v1 }
   0xb   :  { %4530 = vmatmul.mubr.msk.bf16.vlgmr.msra.gmra.mrb[0].mxu0 %vm203_vm1, %v156_v5 }
   0xc   :  { %4538 = vmatmul.mubr.msk.bf16.vlgmr.msra.gmra.mrb[0].mxu1 %vm203_vm1, %v4965_v6  ;;  %4543 = vmatprep.mubr.msk.bf16.mxu0 %vm5114_vm0, %v5113_v1 }
   0xd   :  { %4549 = vmatprep.mubr.msk.bf16.mxu1 %vm5114_vm0, %v5113_v1 }
   0xe   :  { %22 = vsyncpa [#allocation3], 0  ;;  %v54_v7 = vlaneseq  ;;  %v184_v10 = vld [vmem:[%s6388_s10] sm:$0xff]  ;;  %s5115_s21 = smov 96   ;;  %vm337_vm2 = vcmask 64512   ;;  %v5116_v30 = vmov 96  }
   0xf   :  { %4905 = vset.pattern.permute.xlu0 %v5116_v30  ;;  %v5117_v31 = vmov 100   ;;  %s5118_s22 = smov 4   ;;  %s5119_s23 = smov 2   ;;  %v53_v48 = vld [vmem:[%s6381_s3] sm:$0x3]  ;;  %vm429_vm3 = vcmask 1040384  }
  0x10   :  { %v5268_v8 = vshrl.u32 %v54_v7, 7  ;;  %4904 = vset.pattern.permute.xlu1 %v5117_v31  ;;  %s5120_s24 = smov 1   ;;  %s5121_s25 = smov 3   ;;  %vm432_vm4 = vcmask 1041408   ;;  %vm435_vm5 = vcmask 1042432   ;;  %vm438_vm6 = vcmask 1043456  }
  0x11   :  { %s5122_s26 = smov 6   ;;  %s5123_s27 = smov 5   ;;  %vm441_vm7 = vcmask 1044480   ;;  %vm444_vm8 = vcmask 1045504   ;;  %vm447_vm9 = vcmask 1046528   ;;  %vm1833_vm14 = vcmask 130048  }
  0x12   :  { %v5271_v9 = vsub.s32 1, %v5268_v8  ;;  %v311_v12 = vsub.s32 2, %v5268_v8  ;;  %v5306_v29 = vsub.s32 0, %v5268_v8  ;;  %s5124_s28 = smov 7   ;;  %s5125_s3 = smov 120   ;;  %vm1836_vm15 = vcmask 195584  }
  0x13   :  { %s6413_s19 = smov 88   ;;  %s6411_s20 = smov 56  }
  0x14   :  { %v328_v11 = vrot.slane %v184_v10, %v5271_v9  ;;  %v312_v24 = vrot.slane %v184_v10, %v311_v12  ;;  %v322_v32 = vrot.slane %v184_v10, %v5306_v29  ;;  %v104_v50 = vrot.slane %v53_v48, %v5306_v29  ;;  %s6396_s29 = smov 112   ;;  %s6408_s30 = smov 80  }
  0x15   :  { %s6402_s17 = smov 48   ;;  %s6400_s18 = smov 72  }
  0xde   :  { %v241_v13 = vpop.f32.mrb[0].mxu0 }
  0xdf   :  { %v329_v14 = vadd.f32 %v328_v11, %v241_v13  ;;  %v5278_v15 = vpack.c.bf16 %v241_v13, %v241_v13  ;;  %v302_v16 = vpop.f32.mrb[0].mxu1  ;;  %v4531_v17 = vpop.f32.mrb[1].mxu0  ;;  %v323_v36 = vadd.f32 %v322_v32, %v241_v13 }
  0xe0   :  { %v4539_v18 = vpop.f32.mrb[1].mxu1  ;;  %v5280_v19 = vpop.f32.mrb[2].mxu0 }
  0xe1   :  { %v330_v20 = vadd.f32 %v328_v11, %v5280_v19  ;;  %v5285_v21 = vpack.c.bf16 %v5280_v19, %v5280_v19  ;;  %v305_v22 = vpop.f32.mrb[2].mxu1  ;;  %483 = vrot.lane.b32.xlu0 %v5278_v15, %s5115_s21  ;;  %v4532_v23 = vpop.f32.mrb[3].mxu0  ;;  %v324_v39 = vadd.f32 %v322_v32, %v5280_v19  ;;  %v5318_v41 = vpack.c.bf16 %v323_v36, %v323_v36 }
  0xe2   :  { %v5291_v25 = vpack.c.bf16 %v305_v22, %v302_v16  ;;  %v4540_v26 = vpop.f32.mrb[3].mxu1 }
  0xe3   :  { %v5293_v27 = vpack.c.bf16 %v330_v20, %v329_v14  ;;  %536 = vrot.lane.b32.xlu1 %v5285_v21, %s5115_s21  ;;  %v5322_v42 = vpack.c.bf16 %v324_v39, %v324_v39  ;;  %v5126_v20 = vmov 1966171168   ;;  %v52_v26 = vld [vmem:[%s6380_s2] sm:$0x3]  ;;  %s5127_s2 = smov 64  }
  0xe4   :  { %v342_v28 = vsel %vm337_vm2, %v5291_v25, 0  ;;  %v66_v22 = vunpack.c.l.s4 %v5126_v20  ;;  %vm61_vm10 = vcmp.eq.f32.partialorder %v52_v26, 0.0 }
  0xe5   :  { %4542 = vmatpush3.bf16.xpose.msra.mxu0 %v342_v28  ;;  %314 = vrot.lane.b32.xlu0 %v312_v24, %s5115_s21 }
  0xe6   :  { %4553 = vmatprep.subr.bf16.mxu0 %v5113_v1  ;;  %v67_v23 = vunpack.c.0.s8 %v66_v22 }
  0xe8   :  { %v70_v24 = vsub.s32 %v67_v23, %v5268_v8 }
  0xea   :  { %v122_v28 = vrot.slane %v53_v48, %v70_v24 }
  0xec   :  { %4544 = vmatmul.mubr.msk.bf16.vlgmr.msra.gmra.mrb[4].mxu0 %vm337_vm2, %v5293_v27 }
  0xed   :  { %4555 = vmatprep.mubr.msk.bf16.mxu0 %vm5114_vm0, %v5113_v1 }
 0x153   :  { %v484_v33 = vpop.permute.xlu0 %483 }
 0x154   :  { %v493_v34 = vsel %vm337_vm2, %v484_v33, 0  ;;  %v130_v33 = vrot.slane %v122_v28, %v70_v24 }
 0x155   :  { %4548 = vmatpush3.bf16.xpose.msra.mxu1 %v493_v34  ;;  %v537_v35 = vpop.permute.xlu1 %536  ;;  %v4290_v34 = vsel %vm61_vm10, 1.0, %v5113_v1  ;;  %vm2043_vm10 = vcmask 523264  }
 0x156   :  { %v546_v37 = vsel %vm337_vm2, %v537_v35, 0  ;;  %4559 = vmatprep.subr.bf16.mxu1 %v5113_v1  ;;  %v141_v35 = vrot.slane %v130_v33, %v5306_v29  ;;  %v71_v36 = vrot.slane %v4290_v34, %v70_v24 }
 0x157   :  { %v315_v38 = vpop.permute.xlu0 %314  ;;  %4554 = vmatpush3.bf16.xpose.msra.mxu0 %v546_v37 }
 0x158   :  { %v5315_v40 = vadd.f32 %v315_v38, %v241_v13  ;;  %4565 = vmatprep.subr.bf16.mxu0 %v5113_v1  ;;  %v5351_v51 = vadd.f32 %v315_v38, %v5280_v19  ;;  %v111_v19 = vrot.slane %v53_v48, %v5271_v9  ;;  %v57_v38 = vand.u32 127, %v54_v7 }
 0x159   :  { %v79_v39 = vrot.slane %v71_v36, %v70_v24  ;;  %v72_v20 = vcombine.high %v71_v36, %v71_v36 }
 0x15a   :  { %452 = vrot.lane.b32.xlu1 %v5315_v40, %s5118_s22  ;;  %vm58_vm12 = vcmp.ne.s32.totalorder %v5268_v8, %v57_v38 }
 0x15b   :  { %v86_v23 = vrot.slane %v72_v20, %v70_v24 }
 0x15c   :  { %4550 = vmatmul.mubr.msk.bf16.vlgmr.msra.gmra.mrb[4].mxu1 %vm337_vm2, %v5318_v41 }
 0x15d   :  { %4561 = vmatprep.mubr.msk.bf16.mxu1 %vm5114_vm0, %v5113_v1 }
 0x15e   :  { %4556 = vmatmul.mubr.msk.bf16.vlgmr.msra.gmra.mrb[8].mxu0 %vm337_vm2, %v5322_v42 }
 0x15f   :  { %4567 = vmatprep.mubr.msk.bf16.mxu0 %vm5114_vm0, %v5113_v1 }
 0x1bf   :  { %v378_v43 = vpop.f32.mrb[4].mxu0 }
 0x1c0   :  { %393 = vrot.lane.b32.xlu1 %v378_v43, %s5119_s23  ;;  %387 = vrot.lane.b32.xlu0 %v378_v43, %s5120_s24  ;;  %v4545_v44 = vpop.f32.mrb[5].mxu0 }
 0x1c1   :  { %v5334_v45 = vpop.f32.mrb[6].mxu0  ;;  %v90_v44 = vrot.slane %v79_v39, %v5306_v29 }
 0x1c2   :  { %v4546_v46 = vpop.f32.mrb[7].mxu0 }
 0x1c3   :  { %v4289_v46 = vsel %vm58_vm12, 1.0, %v5113_v1 }
 0x1c4   :  { %405 = vrot.lane.b32.xlu1 %v378_v43, %s5118_s22  ;;  %399 = vrot.lane.b32.xlu0 %v378_v43, %s5121_s25  ;;  %v97_v48 = vmul.f32 %v4289_v46, %v90_v44 }
 0x1c8   :  { %417 = vrot.lane.b32.xlu1 %v378_v43, %s5122_s26  ;;  %411 = vrot.lane.b32.xlu0 %v378_v43, %s5123_s27 }
 0x1cc   :  { %423 = vrot.lane.b32.xlu0 %v378_v43, %s5124_s28  ;;  %v453_v47 = vpop.permute.xlu1 %452 }
 0x1cd   :  { %v5345_v49 = vsub.f32 %v5315_v40, %v453_v47 }
 0x1cf   :  { %462 = vperm.xlu1 %4904, %v5345_v49  }
 0x1d0   :  { %473 = vperm.xlu0 %4905, %v5315_v40  }
 0x1d3   :  { %106 = vbcast.lane.b32.xlu1 %v104_v50, 256 }
 0x1d4   :  { %454 = vrot.lane.b32.xlu0 %v5351_v51, %s5118_s22 }
 0x1d8   :  { %395 = vrot.lane.b32.xlu0 %v5334_v45, %s5119_s23 }
 0x1dc   :  { %407 = vrot.lane.b32.xlu0 %v5334_v45, %s5118_s22 }
 0x1e0   :  { %419 = vrot.lane.b32.xlu0 %v5334_v45, %s5122_s26 }
 0x22f   :  { %v5361_v52 = vpop.f32.mrb[4].mxu1 }
 0x230   :  { %v4551_v53 = vpop.f32.mrb[5].mxu1 }
 0x231   :  { %v532_v54 = vpop.f32.mrb[6].mxu1  ;;  %v5363_v55 = vpop.f32.mrb[8].mxu0 }
 0x232   :  { %v394_v56 = vpop.permute.xlu1 %393  ;;  %v388_v57 = vpop.permute.xlu0 %387 }
 0x233   :  { %v430_v58 = vsel %vm429_vm3, %v378_v43, %v388_v57  ;;  %v4552_v59 = vpop.f32.mrb[7].mxu1  ;;  %v4557_v60 = vpop.f32.mrb[9].mxu0  ;;  %v5403_v57 = vmul.f32 -1e+09, %v97_v48 }
 0x234   :  { %v585_v61 = vpop.f32.mrb[10].mxu0  ;;  %v433_v0 = vsel %vm432_vm4, %v430_v58, %v394_v56 }
 0x235   :  { %v4558_v62 = vpop.f32.mrb[11].mxu0 }
 0x236   :  { %v406_v63 = vpop.permute.xlu1 %405  ;;  %v400_v2 = vpop.permute.xlu0 %399 }
 0x237   :  { %v436_v3 = vsel %vm435_vm5, %v433_v0, %v400_v2 }
 0x238   :  { %v439_v4 = vsel %vm438_vm6, %v436_v3, %v406_v63 }
 0x23a   :  { %v412_v5 = vpop.permute.xlu0 %411  ;;  %v418_v6 = vpop.permute.xlu1 %417 }
 0x23b   :  { %v442_v10 = vsel %vm441_vm7, %v439_v4, %v412_v5 }
 0x23c   :  { %v445_v13 = vsel %vm444_vm8, %v442_v10, %v418_v6 }
 0x23e   :  { %v424_v11 = vpop.permute.xlu0 %423 }
 0x23f   :  { %v448_v14 = vsel %vm447_vm9, %v445_v13, %v424_v11 }
 0x240   :  { %486 = vrot.lane.b32.xlu1 %v448_v14, %s5125_s3  ;;  %v123_v14 = vcombine.high %v122_v28, %v122_v28 }
 0x244   :  { %389 = vrot.lane.b32.xlu1 %v5334_v45, %s5120_s24 }
 0x248   :  { %401 = vrot.lane.b32.xlu1 %v5334_v45, %s5121_s25 }
 0x24c   :  { %413 = vrot.lane.b32.xlu1 %v5334_v45, %s5123_s27 }
 0x24e   :  { %v463_v32 = vpop.permute.xlu1 %462 }
 0x24f   :  { %v474_v16 = vpop.permute.xlu0 %473 }
 0x250   :  { %425 = vrot.lane.b32.xlu1 %v5334_v45, %s5124_s28 }
 0x252   :  { %v107_v37 = vpop.permute.xlu1 %106 }
 0x253   :  { %v455_v17 = vpop.permute.xlu0 %454  ;;  %vm148_vm11 = vcmp.ne.f32.partialorder %v107_v37, %v141_v35 }
 0x254   :  { %v5382_v18 = vsub.f32 %v5351_v51, %v455_v17  ;;  %v5397_v43 = vsel %vm148_vm11, 1.0, %v5113_v1  ;;  %v137_v17 = vrot.slane %v123_v14, %v70_v24  ;;  %v5130_v14 = vmov 97  }
 0x255   :  { %v470_v47 = vmul.f32 %v5397_v43, %v463_v32  ;;  %v94_v32 = vrot.slane %v86_v23, %v5306_v29  ;;  %4908 = vset.pattern.permute.xlu0 %v5130_v14 }
 0x256   :  { %467 = vperm.xlu1 %4904, %v5382_v18  }
 0x257   :  { %v480_v53 = vadd.f32 %v474_v16, %v470_v47  ;;  %v396_v56 = vpop.permute.xlu0 %395  ;;  %v98_v34 = vmul.f32 %v4289_v46, %v94_v32 }
 0x259   :  { %v5425_v39 = vmul.f32 -1e+09, %v98_v34 }
 0x25a   :  { %4906 = vset.pattern.permute.xlu1 %v5116_v30 }
 0x25b   :  { %477 = vperm.xlu1 %4906, %v5351_v51   ;;  %v408_v0 = vpop.permute.xlu0 %407 }
 0x25f   :  { %113 = vbcast.lane.b32.xlu1 %v111_v19, 256  ;;  %v420_v6 = vpop.permute.xlu0 %419  ;;  %v145_v19 = vrot.slane %v137_v17, %v5306_v29 }
 0x2b2   :  { %v487_v50 = vpop.permute.xlu1 %486 }
 0x2b3   :  { %v530_v54 = vadd.f32 %v5361_v52, %v487_v50 }
 0x2b5   :  { %v588_v7 = vadd.f32 %v530_v54, %v480_v53 }
 0x2b6   :  { %v390_v58 = vpop.permute.xlu1 %389 }
 0x2b7   :  { %v590_v59 = vmul.f32 0.35355338, %v588_v7  ;;  %v431_v60 = vsel %vm429_vm3, %v5334_v45, %v390_v58 }
 0x2b8   :  { %v434_v62 = vsel %vm432_vm4, %v431_v60, %v396_v56 }
 0x2b9   :  { %v592_v61 = vadd.f32 %v590_v59, %v5403_v57 }
 0x2ba   :  { %v402_v63 = vpop.permute.xlu1 %401 }
 0x2bb   :  { %v437_v2 = vsel %vm435_vm5, %v434_v62, %v402_v63  ;;  %v594_v3 = vsel %vm337_vm2, %v592_v61, -inf }
 0x2bc   :  { %595 = vmax.xlane.f32.xlu0 %v594_v3  ;;  %v440_v52 = vsel %vm438_vm6, %v437_v2, %v408_v0 }
 0x2be   :  { %v414_v4 = vpop.permute.xlu1 %413 }
 0x2bf   :  { %v443_v5 = vsel %vm441_vm7, %v440_v52, %v414_v4 }
 0x2c0   :  { %v446_v45 = vsel %vm444_vm8, %v443_v5, %v420_v6 }
 0x2c2   :  { %v426_v10 = vpop.permute.xlu1 %425 }
 0x2c3   :  { %v449_v11 = vsel %vm447_vm9, %v446_v45, %v426_v10 }
 0x2c4   :  { %539 = vrot.lane.b32.xlu1 %v449_v11, %s5125_s3 }
 0x2d2   :  { %618 = vrot.lane.b32.xlu0 %v5278_v15, %s5127_s2 }
 0x2d5   :  { %v468_v13 = vpop.permute.xlu1 %467 }
 0x2da   :  { %v478_v16 = vpop.permute.xlu1 %477 }
 0x2de   :  { %v114_v22 = vpop.permute.xlu1 %113 }
 0x2df   :  { %vm149_vm13 = vcmp.ne.f32.partialorder %v114_v22, %v145_v19 }
 0x2e0   :  { %v5420_v26 = vsel %vm149_vm13, 1.0, %v5113_v1 }
 0x2e1   :  { %v471_v33 = vmul.f32 %v5420_v26, %v468_v13  ;;  %v5129_v13 = vmov 101  }
 0x2e2   :  { %4907 = vset.pattern.permute.xlu1 %v5129_v13 }
 0x2e3   :  { %v481_v37 = vadd.f32 %v478_v16, %v471_v33 }
 0x336   :  { %v540_v35 = vpop.permute.xlu1 %539 }
 0x337   :  { %v583_v28 = vadd.f32 %v5363_v55, %v540_v35 }
 0x339   :  { %v589_v38 = vadd.f32 %v583_v28, %v481_v37 }
 0x33b   :  { %v591_v44 = vmul.f32 0.35355338, %v589_v38 }
 0x33d   :  { %v593_v36 = vadd.f32 %v591_v44, %v5425_v39 }
 0x33f   :  { %v597_v24 = vsel %vm337_vm2, %v593_v36, -inf }
 0x340   :  { %598 = vmax.xlane.f32.xlu0 %v597_v24 }
 0x349   :  { %v596_v47 = vpop.xlane.xlu0 %595 }
 0x34a   :  { %v600_v48 = vsub.f32 %v592_v61, %v596_v47 }
 0x34c   :  { %v602_v50 = vmul.f32 1.442695, %v600_v48 }
 0x34d   :  { %v619_v53 = vpop.permute.xlu0 %618 }
 0x34e   :  { %4991 = vpow2.f32 %v602_v50  ;;  %v624_v46 = vsel %vm438_vm6, %v619_v53, 0 }
 0x34f   :  { %4560 = vmatpush3.bf16.msra.mxu1 %v624_v46 }
 0x350   :  { %4571 = vmatprep.subr.bf16.mxu1 %v5113_v1 }
 0x356   :  { %666 = vrot.lane.b32.xlu0 %v5285_v21, %s5127_s2 }
 0x358   :  { %v4992_v55 = vpop.eup %4991 }
 0x359   :  { %v606_v54 = vsel %vm337_vm2, %v4992_v55, 0.0 }
 0x35a   :  { %607 = vadd.xlane.f32.xlu1 %v606_v54  ;;  %848 = vrot.lane.b32.xlu0 %v5278_v15, %s6413_s19 }
 0x35e   :  { %903 = vrot.lane.b32.xlu0 %v5285_v21, %s6413_s19  ;;  %s6423_s19 = smov 104  }
 0x362   :  { %901 = vrot.lane.b32.xlu0 %v5322_v42, %s5125_s3 }
 0x36b   :  { %718 = vrot.lane.b32.xlu1 %v5291_v25, %s5125_s3 }
 0x36f   :  { %715 = vrot.lane.b32.xlu1 %v5293_v27, %s5125_s3 }
 0x3cd   :  { %v599_v56 = vpop.xlane.xlu0 %598 }
 0x3ce   :  { %v601_v7 = vsub.f32 %v593_v36, %v599_v56 }
 0x3d0   :  { %v604_v58 = vmul.f32 1.442695, %v601_v7 }
 0x3d1   :  { %v667_v59 = vpop.permute.xlu0 %666 }
 0x3d2   :  { %4993 = vpow2.f32 %v604_v58  ;;  %v672_v60 = vsel %vm438_vm6, %v667_v59, 0 }
 0x3d3   :  { %4566 = vmatpush3.bf16.msra.mxu0 %v672_v60 }
 0x3d4   :  { %4577 = vmatprep.subr.bf16.mxu0 %v5113_v1 }
 0x3d5   :  { %v849_v4 = vpop.permute.xlu0 %848 }
 0x3d6   :  { %v858_v22 = vsel %vm337_vm2, %v849_v4, 0 }
 0x3d9   :  { %v904_v6 = vpop.permute.xlu0 %903 }
 0x3da   :  { %v913_v45 = vsel %vm337_vm2, %v904_v6, 0 }
 0x3dc   :  { %v4994_v61 = vpop.eup %4993 }
 0x3dd   :  { %v609_v62 = vsel %vm337_vm2, %v4994_v61, 0.0  ;;  %v902_v11 = vpop.permute.xlu0 %901 }
 0x3de   :  { %610 = vadd.xlane.f32.xlu1 %v609_v62 }
 0x3e7   :  { %v608_v63 = vpop.xlane.xlu1 %607 }
 0x3e8   :  { %4995 = vrcp.f32 %v608_v63 }
 0x3eb   :  { %v719_v3 = vpop.permute.xlu1 %718 }
 0x3ec   :  { %v724_v5 = vsel %vm337_vm2, %v719_v3, 0 }
 0x3ef   :  { %846 = vrot.lane.b32.xlu1 %v5318_v41, %s5125_s3  ;;  %v716_v10 = vpop.permute.xlu1 %715 }
 0x3f2   :  { %v4996_v0 = vpop.eup %4995 }
 0x3f3   :  { %v614_v2 = vmul.f32 %v4996_v0, %v4992_v55 }
 0x3f5   :  { %v616_v52 = vpack.c.bf16 %v614_v2, %v614_v2 }
 0x3f7   :  { %4562 = vmatmul.mubr.msk.bf16.vlgmr.msra.gmra.mrb[8].mxu1 %vm337_vm2, %v616_v52 }
 0x3f8   :  { %4572 = vmatpush3.bf16.xpose.msra.mxu1 %v724_v5  ;;  %4573 = vmatprep.mubr.msk.bf16.mxu1 %vm5114_vm0, %v5113_v1 }
 0x3f9   :  { %4583 = vmatprep.subr.bf16.mxu1 %v5113_v1 }
 0x3ff   :  { %4574 = vmatmul.mubr.msk.bf16.vlgmr.msra.gmra.mrb[12].mxu1 %vm337_vm2, %v716_v10 }
 0x400   :  { %4584 = vmatpush3.bf16.xpose.msra.mxu1 %v913_v45  ;;  %4585 = vmatprep.mubr.msk.bf16.mxu1 %vm5114_vm0, %v5113_v1 }
 0x401   :  { %4595 = vmatprep.subr.bf16.mxu1 %v5113_v1 }
 0x407   :  { %4586 = vmatmul.mubr.msk.bf16.vlgmr.msra.gmra.mrb[16].mxu1 %vm337_vm2, %v902_v11 }
 0x408   :  { %4597 = vmatprep.mubr.msk.bf16.mxu1 %vm5114_vm0, %v5113_v1 }
 0x46b   :  { %v611_v16 = vpop.xlane.xlu1 %610 }
 0x46c   :  { %4997 = vrcp.f32 %v611_v16 }
 0x46f   :  { %v847_v23 = vpop.permute.xlu1 %846 }
 0x476   :  { %v4998_v17 = vpop.eup %4997 }
 0x477   :  { %v615_v19 = vmul.f32 %v4998_v17, %v4994_v61 }
 0x479   :  { %v617_v20 = vpack.c.bf16 %v615_v19, %v615_v19 }
 0x47b   :  { %4568 = vmatmul.mubr.msk.bf16.vlgmr.msra.gmra.mrb[12].mxu0 %vm337_vm2, %v617_v20 }
 0x47c   :  { %4578 = vmatpush3.bf16.xpose.msra.mxu0 %v858_v22  ;;  %4579 = vmatprep.mubr.msk.bf16.mxu0 %vm5114_vm0, %v5113_v1 }
 0x47d   :  { %4589 = vmatprep.subr.bf16.mxu0 %v5113_v1 }
 0x483   :  { %4580 = vmatmul.mubr.msk.bf16.vlgmr.msra.gmra.mrb[16].mxu0 %vm337_vm2, %v847_v23 }
 0x484   :  { %4591 = vmatprep.mubr.msk.bf16.mxu0 %vm5114_vm0, %v5113_v1 }
 0x4ca   :  { %v5472_v32 = vpop.f32.mrb[8].mxu1 }
 0x4cb   :  { %v4563_v33 = vpop.f32.mrb[9].mxu1 }
 0x4cc   :  { %v663_v34 = vpop.f32.mrb[10].mxu1 }
 0x4cd   :  { %v4564_v35 = vpop.f32.mrb[11].mxu1 }
 0x4d2   :  { %v760_v37 = vpop.f32.mrb[12].mxu1 }
 0x4d3   :  { %v4575_v28 = vpop.f32.mrb[13].mxu1  ;;  %769 = vrot.lane.b32.xlu0 %v760_v37, %s5120_s24  ;;  %787 = vrot.lane.b32.xlu1 %v760_v37, %s5118_s22 }
 0x4d4   :  { %v763_v38 = vpop.f32.mrb[14].mxu1 }
 0x4d5   :  { %v4576_v44 = vpop.f32.mrb[15].mxu1 }
 0x4d7   :  { %775 = vrot.lane.b32.xlu0 %v760_v37, %s5119_s23  ;;  %799 = vrot.lane.b32.xlu1 %v760_v37, %s5122_s26 }
 0x4da   :  { %v5478_v36 = vpop.f32.mrb[16].mxu1 }
 0x4db   :  { %781 = vrot.lane.b32.xlu0 %v760_v37, %s5121_s25  ;;  %826 = vperm.xlu1 %4907, %v5345_v49   ;;  %v4587_v24 = vpop.f32.mrb[17].mxu1 }
 0x4dc   :  { %v952_v47 = vpop.f32.mrb[18].mxu1 }
 0x4dd   :  { %v4588_v48 = vpop.f32.mrb[19].mxu1 }
 0x4df   :  { %793 = vrot.lane.b32.xlu0 %v760_v37, %s5123_s27 }
 0x4e3   :  { %805 = vrot.lane.b32.xlu0 %v760_v37, %s5124_s28 }
 0x4e7   :  { %836 = vperm.xlu0 %4908, %v5315_v40  }
 0x4eb   :  { %777 = vrot.lane.b32.xlu0 %v763_v38, %s5119_s23 }
 0x4ef   :  { %789 = vrot.lane.b32.xlu0 %v763_v38, %s5118_s22 }
 0x4f3   :  { %801 = vrot.lane.b32.xlu0 %v763_v38, %s5122_s26 }
 0x545   :  { %v770_v50 = vpop.permute.xlu0 %769  ;;  %v788_v56 = vpop.permute.xlu1 %787 }
 0x546   :  { %v811_v46 = vsel %vm429_vm3, %v760_v37, %v770_v50 }
 0x549   :  { %v776_v53 = vpop.permute.xlu0 %775  ;;  %v800_v2 = vpop.permute.xlu1 %799 }
 0x54a   :  { %v813_v55 = vsel %vm432_vm4, %v811_v46, %v776_v53 }
 0x54d   :  { %v782_v54 = vpop.permute.xlu0 %781 }
 0x54e   :  { %v815_v7 = vsel %vm435_vm5, %v813_v55, %v782_v54  ;;  %v5491_v58 = vpop.f32.mrb[12].mxu0 }
 0x54f   :  { %v4569_v59 = vpop.f32.mrb[13].mxu0  ;;  %v817_v62 = vsel %vm438_vm6, %v815_v7, %v788_v56 }
 0x550   :  { %v711_v60 = vpop.f32.mrb[14].mxu0 }
 0x551   :  { %v4570_v61 = vpop.f32.mrb[15].mxu0  ;;  %v794_v63 = vpop.permute.xlu0 %793 }
 0x552   :  { %v819_v0 = vsel %vm441_vm7, %v817_v62, %v794_v63 }
 0x553   :  { %v821_v52 = vsel %vm444_vm8, %v819_v0, %v800_v2 }
 0x555   :  { %v806_v3 = vpop.permute.xlu0 %805 }
 0x556   :  { %v894_v4 = vpop.f32.mrb[16].mxu0  ;;  %v823_v5 = vsel %vm447_vm9, %v821_v52, %v806_v3 }
 0x557   :  { %v4581_v6 = vpop.f32.mrb[17].mxu0  ;;  %851 = vrot.lane.b32.xlu1 %v823_v5, %s5125_s3 }
 0x558   :  { %v897_v10 = vpop.f32.mrb[18].mxu0 }
 0x559   :  { %v4582_v45 = vpop.f32.mrb[19].mxu0 }
 0x55a   :  { %v827_v11 = vpop.permute.xlu1 %826 }
 0x55b   :  { %771 = vrot.lane.b32.xlu1 %v763_v38, %s5120_s24  ;;  %v833_v17 = vmul.f32 %v5397_v43, %v827_v11 }
 0x55f   :  { %783 = vrot.lane.b32.xlu1 %v763_v38, %s5121_s25 }
 0x563   :  { %795 = vrot.lane.b32.xlu1 %v763_v38, %s5123_s27 }
 0x566   :  { %v837_v16 = vpop.permute.xlu0 %836 }
 0x567   :  { %807 = vrot.lane.b32.xlu1 %v763_v38, %s5124_s28  ;;  %v843_v20 = vadd.f32 %v837_v16, %v833_v17 }
 0x56a   :  { %v778_v23 = vpop.permute.xlu0 %777 }
 0x56b   :  { %830 = vperm.xlu1 %4907, %v5382_v18  }
 0x56e   :  { %v790_v47 = vpop.permute.xlu0 %789 }
 0x56f   :  { %4909 = vset.pattern.permute.xlu1 %v5130_v14 }
 0x570   :  { %840 = vperm.xlu1 %4909, %v5351_v51  }
 0x572   :  { %v802_v54 = vpop.permute.xlu0 %801 }
 0x5c9   :  { %v852_v19 = vpop.permute.xlu1 %851 }
 0x5ca   :  { %v895_v22 = vadd.f32 %v894_v4, %v852_v19 }
 0x5cc   :  { %v955_v33 = vadd.f32 %v895_v22, %v843_v20 }
 0x5cd   :  { %v772_v34 = vpop.permute.xlu1 %771 }
 0x5ce   :  { %v957_v35 = vmul.f32 0.35355338, %v955_v33  ;;  %v812_v37 = vsel %vm429_vm3, %v763_v38, %v772_v34 }
 0x5cf   :  { %v814_v24 = vsel %vm432_vm4, %v812_v37, %v778_v23 }
 0x5d0   :  { %v959_v28 = vadd.f32 %v957_v35, %v5403_v57 }
 0x5d1   :  { %v784_v44 = vpop.permute.xlu1 %783 }
 0x5d2   :  { %v816_v48 = vsel %vm435_vm5, %v814_v24, %v784_v44  ;;  %v961_v50 = vsel %vm337_vm2, %v959_v28, -inf }
 0x5d3   :  { %962 = vmax.xlane.f32.xlu0 %v961_v50  ;;  %v818_v46 = vsel %vm438_vm6, %v816_v48, %v790_v47 }
 0x5d5   :  { %v796_v53 = vpop.permute.xlu1 %795 }
 0x5d6   :  { %v820_v55 = vsel %vm441_vm7, %v818_v46, %v796_v53 }
 0x5d7   :  { %v822_v38 = vsel %vm444_vm8, %v820_v55, %v802_v54  ;;  %v5134_v54 = vmov 98  }
 0x5d8   :  { %4911 = vset.pattern.permute.xlu1 %v5134_v54 }
 0x5d9   :  { %v808_v56 = vpop.permute.xlu1 %807 }
 0x5da   :  { %v824_v7 = vsel %vm447_vm9, %v822_v38, %v808_v56  ;;  %v5135_v56 = vmov 102  }
 0x5db   :  { %906 = vrot.lane.b32.xlu1 %v824_v7, %s5125_s3  ;;  %4910 = vset.pattern.permute.xlu0 %v5135_v56 }
 0x5e9   :  { %985 = vrot.lane.b32.xlu0 %v5278_v15, %s6411_s20 }
 0x5ea   :  { %v831_v59 = vpop.permute.xlu1 %830 }
 0x5eb   :  { %v834_v61 = vmul.f32 %v5420_v26, %v831_v59 }
 0x5ef   :  { %v841_v60 = vpop.permute.xlu1 %840 }
 0x5f0   :  { %v844_v63 = vadd.f32 %v841_v60, %v834_v61 }
 0x64d   :  { %v907_v62 = vpop.permute.xlu1 %906 }
 0x64e   :  { %v950_v0 = vadd.f32 %v5478_v36, %v907_v62 }
 0x650   :  { %v956_v2 = vadd.f32 %v950_v0, %v844_v63 }
 0x652   :  { %v958_v3 = vmul.f32 0.35355338, %v956_v2 }
 0x654   :  { %v960_v52 = vadd.f32 %v958_v3, %v5425_v39 }
 0x656   :  { %v964_v4 = vsel %vm337_vm2, %v960_v52, -inf }
 0x657   :  { %965 = vmax.xlane.f32.xlu0 %v964_v4 }
 0x660   :  { %v963_v5 = vpop.xlane.xlu0 %962 }
 0x661   :  { %v967_v6 = vsub.f32 %v959_v28, %v963_v5 }
 0x663   :  { %v969_v10 = vmul.f32 1.442695, %v967_v6 }
 0x664   :  { %v986_v45 = vpop.permute.xlu0 %985 }
 0x665   :  { %4999 = vpow2.f32 %v969_v10  ;;  %v991_v11 = vsel %vm438_vm6, %v986_v45, 0 }
 0x666   :  { %4590 = vmatpush3.bf16.msra.mxu0 %v991_v11 }
 0x667   :  { %4601 = vmatprep.subr.bf16.mxu0 %v5113_v1 }
 0x66d   :  { %1033 = vrot.lane.b32.xlu0 %v5285_v21, %s6411_s20  ;;  %s6427_s20 = smov 24  }
 0x66f   :  { %v5000_v36 = vpop.eup %4999 }
 0x670   :  { %v973_v16 = vsel %vm337_vm2, %v5000_v36, 0.0 }
 0x671   :  { %1210 = vrot.lane.b32.xlu0 %v5318_v41, %s6396_s29  ;;  %974 = vadd.xlane.f32.xlu1 %v973_v16 }
 0x675   :  { %1266 = vrot.lane.b32.xlu0 %v5285_v21, %s6408_s30 }
 0x679   :  { %1264 = vrot.lane.b32.xlu0 %v5322_v42, %s6396_s29 }
 0x682   :  { %1083 = vrot.lane.b32.xlu1 %v5291_v25, %s6396_s29 }
 0x686   :  { %1081 = vrot.lane.b32.xlu1 %v5293_v27, %s6396_s29  ;;  %s6398_s29 = smov 104  }
 0x6e4   :  { %v966_v17 = vpop.xlane.xlu0 %965 }
 0x6e5   :  { %v968_v19 = vsub.f32 %v960_v52, %v966_v17 }
 0x6e7   :  { %v971_v20 = vmul.f32 1.442695, %v968_v19 }
 0x6e8   :  { %v1034_v22 = vpop.permute.xlu0 %1033 }
 0x6e9   :  { %5001 = vpow2.f32 %v971_v20  ;;  %v1039_v23 = vsel %vm438_vm6, %v1034_v22, 0 }
 0x6ea   :  { %4596 = vmatpush3.bf16.msra.mxu1 %v1039_v23 }
 0x6eb   :  { %4607 = vmatprep.subr.bf16.mxu1 %v5113_v1 }
 0x6ec   :  { %v1211_v47 = vpop.permute.xlu0 %1210 }
 0x6f0   :  { %v1267_v50 = vpop.permute.xlu0 %1266 }
 0x6f1   :  { %v1276_v46 = vsel %vm337_vm2, %v1267_v50, 0 }
 0x6f3   :  { %v5002_v33 = vpop.eup %5001 }
 0x6f4   :  { %v976_v34 = vsel %vm337_vm2, %v5002_v33, 0.0  ;;  %v1265_v55 = vpop.permute.xlu0 %1264 }
 0x6f5   :  { %977 = vadd.xlane.f32.xlu1 %v976_v34 }
 0x6fe   :  { %v975_v35 = vpop.xlane.xlu1 %974 }
 0x6ff   :  { %5003 = vrcp.f32 %v975_v35 }
 0x702   :  { %v1084_v44 = vpop.permute.xlu1 %1083 }
 0x703   :  { %v1089_v48 = vsel %vm337_vm2, %v1084_v44, 0 }
 0x706   :  { %1212 = vrot.lane.b32.xlu1 %v5278_v15, %s6408_s30  ;;  %v1082_v53 = vpop.permute.xlu1 %1081 }
 0x709   :  { %v5004_v37 = vpop.eup %5003 }
 0x70a   :  { %v981_v28 = vmul.f32 %v5004_v37, %v5000_v36 }
 0x70c   :  { %v983_v24 = vpack.c.bf16 %v981_v28, %v981_v28 }
 0x70e   :  { %4592 = vmatmul.mubr.msk.bf16.vlgmr.msra.gmra.mrb[20].mxu0 %vm337_vm2, %v983_v24 }
 0x70f   :  { %4602 = vmatpush3.bf16.xpose.msra.mxu0 %v1089_v48  ;;  %4603 = vmatprep.mubr.msk.bf16.mxu0 %vm5114_vm0, %v5113_v1 }
 0x710   :  { %4613 = vmatprep.subr.bf16.mxu0 %v5113_v1 }
 0x716   :  { %4604 = vmatmul.mubr.msk.bf16.vlgmr.msra.gmra.mrb[24].mxu0 %vm337_vm2, %v1082_v53 }
 0x717   :  { %4614 = vmatpush3.bf16.xpose.msra.mxu0 %v1276_v46  ;;  %4615 = vmatprep.mubr.msk.bf16.mxu0 %vm5114_vm0, %v5113_v1 }
 0x718   :  { %4625 = vmatprep.subr.bf16.mxu0 %v5113_v1 }
 0x71e   :  { %4616 = vmatmul.mubr.msk.bf16.vlgmr.msra.gmra.mrb[28].mxu0 %vm337_vm2, %v1265_v55 }
 0x71f   :  { %4627 = vmatprep.mubr.msk.bf16.mxu0 %vm5114_vm0, %v5113_v1 }
 0x782   :  { %v978_v38 = vpop.xlane.xlu1 %977 }
 0x783   :  { %5005 = vrcp.f32 %v978_v38 }
 0x786   :  { %v1213_v60 = vpop.permute.xlu1 %1212 }
 0x787   :  { %v1222_v62 = vsel %vm337_vm2, %v1213_v60, 0 }
 0x78d   :  { %v5006_v7 = vpop.eup %5005 }
 0x78e   :  { %v982_v59 = vmul.f32 %v5006_v7, %v5002_v33 }
 0x790   :  { %v984_v61 = vpack.c.bf16 %v982_v59, %v982_v59 }
 0x792   :  { %4598 = vmatmul.mubr.msk.bf16.vlgmr.msra.gmra.mrb[20].mxu1 %vm337_vm2, %v984_v61 }
 0x793   :  { %4608 = vmatpush3.bf16.xpose.msra.mxu1 %v1222_v62  ;;  %4609 = vmatprep.mubr.msk.bf16.mxu1 %vm5114_vm0, %v5113_v1 }
 0x794   :  { %4619 = vmatprep.subr.bf16.mxu1 %v5113_v1 }
 0x79a   :  { %4610 = vmatmul.mubr.msk.bf16.vlgmr.msra.gmra.mrb[24].mxu1 %vm337_vm2, %v1211_v47 }
 0x79b   :  { %4621 = vmatprep.mubr.msk.bf16.mxu1 %vm5114_vm0, %v5113_v1 }
 0x7e1   :  { %v5565_v63 = vpop.f32.mrb[20].mxu0 }
 0x7e2   :  { %v4593_v0 = vpop.f32.mrb[21].mxu0 }
 0x7e3   :  { %v1030_v2 = vpop.f32.mrb[22].mxu0 }
 0x7e4   :  { %v4594_v3 = vpop.f32.mrb[23].mxu0 }
 0x7e9   :  { %v1125_v52 = vpop.f32.mrb[24].mxu0 }
 0x7ea   :  { %1134 = vrot.lane.b32.xlu0 %v1125_v52, %s5120_s24  ;;  %v4605_v4 = vpop.f32.mrb[25].mxu0  ;;  %1146 = vrot.lane.b32.xlu1 %v1125_v52, %s5121_s25 }
 0x7eb   :  { %v1128_v5 = vpop.f32.mrb[26].mxu0 }
 0x7ec   :  { %v4606_v6 = vpop.f32.mrb[27].mxu0 }
 0x7ee   :  { %1140 = vrot.lane.b32.xlu0 %v1125_v52, %s5119_s23  ;;  %1158 = vrot.lane.b32.xlu1 %v1125_v52, %s5123_s27 }
 0x7f1   :  { %v5571_v10 = vpop.f32.mrb[28].mxu0 }
 0x7f2   :  { %1152 = vrot.lane.b32.xlu0 %v1125_v52, %s5118_s22  ;;  %1170 = vrot.lane.b32.xlu1 %v1125_v52, %s5124_s28  ;;  %v4617_v45 = vpop.f32.mrb[29].mxu0 }
 0x7f3   :  { %v1315_v11 = vpop.f32.mrb[30].mxu0 }
 0x7f4   :  { %v4618_v36 = vpop.f32.mrb[31].mxu0 }
 0x7f6   :  { %1164 = vrot.lane.b32.xlu0 %v1125_v52, %s5122_s26  ;;  %1201 = vperm.xlu1 %4911, %v5315_v40  }
 0x7fa   :  { %1191 = vperm.xlu0 %4910, %v5345_v49  }
 0x7fe   :  { %1136 = vrot.lane.b32.xlu0 %v1128_v5, %s5120_s24 }
 0x802   :  { %1148 = vrot.lane.b32.xlu0 %v1128_v5, %s5121_s25 }
 0x806   :  { %1160 = vrot.lane.b32.xlu0 %v1128_v5, %s5123_s27 }
 0x80a   :  { %1172 = vrot.lane.b32.xlu0 %v1128_v5, %s5124_s28 }
 0x80e   :  { %1195 = vperm.xlu0 %4910, %v5382_v18  }
 0x812   :  { %4912 = vset.pattern.permute.xlu0 %v5134_v54 }
 0x813   :  { %1205 = vperm.xlu0 %4912, %v5351_v51  }
 0x85c   :  { %v1135_v16 = vpop.permute.xlu0 %1134  ;;  %v1147_v17 = vpop.permute.xlu1 %1146 }
 0x85d   :  { %v1176_v19 = vsel %vm429_vm3, %v1125_v52, %v1135_v16 }
 0x860   :  { %v1141_v20 = vpop.permute.xlu0 %1140  ;;  %v1159_v23 = vpop.permute.xlu1 %1158 }
 0x861   :  { %v1178_v22 = vsel %vm432_vm4, %v1176_v19, %v1141_v20 }
 0x862   :  { %v1180_v33 = vsel %vm435_vm5, %v1178_v22, %v1147_v17 }
 0x864   :  { %v1153_v34 = vpop.permute.xlu0 %1152  ;;  %v1171_v53 = vpop.permute.xlu1 %1170 }
 0x865   :  { %v1182_v35 = vsel %vm438_vm6, %v1180_v33, %v1153_v34  ;;  %v5589_v37 = vpop.f32.mrb[20].mxu1 }
 0x866   :  { %v4916_v28 = vpack.i.bf16 %v5589_v37, %v5565_v63  ;;  %v4599_v44 = vpop.f32.mrb[21].mxu1  ;;  %v1184_v48 = vsel %vm441_vm7, %v1182_v35, %v1159_v23 }
 0x867   :  { %v1078_v24 = vpop.f32.mrb[22].mxu1 }
 0x868   :  { %v4600_v47 = vpop.f32.mrb[23].mxu1  ;;  %v1165_v50 = vpop.permute.xlu0 %1164 }
 0x869   :  { %v1186_v46 = vsel %vm444_vm8, %v1184_v48, %v1165_v50 }
 0x86a   :  { %v1188_v55 = vsel %vm447_vm9, %v1186_v46, %v1171_v53 }
 0x86b   :  { %1215 = vrot.lane.b32.xlu1 %v1188_v55, %s5125_s3 }
 0x86d   :  { %v1258_v38 = vpop.f32.mrb[24].mxu1 }
 0x86e   :  { %v4611_v7 = vpop.f32.mrb[25].mxu1 }
 0x86f   :  { %v1261_v59 = vpop.f32.mrb[26].mxu1  ;;  %1142 = vrot.lane.b32.xlu1 %v1128_v5, %s5119_s23 }
 0x870   :  { %v4612_v60 = vpop.f32.mrb[27].mxu1 }
 0x873   :  { %1154 = vrot.lane.b32.xlu1 %v1128_v5, %s5118_s22 }
 0x875   :  { %v1202_v0 = vpop.permute.xlu1 %1201 }
 0x877   :  { %1166 = vrot.lane.b32.xlu1 %v1128_v5, %s5122_s26 }
 0x879   :  { %v1192_v61 = vpop.permute.xlu0 %1191 }
 0x87a   :  { %v1198_v2 = vmul.f32 %v5397_v43, %v1192_v61 }
 0x87c   :  { %v1208_v52 = vadd.f32 %v1202_v0, %v1198_v2 }
 0x87d   :  { %v1137_v62 = vpop.permute.xlu0 %1136 }
 0x87e   :  { %v1177_v11 = vsel %vm429_vm3, %v1128_v5, %v1137_v62 }
 0x881   :  { %v1149_v4 = vpop.permute.xlu0 %1148 }
 0x885   :  { %v1161_v19 = vpop.permute.xlu0 %1160 }
 0x889   :  { %v1173_v24 = vpop.permute.xlu0 %1172 }
 0x88d   :  { %v1196_v48 = vpop.permute.xlu0 %1195 }
 0x88e   :  { %v1199_v53 = vmul.f32 %v5420_v26, %v1196_v48 }
 0x892   :  { %v1206_v50 = vpop.permute.xlu0 %1205 }
 0x893   :  { %v1209_v55 = vadd.f32 %v1206_v50, %v1199_v53 }
 0x8dd   :  { %v1216_v3 = vpop.permute.xlu1 %1215 }
 0x8de   :  { %v1259_v6 = vadd.f32 %v1258_v38, %v1216_v3 }
 0x8e0   :  { %v1318_v45 = vadd.f32 %v1259_v6, %v1208_v52 }
 0x8e1   :  { %v1143_v36 = vpop.permute.xlu1 %1142 }
 0x8e2   :  { %v1320_v16 = vmul.f32 0.35355338, %v1318_v45  ;;  %v1179_v17 = vsel %vm432_vm4, %v1177_v11, %v1143_v36 }
 0x8e3   :  { %v1181_v23 = vsel %vm435_vm5, %v1179_v17, %v1149_v4 }
 0x8e4   :  { %v1322_v20 = vadd.f32 %v1320_v16, %v5403_v57 }
 0x8e5   :  { %v1155_v22 = vpop.permute.xlu1 %1154 }
 0x8e6   :  { %v1183_v33 = vsel %vm438_vm6, %v1181_v23, %v1155_v22  ;;  %v1324_v34 = vsel %vm337_vm2, %v1322_v20, -inf }
 0x8e7   :  { %1325 = vmax.xlane.f32.xlu1 %v1324_v34  ;;  %v1185_v44 = vsel %vm441_vm7, %v1183_v33, %v1161_v19 }
 0x8e9   :  { %v1167_v35 = vpop.permute.xlu1 %1166 }
 0x8ea   :  { %v1187_v5 = vsel %vm444_vm8, %v1185_v44, %v1167_v35  ;;  %v5139_v44 = vmov 103  }
 0x8eb   :  { %v1189_v47 = vsel %vm447_vm9, %v1187_v5, %v1173_v24  ;;  %4914 = vset.pattern.permute.xlu0 %v5139_v44  ;;  %4913 = vset.pattern.permute.xlu1 %v5139_v44 }
 0x8ec   :  { %1269 = vrot.lane.b32.xlu0 %v1189_v47, %s5125_s3 }
 0x8f8   :  { %1348 = vrot.lane.b32.xlu1 %v5278_v15, %s6402_s17 }
 0x95e   :  { %v1270_v46 = vpop.permute.xlu0 %1269 }
 0x95f   :  { %v1313_v38 = vadd.f32 %v5571_v10, %v1270_v46 }
 0x961   :  { %v1319_v7 = vadd.f32 %v1313_v38, %v1209_v55 }
 0x963   :  { %v1321_v59 = vmul.f32 0.35355338, %v1319_v7 }
 0x965   :  { %v1323_v60 = vadd.f32 %v1321_v59, %v5425_v39 }
 0x967   :  { %v1327_v61 = vsel %vm337_vm2, %v1323_v60, -inf }
 0x968   :  { %1328 = vmax.xlane.f32.xlu1 %v1327_v61 }
 0x974   :  { %v1326_v62 = vpop.xlane.xlu1 %1325 }
 0x975   :  { %v1330_v0 = vsub.f32 %v1322_v20, %v1326_v62 }
 0x977   :  { %v1332_v2 = vmul.f32 1.442695, %v1330_v0 }
 0x978   :  { %v1349_v3 = vpop.permute.xlu1 %1348 }
 0x979   :  { %5007 = vpow2.f32 %v1332_v2  ;;  %v1354_v52 = vsel %vm438_vm6, %v1349_v3, 0  ;;  %1396 = vrot.lane.b32.xlu1 %v5285_v21, %s6402_s17  ;;  %v5140_v2 = vmov 99   ;;  %s6404_s17 = smov 16  }
 0x97a   :  { %4620 = vmatpush3.bf16.msra.mxu1 %v1354_v52 }
 0x97b   :  { %4631 = vmatprep.subr.bf16.mxu1 %v5113_v1 }
 0x97d   :  { %1575 = vrot.lane.b32.xlu1 %v5278_v15, %s6400_s18 }
 0x981   :  { %1573 = vrot.lane.b32.xlu1 %v5318_v41, %s6398_s29 }
 0x983   :  { %v5008_v10 = vpop.eup %5007 }
 0x984   :  { %v1336_v4 = vsel %vm337_vm2, %v5008_v10, 0.0 }
 0x985   :  { %1337 = vadd.xlane.f32.xlu0 %v1336_v4  ;;  %1627 = vrot.lane.b32.xlu1 %v5322_v42, %s6398_s29 }
 0x99b   :  { %1446 = vrot.lane.b32.xlu0 %v5291_v25, %s6398_s29 }
 0x99f   :  { %1444 = vrot.lane.b32.xlu0 %v5293_v27, %s6398_s29  ;;  %s6406_s29 = smov 40  }
 0x9f5   :  { %v1329_v6 = vpop.xlane.xlu1 %1328 }
 0x9f6   :  { %v1331_v45 = vsub.f32 %v1323_v60, %v1329_v6 }
 0x9f8   :  { %v1334_v11 = vmul.f32 1.442695, %v1331_v45 }
 0x9f9   :  { %v1397_v36 = vpop.permute.xlu1 %1396 }
 0x9fa   :  { %5009 = vpow2.f32 %v1334_v11  ;;  %v1402_v41 = vsel %vm438_vm6, %v1397_v36, 0 }
 0x9fb   :  { %4626 = vmatpush3.bf16.msra.mxu0 %v1402_v41 }
 0x9fc   :  { %4637 = vmatprep.subr.bf16.mxu0 %v5113_v1 }
 0x9fd   :  { %v1576_v33 = vpop.permute.xlu1 %1575 }
 0x9fe   :  { %v1585_v46 = vsel %vm337_vm2, %v1576_v33, 0 }
 0xa01   :  { %v1574_v5 = vpop.permute.xlu1 %1573 }
 0xa04   :  { %v5010_v16 = vpop.eup %5009 }
 0xa05   :  { %v1339_v17 = vsel %vm337_vm2, %v5010_v16, 0.0  ;;  %v1628_v48 = vpop.permute.xlu1 %1627 }
 0xa06   :  { %1340 = vadd.xlane.f32.xlu0 %v1339_v17 }
 0xa12   :  { %v1338_v42 = vpop.xlane.xlu0 %1337 }
 0xa13   :  { %5011 = vrcp.f32 %v1338_v42 }
 0xa16   :  { %v1447_v19 = vpop.permute.xlu0 %1446 }
 0xa17   :  { %v1452_v22 = vsel %vm337_vm2, %v1447_v19, 0 }
 0xa1a   :  { %v1445_v23 = vpop.permute.xlu0 %1444 }
 0xa1c   :  { %1629 = vrot.lane.b32.xlu0 %v5285_v21, %s6400_s18  ;;  %s6405_s18 = smov 8  }
 0xa1d   :  { %v5012_v25 = vpop.eup %5011 }
 0xa1e   :  { %v1344_v27 = vmul.f32 %v5012_v25, %v5008_v10 }
 0xa20   :  { %v1346_v20 = vpack.c.bf16 %v1344_v27, %v1344_v27 }
 0xa22   :  { %4622 = vmatmul.mubr.msk.bf16.vlgmr.msra.gmra.mrb[28].mxu1 %vm337_vm2, %v1346_v20 }
 0xa23   :  { %4632 = vmatpush3.bf16.xpose.msra.mxu1 %v1452_v22  ;;  %4633 = vmatprep.mubr.msk.bf16.mxu1 %vm5114_vm0, %v5113_v1 }
 0xa24   :  { %4643 = vmatprep.subr.bf16.mxu1 %v5113_v1 }
 0xa2a   :  { %4634 = vmatmul.mubr.msk.bf16.vlgmr.msra.gmra.mrb[32].mxu1 %vm337_vm2, %v1445_v23 }
 0xa2b   :  { %4645 = vmatprep.mubr.msk.bf16.mxu1 %vm5114_vm0, %v5113_v1 }
 0xa93   :  { %v1341_v34 = vpop.xlane.xlu0 %1340 }
 0xa94   :  { %5013 = vrcp.f32 %v1341_v34 }
 0xa97   :  { %v1630_v35 = vpop.permute.xlu0 %1629 }
 0xa98   :  { %v1639_v24 = vsel %vm337_vm2, %v1630_v35, 0 }
 0xa99   :  { %4644 = vmatpush3.bf16.xpose.msra.mxu1 %v1639_v24 }
 0xa9a   :  { %4655 = vmatprep.subr.bf16.mxu1 %v5113_v1 }
 0xa9e   :  { %v5014_v47 = vpop.eup %5013 }
 0xa9f   :  { %v1345_v50 = vmul.f32 %v5014_v47, %v5010_v16 }
 0xaa0   :  { %4646 = vmatmul.mubr.msk.bf16.vlgmr.msra.gmra.mrb[36].mxu1 %vm337_vm2, %v1628_v48 }
 0xaa1   :  { %v1347_v53 = vpack.c.bf16 %v1345_v50, %v1345_v50  ;;  %4657 = vmatprep.mubr.msk.bf16.mxu1 %vm5114_vm0, %v5113_v1 }
 0xaa3   :  { %4628 = vmatmul.mubr.msk.bf16.vlgmr.msra.gmra.mrb[32].mxu0 %vm337_vm2, %v1347_v53 }
 0xaa4   :  { %4638 = vmatpush3.bf16.xpose.msra.mxu0 %v1585_v46  ;;  %4639 = vmatprep.mubr.msk.bf16.mxu0 %vm5114_vm0, %v5113_v1 }
 0xaa5   :  { %4649 = vmatprep.subr.bf16.mxu0 %v5113_v1 }
 0xaab   :  { %4640 = vmatmul.mubr.msk.bf16.vlgmr.msra.gmra.mrb[36].mxu0 %vm337_vm2, %v1574_v5 }
 0xaac   :  { %4651 = vmatprep.mubr.msk.bf16.mxu0 %vm5114_vm0, %v5113_v1 }
 0xaf5   :  { %v5660_v55 = vpop.f32.mrb[28].mxu1 }
 0xaf6   :  { %v4623_v38 = vpop.f32.mrb[29].mxu1 }
 0xaf7   :  { %v1393_v7 = vpop.f32.mrb[30].mxu1 }
 0xaf8   :  { %v4624_v59 = vpop.f32.mrb[31].mxu1 }
 0xafd   :  { %v1488_v60 = vpop.f32.mrb[32].mxu1 }
 0xafe   :  { %1497 = vrot.lane.b32.xlu1 %v1488_v60, %s5120_s24  ;;  %v4635_v61 = vpop.f32.mrb[33].mxu1 }
 0xaff   :  { %v1491_v62 = vpop.f32.mrb[34].mxu1 }
 0xb00   :  { %1505 = vrot.lane.b32.xlu0 %v1491_v62, %s5119_s23  ;;  %v4636_v0 = vpop.f32.mrb[35].mxu1 }
 0xb02   :  { %1503 = vrot.lane.b32.xlu1 %v1488_v60, %s5119_s23 }
 0xb04   :  { %1511 = vrot.lane.b32.xlu0 %v1491_v62, %s5121_s25 }
 0xb06   :  { %1509 = vrot.lane.b32.xlu1 %v1488_v60, %s5121_s25 }
 0xb08   :  { %1517 = vrot.lane.b32.xlu0 %v1491_v62, %s5118_s22 }
 0xb0a   :  { %1515 = vrot.lane.b32.xlu1 %v1488_v60, %s5118_s22 }
 0xb0c   :  { %1523 = vrot.lane.b32.xlu0 %v1491_v62, %s5123_s27 }
 0xb0e   :  { %1521 = vrot.lane.b32.xlu1 %v1488_v60, %s5123_s27 }
 0xb10   :  { %1529 = vrot.lane.b32.xlu0 %v1491_v62, %s5122_s26 }
 0xb12   :  { %1499 = vrot.lane.b32.xlu1 %v1491_v62, %s5120_s24 }
 0xb14   :  { %1535 = vrot.lane.b32.xlu0 %v1491_v62, %s5124_s28 }
 0xb16   :  { %1527 = vrot.lane.b32.xlu1 %v1488_v60, %s5122_s26 }
 0xb18   :  { %1558 = vperm.xlu0 %4914, %v5382_v18  }
 0xb1a   :  { %1533 = vrot.lane.b32.xlu1 %v1488_v60, %s5124_s28 }
 0xb1c   :  { %4931 = vset.pattern.permute.xlu0 %v5117_v31 }
 0xb1e   :  { %1554 = vperm.xlu1 %4913, %v5345_v49  }
 0xb22   :  { %4915 = vset.pattern.permute.xlu1 %v5140_v2 }
 0xb23   :  { %1564 = vperm.xlu1 %4915, %v5315_v40  }
 0xb27   :  { %1568 = vperm.xlu1 %4915, %v5351_v51  }
 0xb2b   :  { %4932 = vset.pattern.permute.xlu1 %v5116_v30 }
 0xb70   :  { %v1498_v3 = vpop.permute.xlu1 %1497 }
 0xb71   :  { %v1539_v5 = vsel %vm429_vm3, %v1488_v60, %v1498_v3 }
 0xb72   :  { %v1506_v52 = vpop.permute.xlu0 %1505 }
 0xb73   :  { %v1675_v10 = vpop.f32.mrb[36].mxu1 }
 0xb74   :  { %v1504_v4 = vpop.permute.xlu1 %1503  ;;  %v4647_v18 = vpop.f32.mrb[37].mxu1 }
 0xb75   :  { %v1678_v6 = vpop.f32.mrb[38].mxu1  ;;  %v1541_v48 = vsel %vm432_vm4, %v1539_v5, %v1504_v4 }
 0xb76   :  { %v5683_v45 = vpop.f32.mrb[32].mxu0  ;;  %v4648_v11 = vpop.f32.mrb[39].mxu1 }
 0xb77   :  { %v4921_v49 = vpack.i.bf16 %v5683_v45, %v5660_v55  ;;  %v1512_v36 = vpop.permute.xlu0 %1511  ;;  %v4629_v41 = vpop.f32.mrb[33].mxu0 }
 0xb78   :  { %v1510_v16 = vpop.permute.xlu1 %1509  ;;  %v1441_v40 = vpop.f32.mrb[34].mxu0 }
 0xb79   :  { %v4630_v17 = vpop.f32.mrb[35].mxu0  ;;  %v1543_v46 = vsel %vm435_vm5, %v1541_v48, %v1510_v16 }
 0xb7b   :  { %v1518_v51 = vpop.permute.xlu0 %1517 }
 0xb7c   :  { %v1516_v42 = vpop.permute.xlu1 %1515 }
 0xb7d   :  { %v1545_v38 = vsel %vm438_vm6, %v1543_v46, %v1516_v42 }
 0xb7e   :  { %v1621_v25 = vpop.f32.mrb[36].mxu0 }
 0xb7f   :  { %v1524_v27 = vpop.permute.xlu0 %1523  ;;  %v4641_v19 = vpop.f32.mrb[37].mxu0 }
 0xb80   :  { %v1522_v20 = vpop.permute.xlu1 %1521  ;;  %v1624_v22 = vpop.f32.mrb[38].mxu0 }
 0xb81   :  { %v4642_v23 = vpop.f32.mrb[39].mxu0  ;;  %v1547_v61 = vsel %vm441_vm7, %v1545_v38, %v1522_v20 }
 0xb83   :  { %v1530_v33 = vpop.permute.xlu0 %1529 }
 0xb84   :  { %v1500_v34 = vpop.permute.xlu1 %1499 }
 0xb85   :  { %v1540_v35 = vsel %vm429_vm3, %v1491_v62, %v1500_v34 }
 0xb86   :  { %v1542_v24 = vsel %vm432_vm4, %v1540_v35, %v1506_v52 }
 0xb87   :  { %v1544_v47 = vsel %vm435_vm5, %v1542_v24, %v1512_v36  ;;  %v1536_v59 = vpop.permute.xlu0 %1535 }
 0xb88   :  { %v1546_v50 = vsel %vm438_vm6, %v1544_v47, %v1518_v51  ;;  %v1528_v53 = vpop.permute.xlu1 %1527 }
 0xb89   :  { %v1548_v55 = vsel %vm441_vm7, %v1546_v50, %v1524_v27  ;;  %v1549_v62 = vsel %vm444_vm8, %v1547_v61, %v1528_v53 }
 0xb8a   :  { %v1550_v7 = vsel %vm444_vm8, %v1548_v55, %v1530_v33 }
 0xb8b   :  { %v1552_v60 = vsel %vm447_vm9, %v1550_v7, %v1536_v59 }
 0xb8c   :  { %v1534_v0 = vpop.permute.xlu1 %1533  ;;  %1632 = vrot.lane.b32.xlu1 %v1552_v60, %s5125_s3 }
 0xb8d   :  { %v1551_v3 = vsel %vm447_vm9, %v1549_v62, %v1534_v0  ;;  %v4966_v62 = vld [vmem:[%s6385_s7] sm:$0xff]   ;;  %v4967_v0 = vld [vmem:[%s6385_s7 + $0x8] sm:$0xff]  }
 0xb8e   :  { %1578 = vrot.lane.b32.xlu0 %v1551_v3, %s5125_s3 }
 0xb97   :  { %v1559_v18 = vpop.permute.xlu0 %1558 }
 0xb98   :  { %v1562_v45 = vmul.f32 %v5420_v26, %v1559_v18 }
 0xb9d   :  { %v1555_v52 = vpop.permute.xlu1 %1554 }
 0xb9e   :  { %v1561_v36 = vmul.f32 %v5397_v43, %v1555_v52 }
 0xba2   :  { %v1565_v4 = vpop.permute.xlu1 %1564 }
 0xba3   :  { %v1571_v17 = vadd.f32 %v1565_v4, %v1561_v36 }
 0xba6   :  { %v1569_v6 = vpop.permute.xlu1 %1568 }
 0xba7   :  { %v1572_v41 = vadd.f32 %v1569_v6, %v1562_v45 }
 0xbfe   :  { %v1633_v11 = vpop.permute.xlu1 %1632 }
 0xbff   :  { %v1676_v16 = vadd.f32 %v1675_v10, %v1633_v11 }
 0xc00   :  { %v1579_v40 = vpop.permute.xlu0 %1578 }
 0xc01   :  { %v1682_v51 = vadd.f32 %v1676_v16, %v1572_v41  ;;  %v1622_v42 = vadd.f32 %v1621_v25, %v1579_v40 }
 0xc03   :  { %v1684_v27 = vmul.f32 0.35355338, %v1682_v51  ;;  %v1681_v19 = vadd.f32 %v1622_v42, %v1571_v17 }
 0xc05   :  { %v1683_v20 = vmul.f32 0.35355338, %v1681_v19  ;;  %v1686_v22 = vadd.f32 %v1684_v27, %v5425_v39 }
 0xc07   :  { %v1690_v23 = vsel %vm337_vm2, %v1686_v22, -inf  ;;  %v1685_v33 = vadd.f32 %v1683_v20, %v5403_v57 }
 0xc08   :  { %1691 = vmax.xlane.f32.xlu1 %v1690_v23 }
 0xc09   :  { %v1687_v34 = vsel %vm337_vm2, %v1685_v33, -inf }
 0xc0a   :  { %1688 = vmax.xlane.f32.xlu0 %v1687_v34 }
 0xc19   :  { %1711 = vrot.lane.b32.xlu1 %v5278_v15, %s6406_s29 }
 0xc1d   :  { %4917 = vrot.lane.b32.xlu1 %v4916_v28, %s6405_s18 }
 0xc21   :  { %4922 = vrot.lane.b32.xlu1 %v4921_v49, %s6404_s17  ;;  %s6410_s17 = smov 24  }
 0xc95   :  { %v1692_v10 = vpop.xlane.xlu1 %1691 }
 0xc96   :  { %v1694_v25 = vsub.f32 %v1686_v22, %v1692_v10 }
 0xc97   :  { %v1689_v35 = vpop.xlane.xlu0 %1688 }
 0xc98   :  { %v1693_v24 = vsub.f32 %v1685_v33, %v1689_v35  ;;  %v1697_v47 = vmul.f32 1.442695, %v1694_v25 }
 0xc99   :  { %v1712_v5 = vpop.permute.xlu1 %1711 }
 0xc9a   :  { %v1695_v48 = vmul.f32 1.442695, %v1693_v24  ;;  %v1717_v50 = vsel %vm438_vm6, %v1712_v5, 0 }
 0xc9b   :  { %4650 = vmatpush3.bf16.msra.mxu0 %v1717_v50 }
 0xc9c   :  { %5015 = vpow2.f32 %v1695_v48  ;;  %4661 = vmatprep.subr.bf16.mxu0 %v5113_v1 }
 0xc9d   :  { %5017 = vpow2.f32 %v1697_v47  ;;  %v4918_v16 = vpop.permute.xlu1 %4917 }
 0xc9e   :  { %v4920_v17 = vunpack.i.h.bf16 %v4918_v16  ;;  %v4919_v51 = vunpack.i.l.bf16 %v4918_v16 }
 0xca0   :  { %v1832_v20 = vsel %vm337_vm2, %v5491_v58, %v4920_v17  ;;  %v1831_v22 = vsel %vm337_vm2, %v5472_v32, %v4919_v51  ;;  %v5085_v32 = vld [vmem:[%s6416_s0] sm:$0xff]  }
 0xca1   :  { %v4923_v40 = vpop.permute.xlu1 %4922  ;;  %v158_v58 = vunpack.c.l.bf16 %v5085_v32  ;;  %v159_v5 = vunpack.c.h.bf16 %v5085_v32  ;;  %v1938_v32 = vsub.s32 5, %v5268_v8 }
 0xca2   :  { %v4925_v42 = vunpack.i.h.bf16 %v4923_v40  ;;  %v4924_v27 = vunpack.i.l.bf16 %v4923_v40  ;;  %v1931_v40 = vsub.s32 4, %v5268_v8 }
 0xca4   :  { %v1834_v34 = vsel %vm1833_vm14, %v1831_v22, %v4924_v27  ;;  %v1835_v10 = vsel %vm1833_vm14, %v1832_v20, %v4925_v42 }
 0xca6   :  { %v5016_v15 = vpop.eup %5015 }
 0xca7   :  { %v1699_v63 = vsel %vm337_vm2, %v5016_v15, 0.0  ;;  %v5018_v37 = vpop.eup %5017 }
 0xca8   :  { %1700 = vadd.xlane.f32.xlu0 %v1699_v63  ;;  %v1702_v28 = vsel %vm337_vm2, %v5018_v37, 0.0 }
 0xcac   :  { %1703 = vadd.xlane.f32.xlu0 %v1702_v28 }
 0xcc2   :  { %1759 = vrot.lane.b32.xlu0 %v5285_v21, %s6406_s29  ;;  %s6422_s29 = smov 72  }
 0xd35   :  { %v1701_v49 = vpop.xlane.xlu0 %1700 }
 0xd36   :  { %5019 = vrcp.f32 %v1701_v49 }
 0xd39   :  { %v1704_v53 = vpop.xlane.xlu0 %1703 }
 0xd3a   :  { %5021 = vrcp.f32 %v1704_v53 }
 0xd3d   :  { %v1760_v46 = vpop.permute.xlu0 %1759 }
 0xd3e   :  { %v1765_v55 = vsel %vm438_vm6, %v1760_v46, 0 }
 0xd3f   :  { %4656 = vmatpush3.bf16.msra.mxu1 %v1765_v55 }
 0xd40   :  { %v5020_v38 = vpop.eup %5019  ;;  %4669 = vmatprep.subr.bf16.mxu1 %v5113_v1 }
 0xd41   :  { %v1707_v7 = vmul.f32 %v5020_v38, %v5016_v15 }
 0xd43   :  { %v1709_v59 = vpack.c.bf16 %v1707_v7, %v1707_v7 }
 0xd44   :  { %v5022_v61 = vpop.eup %5021 }
 0xd45   :  { %4652 = vmatmul.mubr.msk.bf16.vlgmr.msra.gmra.mrb[40].mxu0 %vm337_vm2, %v1709_v59  ;;  %v1708_v60 = vmul.f32 %v5022_v61, %v5018_v37 }
 0xd46   :  { %4665 = vmatprep.mubr.msk.bf16.mxu0 %vm5114_vm0, %v5113_v1  ;;  %4662 = vmatpush3.bf16.msra.mxu0 %v4966_v62 }
 0xd47   :  { %v1710_v21 = vpack.c.bf16 %v1708_v60, %v1708_v60  ;;  %4663 = vmatprep.subr.bf16.mxu0 %v5113_v1 }
 0xd49   :  { %4658 = vmatmul.mubr.msk.bf16.vlgmr.msra.gmra.mrb[40].mxu1 %vm337_vm2, %v1710_v21 }
 0xd4a   :  { %4673 = vmatprep.mubr.msk.bf16.mxu1 %vm5114_vm0, %v5113_v1  ;;  %4664 = vmatpush3.bf16.msra.mxu0 %v4967_v0  ;;  %v4968_v0 = vld [vmem:[%s6386_s8] sm:$0xff]  }
 0xd4b   :  { %4677 = vmatprep.subr.bf16.mxu0 %v5113_v1  ;;  %4670 = vmatpush3.bf16.msra.mxu1 %v4968_v0 }
 0xd4c   :  { %4671 = vmatprep.subr.bf16.mxu1 %v5113_v1 }
 0xe18   :  { %v1753_v3 = vpop.f32.mrb[40].mxu0 }
 0xe19   :  { %v4653_v52 = vpop.f32.mrb[41].mxu0 }
 0xe1a   :  { %v1756_v4 = vpop.f32.mrb[42].mxu0 }
 0xe1b   :  { %v4654_v18 = vpop.f32.mrb[43].mxu0 }
 0xe1c   :  { %v1801_v6 = vpop.f32.mrb[40].mxu1 }
 0xe1d   :  { %v4926_v45 = vpack.i.bf16 %v1801_v6, %v1753_v3  ;;  %v4659_v11 = vpop.f32.mrb[41].mxu1  ;;  %v4969_v3 = vld [vmem:[%s6386_s8 + $0x8] sm:$0xff]  }
 0xe1e   :  { %v1804_v36 = vpop.f32.mrb[42].mxu1  ;;  %4672 = vmatpush3.bf16.msra.mxu1 %v4969_v3 }
 0xe1f   :  { %4927 = vrot.lane.b32.xlu0 %v4926_v45, %s6410_s17  ;;  %v4660_v41 = vpop.f32.mrb[43].mxu1  ;;  %4689 = vmatprep.subr.bf16.mxu1 %v5113_v1  ;;  %v1925_v36 = vsub.s32 3, %v5268_v8 }
 0xe20   :  { %v5769_v41 = vld [vmem:[%s6388_s10] sm:$0xff] }
 0xe21   :  { %v1926_v16 = vrot.slane %v5769_v41, %v1925_v36  ;;  %v1932_v20 = vrot.slane %v5769_v41, %v1931_v40 }
 0xe91   :  { %v4928_v19 = vpop.permute.xlu0 %4927 }
 0xe92   :  { %v4930_v23 = vunpack.i.h.bf16 %v4928_v19  ;;  %v4929_v33 = vunpack.i.l.bf16 %v4928_v19 }
 0xe94   :  { %v1838_v25 = vsel %vm1836_vm15, %v1835_v10, %v4930_v23  ;;  %v1837_v35 = vsel %vm1836_vm15, %v1834_v34, %v4929_v33  ;;  %v4970_v10 = vld [vmem:[%s6387_s9] sm:$0xff]  }
 0xe95   :  { %v1839_v24 = vpack.c.bf16 %v1838_v25, %v1837_v35  ;;  %v4971_v25 = vld [vmem:[%s6387_s9 + $0x8] sm:$0xff]   ;;  %v4972_v35 = vld [vmem:[%s6387_s9 + $0x10] sm:$0xff]  }
 0xe97   :  { %4666 = vmatmul.mubr.msk.bf16.vlgmr.msra.gmra.mrb[44].mxu0 %vm203_vm1, %v1839_v24  ;;  %v4973_v24 = vld [vmem:[%s6387_s9 + $0x18] sm:$0xff]  }
 0xe98   :  { %4685 = vmatprep.mubr.msk.bf16.mxu0 %vm5114_vm0, %v5113_v1  ;;  %4678 = vmatpush3.bf16.msra.mxu0 %v4970_v10 }
 0xe99   :  { %4679 = vmatprep.subr.bf16.mxu0 %v5113_v1 }
 0xe9c   :  { %4680 = vmatpush3.bf16.msra.mxu0 %v4971_v25 }
 0xe9d   :  { %4681 = vmatprep.subr.bf16.mxu0 %v5113_v1 }
 0xea0   :  { %4682 = vmatpush3.bf16.msra.mxu0 %v4972_v35 }
 0xea1   :  { %4683 = vmatprep.subr.bf16.mxu0 %v5113_v1 }
 0xea4   :  { %4684 = vmatpush3.bf16.msra.mxu0 %v4973_v24 }
 0xea5   :  { %4705 = vmatprep.subr.bf16.mxu0 %v5113_v1 }
 0xf6a   :  { %v1889_v47 = vpop.f32.mrb[44].mxu0 }
 0xf6b   :  { %v1890_v48 = vadd.f32 %v1889_v47, %v158_v58  ;;  %v4667_v50 = vpop.f32.mrb[45].mxu0  ;;  %v1939_v58 = vrot.slane %v5769_v41, %v1938_v32 }
 0xf6c   :  { %v1892_v15 = vpop.f32.mrb[46].mxu0 }
 0xf6d   :  { %v1893_v63 = vadd.f32 %v1892_v15, %v159_v5  ;;  %v4668_v37 = vpop.f32.mrb[47].mxu0  ;;  %v1896_v28 = vsel %vm203_vm1, %v1890_v48, 0.0 }
 0xf6e   :  { %1897 = vadd.xlane.f32.xlu1 %v1896_v28 }
 0xf6f   :  { %v1899_v49 = vsel %vm203_vm1, %v1893_v63, 0.0 }
 0xf70   :  { %1900 = vadd.xlane.f32.xlu0 %v1899_v49 }
 0xffb   :  { %v1898_v53 = vpop.xlane.xlu1 %1897 }
 0xffc   :  { %v1903_v46 = vmul.f32 0.03125, %v1898_v53 }
 0xffd   :  { %v1901_v55 = vpop.xlane.xlu0 %1900 }
 0xffe   :  { %v1905_v38 = vsub.f32 %v1890_v48, %v1903_v46  ;;  %v1904_v7 = vmul.f32 0.03125, %v1901_v55 }
0x1000   :  { %v1906_v59 = vsub.f32 %v1893_v63, %v1904_v7  ;;  %v1907_v61 = vmul.f32 %v1905_v38, %v1905_v38 }
0x1002   :  { %v1909_v60 = vsel %vm203_vm1, %v1907_v61, 0.0  ;;  %v1908_v21 = vmul.f32 %v1906_v59, %v1906_v59 }
0x1003   :  { %1910 = vadd.xlane.f32.xlu0 %v1909_v60 }
0x1004   :  { %v1912_v62 = vsel %vm203_vm1, %v1908_v21, 0.0 }
0x1005   :  { %1913 = vadd.xlane.f32.xlu1 %v1912_v62 }
0x1090   :  { %v1911_v52 = vpop.xlane.xlu0 %1910 }
0x1091   :  { %v1915_v4 = vmul.f32 0.03125, %v1911_v52 }
0x1092   :  { %v1914_v18 = vpop.xlane.xlu1 %1913 }
0x1093   :  { %v1917_v6 = vadd.f32 1e-12, %v1915_v4  ;;  %v1916_v45 = vmul.f32 0.03125, %v1914_v18 }
0x1095   :  { %5023 = vrsqrt.f32 %v1917_v6  ;;  %v1918_v11 = vadd.f32 1e-12, %v1916_v45  ;;  %v2017_v45 = vsub.s32 6, %v5268_v8 }
0x1097   :  { %5025 = vrsqrt.f32 %v1918_v11  ;;  %v2018_v11 = vrot.slane %v5769_v41, %v2017_v45 }
0x109f   :  { %v5024_v17 = vpop.eup %5023 }
0x10a0   :  { %v1921_v51 = vmul.f32 %v5024_v17, %v1905_v38 }
0x10a1   :  { %v5026_v42 = vpop.eup %5025 }
0x10a2   :  { %v1927_v27 = vmul.f32 %v1926_v16, %v1921_v51  ;;  %v1922_v19 = vmul.f32 %v5026_v42, %v1906_v59 }
0x10a4   :  { %v1928_v22 = vmul.f32 %v1926_v16, %v1922_v19  ;;  %v1933_v23 = vadd.f32 %v1932_v20, %v1927_v27 }
0x10a6   :  { %v1934_v33 = vadd.f32 %v1932_v20, %v1928_v22 }
0x10a8   :  { %v1935_v34 = vpack.c.bf16 %v1934_v33, %v1933_v23 }
0x10aa   :  { %4674 = vmatmul.mubr.msk.bf16.vlgmr.msra.gmra.mrb[44].mxu1 %vm203_vm1, %v1935_v34 }
0x10ab   :  { %4693 = vmatprep.mubr.msk.bf16.mxu1 %vm5114_vm0, %v5113_v1 }
0x117d   :  { %v1989_v5 = vpop.f32.mrb[44].mxu1 }
0x117e   :  { %v1990_v47 = vadd.f32 %v1989_v5, %v1939_v58  ;;  %v4675_v48 = vpop.f32.mrb[45].mxu1 }
0x117f   :  { %v1992_v50 = vpop.f32.mrb[46].mxu1 }
0x1180   :  { %v1996_v15 = vmul.f32 %v1990_v47, %v1990_v47  ;;  %v1993_v63 = vadd.f32 %v1992_v50, %v1939_v58  ;;  %v4676_v37 = vpop.f32.mrb[47].mxu1 }
0x1181   :  { %v4357_v37 = vld [vmem:[%s6388_s10 + $0x10] sm:$0xff] }
0x1182   :  { %v1998_v28 = vmul.f32 %v1996_v15, %v1990_v47  ;;  %v1997_v49 = vmul.f32 %v1993_v63, %v1993_v63 }
0x1184   :  { %v2000_v53 = vmul.f32 0.044715, %v1998_v28  ;;  %v1999_v46 = vmul.f32 %v1997_v49, %v1993_v63  ;;  %v2273_v28 = vrot.slane %v4357_v37, %v311_v12 }
0x1186   :  { %v2002_v55 = vadd.f32 %v2000_v53, %v1990_v47  ;;  %v2001_v38 = vmul.f32 0.044715, %v1999_v46 }
0x1188   :  { %v2004_v7 = vmul.f32 0.7978846, %v2002_v55  ;;  %v2003_v59 = vadd.f32 %v2001_v38, %v1993_v63 }
0x118a   :  { %5027 = vtanh.f32 %v2004_v7  ;;  %v2005_v61 = vmul.f32 0.7978846, %v2003_v59  ;;  %v2118_v59 = vsub.s32 7, %v5268_v8 }
0x118c   :  { %5029 = vtanh.f32 %v2005_v61  ;;  %v2119_v61 = vrot.slane %v5769_v41, %v2118_v59 }
0x1194   :  { %v5028_v60 = vpop.eup %5027 }
0x1195   :  { %v2008_v21 = vadd.f32 1.0, %v5028_v60 }
0x1196   :  { %v5030_v62 = vpop.eup %5029 }
0x1197   :  { %v2010_v0 = vmul.f32 0.5, %v2008_v21  ;;  %v2009_v3 = vadd.f32 1.0, %v5030_v62 }
0x1199   :  { %v2011_v52 = vmul.f32 0.5, %v2009_v3  ;;  %v2012_v4 = vmul.f32 %v2010_v0, %v1990_v47  ;;  %v4332_v3 = vld [vmem:[%s6388_s10 + $0x8] ss:$0 sm:$0xff] }
0x119b   :  { %v2013_v18 = vmul.f32 %v2011_v52, %v1993_v63  ;;  %v4975_v63 = vld [vmem:[%s6383_s5 + $0x18] sm:$0xff]  }
0x119d   :  { %v2014_v6 = vpack.c.bf16 %v2013_v18, %v2012_v4 }
0x119f   :  { %4686 = vmatmul.mubr.msk.bf16.vlgmr.msra.gmra.mrb[48].mxu0 %vm2043_vm10, %v2014_v6  ;;  %v4976_v6 = vld [vmem:[%s6384_s6 + $0x10] sm:$0xff]  }
0x11a0   :  { %4707 = vmatprep.mubr.msk.bf16.mxu0 %vm5114_vm0, %v5113_v1 }
0x1272   :  { %v2081_v16 = vpop.f32.mrb[48].mxu0 }
0x1273   :  { %v2082_v17 = vadd.f32 %v2081_v16, %v2018_v11  ;;  %v4687_v51 = vpop.f32.mrb[49].mxu0  ;;  %v5087_v16 = vld [vmem:[%s6379_s1] sm:$0xff]   ;;  %s6417_s1 = smov 88  }
0x1274   :  { %v2084_v42 = vpop.f32.mrb[50].mxu0 }
0x1275   :  { %v2088_v27 = vadd.f32 %v2082_v17, %v1933_v23  ;;  %v2085_v19 = vadd.f32 %v2084_v42, %v2018_v11  ;;  %v4688_v20 = vpop.f32.mrb[51].mxu0  ;;  %v4977_v11 = vld [vmem:[%s6384_s6 + $0x18] sm:$0xff]   ;;  %v2289_v17 = vrot.slane %v4357_v37, %v5271_v9  ;;  %s6418_s6 = smov 56  }
0x1277   :  { %v2089_v22 = vadd.f32 %v2085_v19, %v1934_v33  ;;  %v2090_v34 = vsel %vm203_vm1, %v2088_v27, 0.0  ;;  %v4974_v33 = vld [vmem:[%s6383_s5 + $0x10] sm:$0xff]   ;;  %s6421_s5 = smov 48  }
0x1278   :  { %2091 = vadd.xlane.f32.xlu0 %v2090_v34  ;;  %4690 = vmatpush3.bf16.msra.mxu1 %v4974_v33 }
0x1279   :  { %v2093_v10 = vsel %vm203_vm1, %v2089_v22, 0.0  ;;  %4691 = vmatprep.subr.bf16.mxu1 %v5113_v1 }
0x127a   :  { %2094 = vadd.xlane.f32.xlu1 %v2093_v10 }
0x127c   :  { %4692 = vmatpush3.bf16.msra.mxu1 %v4975_v63 }
0x127d   :  { %4697 = vmatprep.subr.bf16.mxu1 %v5113_v1 }
0x1305   :  { %v2092_v25 = vpop.xlane.xlu0 %2091 }
0x1306   :  { %v2096_v35 = vmul.f32 0.03125, %v2092_v25 }
0x1307   :  { %v2095_v24 = vpop.xlane.xlu1 %2094 }
0x1308   :  { %v2098_v58 = vsub.f32 %v2088_v27, %v2096_v35  ;;  %v2097_v5 = vmul.f32 0.03125, %v2095_v24 }
0x130a   :  { %v2099_v47 = vsub.f32 %v2089_v22, %v2097_v5  ;;  %v2100_v48 = vmul.f32 %v2098_v58, %v2098_v58 }
0x130c   :  { %v2102_v50 = vsel %vm203_vm1, %v2100_v48, 0.0  ;;  %v2101_v15 = vmul.f32 %v2099_v47, %v2099_v47 }
0x130d   :  { %2103 = vadd.xlane.f32.xlu0 %v2102_v50 }
0x130e   :  { %v2105_v23 = vsel %vm203_vm1, %v2101_v15, 0.0  ;;  %v2283_v15 = vrot.slane %v4357_v37, %v5306_v29 }
0x130f   :  { %2106 = vadd.xlane.f32.xlu1 %v2105_v23 }
0x1320   :  { %2275 = vrot.lane.b32.xlu1 %v2273_v28, %s5115_s21 }
0x139a   :  { %v2104_v49 = vpop.xlane.xlu0 %2103 }
0x139b   :  { %v2108_v53 = vmul.f32 0.03125, %v2104_v49 }
0x139c   :  { %v2107_v46 = vpop.xlane.xlu1 %2106 }
0x139d   :  { %v2110_v55 = vadd.f32 1e-12, %v2108_v53  ;;  %v2109_v38 = vmul.f32 0.03125, %v2107_v46 }
0x139f   :  { %5031 = vrsqrt.f32 %v2110_v55  ;;  %v2111_v7 = vadd.f32 1e-12, %v2109_v38 }
0x13a0   :  { %v2276_v19 = vpop.permute.xlu1 %2275 }
0x13a1   :  { %5033 = vrsqrt.f32 %v2111_v7 }
0x13a9   :  { %v5032_v60 = vpop.eup %5031 }
0x13aa   :  { %v2114_v21 = vmul.f32 %v5032_v60, %v2098_v58 }
0x13ab   :  { %v5034_v62 = vpop.eup %5033 }
0x13ac   :  { %v2120_v12 = vmul.f32 %v2119_v61, %v2114_v21  ;;  %v2115_v0 = vmul.f32 %v5034_v62, %v2099_v47 }
0x13ae   :  { %v2121_v52 = vmul.f32 %v2119_v61, %v2115_v0  ;;  %v5833_v4 = vadd.f32 %v4332_v3, %v2120_v12 }
0x13b0   :  { %v5835_v18 = vadd.f32 %v4332_v3, %v2121_v52 }
0x13b2   :  { %v2160_v41 = vpack.c.bf16 %v5835_v18, %v5833_v4 }
0x13b4   :  { %4694 = vmatmul.mubr.msk.bf16.vlgmr.msra.gmra.mrb[48].mxu1 %vm203_vm1, %v2160_v41 }
0x13b5   :  { %4698 = vmatpush3.bf16.msra.mxu1 %v4976_v6  ;;  %4701 = vmatprep.mubr.msk.bf16.mxu1 %vm5114_vm0, %v5113_v1 }
0x13b6   :  { %4699 = vmatprep.subr.bf16.mxu1 %v5113_v1 }
0x13b9   :  { %4700 = vmatpush3.bf16.msra.mxu1 %v4977_v11 }
0x13ba   :  { %4711 = vmatprep.subr.bf16.mxu1 %v5113_v1 }
0x13bc   :  { %4702 = vmatmul.mubr.msk.bf16.vlgmr.msra.gmra.mrb[52].mxu1 %vm203_vm1, %v5087_v16 }
0x13bd   :  { %4713 = vmatprep.mubr.msk.bf16.mxu1 %vm5114_vm0, %v5113_v1 }
0x1487   :  { %v2210_v51 = vpop.f32.mrb[48].mxu1 }
0x1488   :  { %v5857_v42 = vpack.c.bf16 %v2210_v51, %v2210_v51  ;;  %v4695_v27 = vpop.f32.mrb[49].mxu1  ;;  %v2290_v22 = vadd.f32 %v2289_v17, %v2210_v51  ;;  %v5863_v35 = vadd.f32 %v2276_v19, %v2210_v51  ;;  %v2284_v63 = vadd.f32 %v2283_v15, %v2210_v51 }
0x1489   :  { %v2213_v20 = vpop.f32.mrb[50].mxu1 }
0x148a   :  { %v2291_v34 = vadd.f32 %v2289_v17, %v2213_v20  ;;  %2436 = vrot.lane.b32.xlu0 %v5857_v42, %s5115_s21  ;;  %v4696_v10 = vpop.f32.mrb[51].mxu1  ;;  %v5861_v25 = vpack.c.bf16 %v2213_v20, %v2213_v20  ;;  %v2285_v53 = vadd.f32 %v2283_v15, %v2213_v20  ;;  %v5885_v46 = vpack.c.bf16 %v2284_v63, %v2284_v63 }
0x148b   :  { %v5908_v21 = vadd.f32 %v2276_v19, %v2213_v20 }
0x148c   :  { %v5865_v24 = vpack.c.bf16 %v2291_v34, %v2290_v22  ;;  %2489 = vrot.lane.b32.xlu1 %v5861_v25, %s5115_s21  ;;  %v5889_v29 = vpack.c.bf16 %v2285_v53, %v2285_v53  ;;  %s6419_s21 = smov 80  }
0x148e   :  { %2405 = vrot.lane.b32.xlu0 %v5863_v35, %s5118_s22 }
0x148f   :  { %v2263_v9 = vpop.f32.mrb[52].mxu1 }
0x1490   :  { %v4703_v58 = vpop.f32.mrb[53].mxu1 }
0x1491   :  { %v2266_v5 = vpop.f32.mrb[54].mxu1 }
0x1492   :  { %v5871_v47 = vpack.c.bf16 %v2266_v5, %v2263_v9  ;;  %v4704_v48 = vpop.f32.mrb[55].mxu1 }
0x1494   :  { %v2302_v50 = vsel %vm337_vm2, %v5871_v47, 0 }
0x1495   :  { %4706 = vmatpush3.bf16.xpose.msra.mxu0 %v2302_v50 }
0x1496   :  { %4717 = vmatprep.subr.bf16.mxu0 %v5113_v1 }
0x149c   :  { %4708 = vmatmul.mubr.msk.bf16.vlgmr.msra.gmra.mrb[52].mxu0 %vm337_vm2, %v5865_v24 }
0x149d   :  { %4719 = vmatprep.mubr.msk.bf16.mxu0 %vm5114_vm0, %v5113_v1 }
0x14fc   :  { %v2437_v23 = vpop.permute.xlu0 %2436 }
0x14fd   :  { %v2446_v33 = vsel %vm337_vm2, %v2437_v23, 0 }
0x14fe   :  { %4712 = vmatpush3.bf16.xpose.msra.mxu1 %v2446_v33  ;;  %v2490_v28 = vpop.permute.xlu1 %2489 }
0x14ff   :  { %4723 = vmatprep.subr.bf16.mxu1 %v5113_v1  ;;  %v2499_v49 = vsel %vm337_vm2, %v2490_v28, 0 }
0x1500   :  { %4718 = vmatpush3.bf16.xpose.msra.mxu0 %v2499_v49  ;;  %v2406_v61 = vpop.permute.xlu0 %2405 }
0x1501   :  { %4729 = vmatprep.subr.bf16.mxu0 %v5113_v1  ;;  %v5904_v60 = vsub.f32 %v5863_v35, %v2406_v61 }
0x1505   :  { %4714 = vmatmul.mubr.msk.bf16.vlgmr.msra.gmra.mrb[56].mxu1 %vm337_vm2, %v5885_v46 }
0x1506   :  { %4725 = vmatprep.mubr.msk.bf16.mxu1 %vm5114_vm0, %v5113_v1 }
0x1507   :  { %4720 = vmatmul.mubr.msk.bf16.vlgmr.msra.gmra.mrb[56].mxu0 %vm337_vm2, %v5889_v29 }
0x1508   :  { %4731 = vmatprep.mubr.msk.bf16.mxu0 %vm5114_vm0, %v5113_v1 }
0x156f   :  { %v2338_v37 = vpop.f32.mrb[52].mxu0 }
0x1570   :  { %2353 = vrot.lane.b32.xlu0 %v2338_v37, %s5119_s23  ;;  %2347 = vrot.lane.b32.xlu1 %v2338_v37, %s5120_s24  ;;  %v4709_v55 = vpop.f32.mrb[53].mxu0 }
0x1571   :  { %v2341_v38 = vpop.f32.mrb[54].mxu0 }
0x1572   :  { %v4710_v7 = vpop.f32.mrb[55].mxu0 }
0x1574   :  { %2365 = vrot.lane.b32.xlu0 %v2338_v37, %s5118_s22  ;;  %2359 = vrot.lane.b32.xlu1 %v2338_v37, %s5121_s25 }
0x1578   :  { %2377 = vrot.lane.b32.xlu0 %v2338_v37, %s5122_s26  ;;  %2371 = vrot.lane.b32.xlu1 %v2338_v37, %s5123_s27 }
0x157c   :  { %2415 = vperm.xlu0 %4931, %v5904_v60   ;;  %2383 = vrot.lane.b32.xlu1 %v2338_v37, %s5124_s28 }
0x1580   :  { %2407 = vrot.lane.b32.xlu0 %v5908_v21, %s5118_s22  ;;  %2426 = vperm.xlu1 %4932, %v5863_v35  }
0x1581   :  { %4935 = vset.pattern.permute.xlu0 %v5129_v13 }
0x1584   :  { %2355 = vrot.lane.b32.xlu0 %v2341_v38, %s5119_s23  ;;  %4933 = vset.pattern.permute.xlu1 %v5117_v31 }
0x1588   :  { %2367 = vrot.lane.b32.xlu0 %v2341_v38, %s5118_s22 }
0x158c   :  { %2379 = vrot.lane.b32.xlu0 %v2341_v38, %s5122_s26 }
0x15d8   :  { %v2482_v62 = vpop.f32.mrb[56].mxu1 }
0x15d9   :  { %v4715_v12 = vpop.f32.mrb[57].mxu1 }
0x15da   :  { %v2485_v0 = vpop.f32.mrb[58].mxu1  ;;  %v2535_v3 = vpop.f32.mrb[56].mxu0 }
0x15db   :  { %v4716_v52 = vpop.f32.mrb[59].mxu1  ;;  %v4721_v6 = vpop.f32.mrb[57].mxu0 }
0x15dc   :  { %v2538_v41 = vpop.f32.mrb[58].mxu0 }
0x15dd   :  { %v4722_v11 = vpop.f32.mrb[59].mxu0 }
0x15e2   :  { %v2354_v16 = vpop.permute.xlu0 %2353  ;;  %v2348_v17 = vpop.permute.xlu1 %2347 }
0x15e3   :  { %v2389_v13 = vsel %vm429_vm3, %v2338_v37, %v2348_v17 }
0x15e4   :  { %v2391_v27 = vsel %vm432_vm4, %v2389_v13, %v2354_v16 }
0x15e6   :  { %v2366_v51 = vpop.permute.xlu0 %2365  ;;  %v2360_v31 = vpop.permute.xlu1 %2359 }
0x15e7   :  { %v2393_v19 = vsel %vm435_vm5, %v2391_v27, %v2360_v31 }
0x15e8   :  { %v2395_v20 = vsel %vm438_vm6, %v2393_v19, %v2366_v51 }
0x15ea   :  { %v2372_v22 = vpop.permute.xlu1 %2371  ;;  %v2378_v34 = vpop.permute.xlu0 %2377 }
0x15eb   :  { %v2397_v10 = vsel %vm441_vm7, %v2395_v20, %v2372_v22 }
0x15ec   :  { %v2399_v9 = vsel %vm444_vm8, %v2397_v10, %v2378_v34 }
0x15ee   :  { %v2384_v58 = vpop.permute.xlu1 %2383 }
0x15ef   :  { %v2401_v5 = vsel %vm447_vm9, %v2399_v9, %v2384_v58 }
0x15f0   :  { %2439 = vrot.lane.b32.xlu1 %v2401_v5, %s5125_s3 }
0x15f4   :  { %2349 = vrot.lane.b32.xlu1 %v2341_v38, %s5120_s24 }
0x15f8   :  { %2361 = vrot.lane.b32.xlu1 %v2341_v38, %s5121_s25 }
0x15fb   :  { %v2416_v48 = vpop.permute.xlu0 %2415 }
0x15fc   :  { %2373 = vrot.lane.b32.xlu1 %v2341_v38, %s5123_s27  ;;  %v2423_v33 = vmul.f32 %v5397_v43, %v2416_v48 }
0x15ff   :  { %v2408_v50 = vpop.permute.xlu0 %2407  ;;  %v2427_v23 = vpop.permute.xlu1 %2426 }
0x1600   :  { %2385 = vrot.lane.b32.xlu1 %v2341_v38, %s5124_s28  ;;  %v5931_v15 = vsub.f32 %v5908_v21, %v2408_v50  ;;  %v2433_v28 = vadd.f32 %v2427_v23, %v2423_v33 }
0x1603   :  { %v2356_v53 = vpop.permute.xlu0 %2355 }
0x1604   :  { %2420 = vperm.xlu1 %4933, %v5931_v15  }
0x1607   :  { %v2368_v52 = vpop.permute.xlu0 %2367 }
0x1608   :  { %4934 = vset.pattern.permute.xlu1 %v5116_v30 }
0x1609   :  { %2430 = vperm.xlu1 %4934, %v5908_v21  }
0x160b   :  { %v2380_v17 = vpop.permute.xlu0 %2379 }
0x160d   :  { %4936 = vset.pattern.permute.xlu1 %v5130_v14 }
0x1662   :  { %v2440_v63 = vpop.permute.xlu1 %2439 }
0x1663   :  { %v2483_v49 = vadd.f32 %v2482_v62, %v2440_v63 }
0x1665   :  { %v2541_v37 = vadd.f32 %v2483_v49, %v2433_v28 }
0x1666   :  { %v2350_v55 = vpop.permute.xlu1 %2349 }
0x1667   :  { %v2543_v7 = vmul.f32 0.35355338, %v2541_v37  ;;  %v2390_v61 = vsel %vm429_vm3, %v2341_v38, %v2350_v55 }
0x1668   :  { %v2392_v30 = vsel %vm432_vm4, %v2390_v61, %v2356_v53 }
0x1669   :  { %v2545_v12 = vadd.f32 %v2543_v7, %v5403_v57 }
0x166a   :  { %v2362_v0 = vpop.permute.xlu1 %2361 }
0x166b   :  { %v2394_v6 = vsel %vm435_vm5, %v2392_v30, %v2362_v0  ;;  %v2547_v41 = vsel %vm337_vm2, %v2545_v12, -inf }
0x166c   :  { %2548 = vmax.xlane.f32.xlu0 %v2547_v41  ;;  %v2396_v11 = vsel %vm438_vm6, %v2394_v6, %v2368_v52 }
0x166e   :  { %v2374_v62 = vpop.permute.xlu1 %2373 }
0x166f   :  { %v2398_v16 = vsel %vm441_vm7, %v2396_v11, %v2374_v62 }
0x1670   :  { %v2400_v13 = vsel %vm444_vm8, %v2398_v16, %v2380_v17 }
0x1672   :  { %v2386_v38 = vpop.permute.xlu1 %2385 }
0x1673   :  { %v2402_v51 = vsel %vm447_vm9, %v2400_v13, %v2386_v38 }
0x1674   :  { %2492 = vrot.lane.b32.xlu1 %v2402_v51, %s5125_s3 }
0x1682   :  { %2571 = vrot.lane.b32.xlu0 %v5857_v42, %s5127_s2 }
0x1683   :  { %v2421_v27 = vpop.permute.xlu1 %2420 }
0x1684   :  { %v2424_v19 = vmul.f32 %v5420_v26, %v2421_v27 }
0x1688   :  { %v2431_v31 = vpop.permute.xlu1 %2430 }
0x1689   :  { %v2434_v22 = vadd.f32 %v2431_v31, %v2424_v19 }
0x16e6   :  { %v2493_v20 = vpop.permute.xlu1 %2492 }
0x16e7   :  { %v2536_v34 = vadd.f32 %v2535_v3, %v2493_v20 }
0x16e9   :  { %v2542_v10 = vadd.f32 %v2536_v34, %v2434_v22 }
0x16eb   :  { %v2544_v9 = vmul.f32 0.35355338, %v2542_v10 }
0x16ed   :  { %v2546_v58 = vadd.f32 %v2544_v9, %v5425_v39 }
0x16ef   :  { %v2550_v5 = vsel %vm337_vm2, %v2546_v58, -inf }
0x16f0   :  { %2551 = vmax.xlane.f32.xlu0 %v2550_v5 }
0x16f9   :  { %v2549_v48 = vpop.xlane.xlu0 %2548 }
0x16fa   :  { %v2553_v50 = vsub.f32 %v2545_v12, %v2549_v48 }
0x16fc   :  { %v2555_v23 = vmul.f32 1.442695, %v2553_v50 }
0x16fd   :  { %v2572_v33 = vpop.permute.xlu0 %2571 }
0x16fe   :  { %5035 = vpow2.f32 %v2555_v23  ;;  %v2577_v63 = vsel %vm438_vm6, %v2572_v33, 0 }
0x16ff   :  { %4724 = vmatpush3.bf16.msra.mxu1 %v2577_v63 }
0x1700   :  { %4735 = vmatprep.subr.bf16.mxu1 %v5113_v1 }
0x1706   :  { %2619 = vrot.lane.b32.xlu0 %v5861_v25, %s5127_s2  ;;  %s6420_s2 = smov 112  }
0x1708   :  { %v5036_v3 = vpop.eup %5035 }
0x1709   :  { %v2559_v28 = vsel %vm337_vm2, %v5036_v3, 0.0 }
0x170a   :  { %2799 = vrot.lane.b32.xlu0 %v5885_v46, %s5125_s3  ;;  %2560 = vadd.xlane.f32.xlu1 %v2559_v28 }
0x170e   :  { %2856 = vrot.lane.b32.xlu0 %v5861_v25, %s6417_s1 }
0x1712   :  { %2854 = vrot.lane.b32.xlu0 %v5889_v29, %s5125_s3 }
0x171b   :  { %2671 = vrot.lane.b32.xlu1 %v5871_v47, %s5125_s3 }
0x171f   :  { %2668 = vrot.lane.b32.xlu1 %v5865_v24, %s5125_s3 }
0x177d   :  { %v2552_v49 = vpop.xlane.xlu0 %2551 }
0x177e   :  { %v2554_v53 = vsub.f32 %v2546_v58, %v2552_v49 }
0x1780   :  { %v2557_v37 = vmul.f32 1.442695, %v2554_v53 }
0x1781   :  { %v2620_v55 = vpop.permute.xlu0 %2619 }
0x1782   :  { %5037 = vpow2.f32 %v2557_v37  ;;  %v2625_v7 = vsel %vm438_vm6, %v2620_v55, 0 }
0x1783   :  { %4730 = vmatpush3.bf16.msra.mxu0 %v2625_v7 }
0x1784   :  { %4741 = vmatprep.subr.bf16.mxu0 %v5113_v1 }
0x1785   :  { %v2800_v11 = vpop.permute.xlu0 %2799 }
0x1789   :  { %v2857_v16 = vpop.permute.xlu0 %2856 }
0x178a   :  { %v2866_v13 = vsel %vm337_vm2, %v2857_v16, 0 }
0x178c   :  { %v5038_v61 = vpop.eup %5037 }
0x178d   :  { %v2562_v12 = vsel %vm337_vm2, %v5038_v61, 0.0  ;;  %v2855_v38 = vpop.permute.xlu0 %2854 }
0x178e   :  { %2563 = vadd.xlane.f32.xlu1 %v2562_v12 }
0x1797   :  { %v2561_v30 = vpop.xlane.xlu1 %2560 }
0x1798   :  { %5039 = vrcp.f32 %v2561_v30 }
0x179b   :  { %v2672_v6 = vpop.permute.xlu1 %2671 }
0x179c   :  { %v2677_v62 = vsel %vm337_vm2, %v2672_v6, 0 }
0x179f   :  { %2801 = vrot.lane.b32.xlu1 %v5857_v42, %s6417_s1  ;;  %v2669_v17 = vpop.permute.xlu1 %2668 }
0x17a2   :  { %v5040_v0 = vpop.eup %5039 }
0x17a3   :  { %v2567_v52 = vmul.f32 %v5040_v0, %v5036_v3 }
0x17a5   :  { %v2569_v41 = vpack.c.bf16 %v2567_v52, %v2567_v52 }
0x17a7   :  { %4726 = vmatmul.mubr.msk.bf16.vlgmr.msra.gmra.mrb[60].mxu1 %vm337_vm2, %v2569_v41 }
0x17a8   :  { %4736 = vmatpush3.bf16.xpose.msra.mxu1 %v2677_v62  ;;  %4737 = vmatprep.mubr.msk.bf16.mxu1 %vm5114_vm0, %v5113_v1 }
0x17a9   :  { %4747 = vmatprep.subr.bf16.mxu1 %v5113_v1 }
0x17af   :  { %4738 = vmatmul.mubr.msk.bf16.vlgmr.msra.gmra.mrb[64].mxu1 %vm337_vm2, %v2669_v17 }
0x17b0   :  { %4748 = vmatpush3.bf16.xpose.msra.mxu1 %v2866_v13  ;;  %4749 = vmatprep.mubr.msk.bf16.mxu1 %vm5114_vm0, %v5113_v1 }
0x17b1   :  { %4759 = vmatprep.subr.bf16.mxu1 %v5113_v1 }
0x17b7   :  { %4750 = vmatmul.mubr.msk.bf16.vlgmr.msra.gmra.mrb[68].mxu1 %vm337_vm2, %v2855_v38 }
0x17b8   :  { %4761 = vmatprep.mubr.msk.bf16.mxu1 %vm5114_vm0, %v5113_v1 }
0x181b   :  { %v2564_v51 = vpop.xlane.xlu1 %2563 }
0x181c   :  { %5041 = vrcp.f32 %v2564_v51 }
0x181f   :  { %v2802_v19 = vpop.permute.xlu1 %2801 }
0x1820   :  { %v2811_v22 = vsel %vm337_vm2, %v2802_v19, 0 }
0x1826   :  { %v5042_v27 = vpop.eup %5041 }
0x1827   :  { %v2568_v31 = vmul.f32 %v5042_v27, %v5038_v61 }
0x1829   :  { %v2570_v20 = vpack.c.bf16 %v2568_v31, %v2568_v31 }
0x182b   :  { %4732 = vmatmul.mubr.msk.bf16.vlgmr.msra.gmra.mrb[60].mxu0 %vm337_vm2, %v2570_v20 }
0x182c   :  { %4742 = vmatpush3.bf16.xpose.msra.mxu0 %v2811_v22  ;;  %4743 = vmatprep.mubr.msk.bf16.mxu0 %vm5114_vm0, %v5113_v1 }
0x182d   :  { %4753 = vmatprep.subr.bf16.mxu0 %v5113_v1 }
0x1833   :  { %4744 = vmatmul.mubr.msk.bf16.vlgmr.msra.gmra.mrb[64].mxu0 %vm337_vm2, %v2800_v11 }
0x1834   :  { %4755 = vmatprep.mubr.msk.bf16.mxu0 %vm5114_vm0, %v5113_v1 }
0x187a   :  { %v5994_v34 = vpop.f32.mrb[60].mxu1 }
0x187b   :  { %v4727_v10 = vpop.f32.mrb[61].mxu1 }
0x187c   :  { %v2616_v9 = vpop.f32.mrb[62].mxu1 }
0x187d   :  { %v4728_v58 = vpop.f32.mrb[63].mxu1 }
0x1882   :  { %v2713_v5 = vpop.f32.mrb[64].mxu1 }
0x1883   :  { %2734 = vrot.lane.b32.xlu1 %v2713_v5, %s5121_s25  ;;  %2722 = vrot.lane.b32.xlu0 %v2713_v5, %s5120_s24  ;;  %v4739_v48 = vpop.f32.mrb[65].mxu1 }
0x1884   :  { %v2716_v50 = vpop.f32.mrb[66].mxu1 }
0x1885   :  { %v4740_v23 = vpop.f32.mrb[67].mxu1 }
0x1887   :  { %2746 = vrot.lane.b32.xlu1 %v2713_v5, %s5123_s27  ;;  %2728 = vrot.lane.b32.xlu0 %v2713_v5, %s5119_s23 }
0x188a   :  { %v6000_v33 = vpop.f32.mrb[68].mxu1 }
0x188b   :  { %2758 = vrot.lane.b32.xlu1 %v2713_v5, %s5124_s28  ;;  %2740 = vrot.lane.b32.xlu0 %v2713_v5, %s5118_s22  ;;  %v4751_v63 = vpop.f32.mrb[69].mxu1 }
0x188c   :  { %v2905_v3 = vpop.f32.mrb[70].mxu1 }
0x188d   :  { %v4752_v28 = vpop.f32.mrb[71].mxu1 }
0x188f   :  { %2789 = vperm.xlu1 %4936, %v5863_v35   ;;  %2752 = vrot.lane.b32.xlu0 %v2713_v5, %s5122_s26 }
0x1893   :  { %2779 = vperm.xlu0 %4935, %v5904_v60   ;;  %4939 = vset.pattern.permute.xlu1 %v5134_v54 }
0x1897   :  { %2724 = vrot.lane.b32.xlu0 %v2716_v50, %s5120_s24 }
0x189b   :  { %2736 = vrot.lane.b32.xlu0 %v2716_v50, %s5121_s25 }
0x189f   :  { %2748 = vrot.lane.b32.xlu0 %v2716_v50, %s5123_s27 }
0x18a3   :  { %2760 = vrot.lane.b32.xlu0 %v2716_v50, %s5124_s28 }
0x18a7   :  { %2783 = vperm.xlu0 %4935, %v5931_v15  }
0x18ab   :  { %4937 = vset.pattern.permute.xlu0 %v5130_v14 }
0x18ac   :  { %2793 = vperm.xlu0 %4937, %v5908_v21  }
0x18b0   :  { %4938 = vset.pattern.permute.xlu0 %v5135_v56 }
0x18f5   :  { %v2723_v49 = vpop.permute.xlu0 %2722  ;;  %v2735_v53 = vpop.permute.xlu1 %2734 }
0x18f6   :  { %v2764_v37 = vsel %vm429_vm3, %v2713_v5, %v2723_v49 }
0x18f9   :  { %v2729_v55 = vpop.permute.xlu0 %2728  ;;  %v2747_v61 = vpop.permute.xlu1 %2746 }
0x18fa   :  { %v2766_v7 = vsel %vm432_vm4, %v2764_v37, %v2729_v55 }
0x18fb   :  { %v2768_v12 = vsel %vm435_vm5, %v2766_v7, %v2735_v53 }
0x18fd   :  { %v2741_v30 = vpop.permute.xlu0 %2740  ;;  %v2759_v62 = vpop.permute.xlu1 %2758 }
0x18fe   :  { %v2770_v0 = vsel %vm438_vm6, %v2768_v12, %v2741_v30  ;;  %v6020_v52 = vpop.f32.mrb[60].mxu0 }
0x18ff   :  { %v4733_v14 = vpop.f32.mrb[61].mxu0  ;;  %v2772_v56 = vsel %vm441_vm7, %v2770_v0, %v2747_v61 }
0x1900   :  { %v2664_v6 = vpop.f32.mrb[62].mxu0 }
0x1901   :  { %v4734_v41 = vpop.f32.mrb[63].mxu0  ;;  %v2753_v11 = vpop.permute.xlu0 %2752 }
0x1902   :  { %v2774_v16 = vsel %vm444_vm8, %v2772_v56, %v2753_v11 }
0x1903   :  { %v2776_v17 = vsel %vm447_vm9, %v2774_v16, %v2759_v62 }
0x1904   :  { %2804 = vrot.lane.b32.xlu1 %v2776_v17, %s5125_s3 }
0x1906   :  { %v2847_v13 = vpop.f32.mrb[64].mxu0 }
0x1907   :  { %v4745_v38 = vpop.f32.mrb[65].mxu0 }
0x1908   :  { %v2850_v51 = vpop.f32.mrb[66].mxu0  ;;  %2730 = vrot.lane.b32.xlu1 %v2716_v50, %s5119_s23 }
0x1909   :  { %v4746_v27 = vpop.f32.mrb[67].mxu0 }
0x190c   :  { %2742 = vrot.lane.b32.xlu1 %v2716_v50, %s5118_s22 }
0x190e   :  { %v2790_v20 = vpop.permute.xlu1 %2789 }
0x1910   :  { %2754 = vrot.lane.b32.xlu1 %v2716_v50, %s5122_s26 }
0x1912   :  { %v2780_v31 = vpop.permute.xlu0 %2779 }
0x1913   :  { %v2786_v22 = vmul.f32 %v5397_v43, %v2780_v31 }
0x1915   :  { %v2796_v9 = vadd.f32 %v2790_v20, %v2786_v22 }
0x1916   :  { %v2725_v19 = vpop.permute.xlu0 %2724 }
0x1917   :  { %v2765_v23 = vsel %vm429_vm3, %v2716_v50, %v2725_v19 }
0x191a   :  { %v2737_v58 = vpop.permute.xlu0 %2736 }
0x191e   :  { %v2749_v49 = vpop.permute.xlu0 %2748 }
0x1922   :  { %v2761_v0 = vpop.permute.xlu0 %2760 }
0x1926   :  { %v2784_v6 = vpop.permute.xlu0 %2783 }
0x1927   :  { %v2787_v56 = vmul.f32 %v5420_v26, %v2784_v6 }
0x192b   :  { %v2794_v41 = vpop.permute.xlu0 %2793 }
0x192c   :  { %v2797_v62 = vadd.f32 %v2794_v41, %v2787_v56 }
0x1976   :  { %v2805_v10 = vpop.permute.xlu1 %2804 }
0x1977   :  { %v2848_v5 = vadd.f32 %v2847_v13, %v2805_v10 }
0x1979   :  { %v2908_v48 = vadd.f32 %v2848_v5, %v2796_v9 }
0x197a   :  { %v2731_v63 = vpop.permute.xlu1 %2730 }
0x197b   :  { %v2910_v3 = vmul.f32 0.35355338, %v2908_v48  ;;  %v2767_v28 = vsel %vm432_vm4, %v2765_v23, %v2731_v63 }
0x197c   :  { %v2769_v55 = vsel %vm435_vm5, %v2767_v28, %v2737_v58 }
0x197d   :  { %v2912_v53 = vadd.f32 %v2910_v3, %v5403_v57 }
0x197e   :  { %v2743_v37 = vpop.permute.xlu1 %2742 }
0x197f   :  { %v2771_v7 = vsel %vm438_vm6, %v2769_v55, %v2743_v37  ;;  %v2914_v61 = vsel %vm337_vm2, %v2912_v53, -inf }
0x1980   :  { %2915 = vmax.xlane.f32.xlu1 %v2914_v61  ;;  %v2773_v30 = vsel %vm441_vm7, %v2771_v7, %v2749_v49 }
0x1982   :  { %v2755_v12 = vpop.permute.xlu1 %2754 }
0x1983   :  { %v2775_v50 = vsel %vm444_vm8, %v2773_v30, %v2755_v12 }
0x1984   :  { %v2777_v14 = vsel %vm447_vm9, %v2775_v50, %v2761_v0 }
0x1985   :  { %2859 = vrot.lane.b32.xlu0 %v2777_v14, %s5125_s3 }
0x1991   :  { %2938 = vrot.lane.b32.xlu1 %v5857_v42, %s6418_s6 }
0x19f7   :  { %v2860_v11 = vpop.permute.xlu0 %2859 }
0x19f8   :  { %v2903_v16 = vadd.f32 %v6000_v33, %v2860_v11 }
0x19fa   :  { %v2909_v17 = vadd.f32 %v2903_v16, %v2797_v62 }
0x19fc   :  { %v2911_v13 = vmul.f32 0.35355338, %v2909_v17 }
0x19fe   :  { %v2913_v38 = vadd.f32 %v2911_v13, %v5425_v39 }
0x1a00   :  { %v2917_v51 = vsel %vm337_vm2, %v2913_v38, -inf }
0x1a01   :  { %2918 = vmax.xlane.f32.xlu1 %v2917_v51 }
0x1a0d   :  { %v2916_v27 = vpop.xlane.xlu1 %2915 }
0x1a0e   :  { %v2920_v31 = vsub.f32 %v2912_v53, %v2916_v27 }
0x1a10   :  { %v2922_v19 = vmul.f32 1.442695, %v2920_v31 }
0x1a11   :  { %v2939_v20 = vpop.permute.xlu1 %2938 }
0x1a12   :  { %5043 = vpow2.f32 %v2922_v19  ;;  %v2944_v22 = vsel %vm438_vm6, %v2939_v20, 0  ;;  %2986 = vrot.lane.b32.xlu1 %v5861_v25, %s6418_s6 }
0x1a13   :  { %4754 = vmatpush3.bf16.msra.mxu0 %v2944_v22 }
0x1a14   :  { %4765 = vmatprep.subr.bf16.mxu0 %v5113_v1 }
0x1a16   :  { %3165 = vrot.lane.b32.xlu1 %v5857_v42, %s6419_s21 }
0x1a1a   :  { %3219 = vrot.lane.b32.xlu1 %v5861_v25, %s6419_s21 }
0x1a1c   :  { %v5044_v33 = vpop.eup %5043 }
0x1a1d   :  { %v2926_v10 = vsel %vm337_vm2, %v5044_v33, 0.0 }
0x1a1e   :  { %2927 = vadd.xlane.f32.xlu0 %v2926_v10  ;;  %3217 = vrot.lane.b32.xlu1 %v5889_v29, %s6420_s2 }
0x1a34   :  { %3036 = vrot.lane.b32.xlu0 %v5871_v47, %s6420_s2 }
0x1a38   :  { %3034 = vrot.lane.b32.xlu0 %v5865_v24, %s6420_s2 }
0x1a8e   :  { %v2919_v9 = vpop.xlane.xlu1 %2918 }
0x1a8f   :  { %v2921_v58 = vsub.f32 %v2913_v38, %v2919_v9 }
0x1a91   :  { %v2924_v5 = vmul.f32 1.442695, %v2921_v58 }
0x1a92   :  { %v2987_v48 = vpop.permute.xlu1 %2986 }
0x1a93   :  { %5045 = vpow2.f32 %v2924_v5  ;;  %v2992_v23 = vsel %vm438_vm6, %v2987_v48, 0 }
0x1a94   :  { %4760 = vmatpush3.bf16.msra.mxu1 %v2992_v23 }
0x1a95   :  { %4771 = vmatprep.subr.bf16.mxu1 %v5113_v1 }
0x1a96   :  { %v3166_v7 = vpop.permute.xlu1 %3165 }
0x1a97   :  { %v3175_v11 = vsel %vm337_vm2, %v3166_v7, 0 }
0x1a9a   :  { %v3220_v12 = vpop.permute.xlu1 %3219 }
0x1a9b   :  { %v3229_v0 = vsel %vm337_vm2, %v3220_v12, 0 }
0x1a9d   :  { %v5046_v63 = vpop.eup %5045 }
0x1a9e   :  { %v2929_v3 = vsel %vm337_vm2, %v5046_v63, 0.0  ;;  %v3218_v50 = vpop.permute.xlu1 %3217 }
0x1a9f   :  { %2930 = vadd.xlane.f32.xlu0 %v2929_v3 }
0x1aab   :  { %v2928_v28 = vpop.xlane.xlu0 %2927 }
0x1aac   :  { %5047 = vrcp.f32 %v2928_v28 }
0x1aaf   :  { %v3037_v37 = vpop.permute.xlu0 %3036 }
0x1ab0   :  { %v3042_v61 = vsel %vm337_vm2, %v3037_v37, 0 }
0x1ab3   :  { %v3035_v30 = vpop.permute.xlu0 %3034 }
0x1ab5   :  { %3163 = vrot.lane.b32.xlu0 %v5885_v46, %s6420_s2 }
0x1ab6   :  { %v5048_v49 = vpop.eup %5047 }
0x1ab7   :  { %v2934_v53 = vmul.f32 %v5048_v49, %v5044_v33 }
0x1ab9   :  { %v2936_v55 = vpack.c.bf16 %v2934_v53, %v2934_v53 }
0x1abb   :  { %4756 = vmatmul.mubr.msk.bf16.vlgmr.msra.gmra.mrb[68].mxu0 %vm337_vm2, %v2936_v55 }
0x1abc   :  { %4766 = vmatpush3.bf16.xpose.msra.mxu0 %v3042_v61  ;;  %4767 = vmatprep.mubr.msk.bf16.mxu0 %vm5114_vm0, %v5113_v1 }
0x1abd   :  { %4777 = vmatprep.subr.bf16.mxu0 %v5113_v1 }
0x1ac3   :  { %4768 = vmatmul.mubr.msk.bf16.vlgmr.msra.gmra.mrb[72].mxu0 %vm337_vm2, %v3035_v30 }
0x1ac4   :  { %4778 = vmatpush3.bf16.xpose.msra.mxu0 %v3229_v0  ;;  %4779 = vmatprep.mubr.msk.bf16.mxu0 %vm5114_vm0, %v5113_v1 }
0x1ac5   :  { %4789 = vmatprep.subr.bf16.mxu0 %v5113_v1 }
0x1acb   :  { %4780 = vmatmul.mubr.msk.bf16.vlgmr.msra.gmra.mrb[76].mxu0 %vm337_vm2, %v3218_v50 }
0x1acc   :  { %4791 = vmatprep.mubr.msk.bf16.mxu0 %vm5114_vm0, %v5113_v1 }
0x1b2c   :  { %v2931_v14 = vpop.xlane.xlu0 %2930 }
0x1b2d   :  { %5049 = vrcp.f32 %v2931_v14 }
0x1b30   :  { %v3164_v62 = vpop.permute.xlu0 %3163 }
0x1b37   :  { %v5050_v6 = vpop.eup %5049 }
0x1b38   :  { %v2935_v41 = vmul.f32 %v5050_v6, %v5046_v63 }
0x1b3a   :  { %v2937_v56 = vpack.c.bf16 %v2935_v41, %v2935_v41 }
0x1b3c   :  { %4762 = vmatmul.mubr.msk.bf16.vlgmr.msra.gmra.mrb[72].mxu1 %vm337_vm2, %v2937_v56 }
0x1b3d   :  { %4772 = vmatpush3.bf16.xpose.msra.mxu1 %v3175_v11  ;;  %4773 = vmatprep.mubr.msk.bf16.mxu1 %vm5114_vm0, %v5113_v1 }
0x1b3e   :  { %4783 = vmatprep.subr.bf16.mxu1 %v5113_v1 }
0x1b44   :  { %4774 = vmatmul.mubr.msk.bf16.vlgmr.msra.gmra.mrb[76].mxu1 %vm337_vm2, %v3164_v62 }
0x1b45   :  { %4785 = vmatprep.mubr.msk.bf16.mxu1 %vm5114_vm0, %v5113_v1 }
0x1b8e   :  { %v6087_v16 = vpop.f32.mrb[68].mxu0 }
0x1b8f   :  { %v4757_v17 = vpop.f32.mrb[69].mxu0 }
0x1b90   :  { %v2983_v13 = vpop.f32.mrb[70].mxu0 }
0x1b91   :  { %v4758_v38 = vpop.f32.mrb[71].mxu0 }
0x1b96   :  { %v3078_v51 = vpop.f32.mrb[72].mxu0 }
0x1b97   :  { %v4769_v27 = vpop.f32.mrb[73].mxu0  ;;  %3087 = vrot.lane.b32.xlu1 %v3078_v51, %s5120_s24  ;;  %3105 = vrot.lane.b32.xlu0 %v3078_v51, %s5118_s22 }
0x1b98   :  { %v3081_v31 = vpop.f32.mrb[74].mxu0 }
0x1b99   :  { %v4770_v19 = vpop.f32.mrb[75].mxu0 }
0x1b9b   :  { %3093 = vrot.lane.b32.xlu1 %v3078_v51, %s5119_s23  ;;  %3117 = vrot.lane.b32.xlu0 %v3078_v51, %s5122_s26 }
0x1b9e   :  { %v6093_v20 = vpop.f32.mrb[76].mxu0 }
0x1b9f   :  { %3099 = vrot.lane.b32.xlu1 %v3078_v51, %s5121_s25  ;;  %3144 = vperm.xlu0 %4938, %v5904_v60   ;;  %v4781_v22 = vpop.f32.mrb[77].mxu0 }
0x1ba0   :  { %v3268_v33 = vpop.f32.mrb[78].mxu0 }
0x1ba1   :  { %v4782_v10 = vpop.f32.mrb[79].mxu0 }
0x1ba3   :  { %3111 = vrot.lane.b32.xlu1 %v3078_v51, %s5123_s27  ;;  %3089 = vrot.lane.b32.xlu0 %v3081_v31, %s5120_s24 }
0x1ba7   :  { %3123 = vrot.lane.b32.xlu1 %v3078_v51, %s5124_s28  ;;  %3101 = vrot.lane.b32.xlu0 %v3081_v31, %s5121_s25 }
0x1bab   :  { %3154 = vperm.xlu1 %4939, %v5863_v35   ;;  %3113 = vrot.lane.b32.xlu0 %v3081_v31, %s5123_s27 }
0x1baf   :  { %3125 = vrot.lane.b32.xlu0 %v3081_v31, %s5124_s28  ;;  %4941 = vset.pattern.permute.xlu1 %v5139_v44 }
0x1bb3   :  { %3148 = vperm.xlu0 %4938, %v5931_v15  }
0x1bb7   :  { %4940 = vset.pattern.permute.xlu0 %v5134_v54 }
0x1bb8   :  { %3158 = vperm.xlu0 %4940, %v5908_v21  }
0x1bbc   :  { %4942 = vset.pattern.permute.xlu0 %v5139_v44 }
0x1c09   :  { %v3088_v9 = vpop.permute.xlu1 %3087  ;;  %v3106_v53 = vpop.permute.xlu0 %3105 }
0x1c0a   :  { %v3129_v48 = vsel %vm429_vm3, %v3078_v51, %v3088_v9 }
0x1c0d   :  { %v3094_v58 = vpop.permute.xlu1 %3093  ;;  %v3118_v12 = vpop.permute.xlu0 %3117 }
0x1c0e   :  { %v3131_v3 = vsel %vm432_vm4, %v3129_v48, %v3094_v58 }
0x1c0f   :  { %v6109_v5 = vpop.f32.mrb[72].mxu1 }
0x1c10   :  { %v4944_v23 = vpack.i.bf16 %v6109_v5, %v6087_v16  ;;  %v4763_v63 = vpop.f32.mrb[73].mxu1 }
0x1c11   :  { %v3100_v28 = vpop.permute.xlu1 %3099  ;;  %v3031_v49 = vpop.f32.mrb[74].mxu1 }
0x1c12   :  { %v3133_v54 = vsel %vm435_vm5, %v3131_v3, %v3100_v28  ;;  %v4764_v37 = vpop.f32.mrb[75].mxu1 }
0x1c13   :  { %v3135_v44 = vsel %vm438_vm6, %v3133_v54, %v3106_v53 }
0x1c15   :  { %v3112_v55 = vpop.permute.xlu1 %3111 }
0x1c16   :  { %v3137_v7 = vsel %vm441_vm7, %v3135_v44, %v3112_v55 }
0x1c17   :  { %v3211_v61 = vpop.f32.mrb[76].mxu1  ;;  %v3139_v0 = vsel %vm444_vm8, %v3137_v7, %v3118_v12 }
0x1c18   :  { %v4775_v30 = vpop.f32.mrb[77].mxu1 }
0x1c19   :  { %v3124_v50 = vpop.permute.xlu1 %3123  ;;  %v3214_v14 = vpop.f32.mrb[78].mxu1 }
0x1c1a   :  { %v3141_v6 = vsel %vm447_vm9, %v3139_v0, %v3124_v50  ;;  %v4776_v41 = vpop.f32.mrb[79].mxu1 }
0x1c1b   :  { %3168 = vrot.lane.b32.xlu1 %v3141_v6, %s5125_s3 }
0x1c1e   :  { %v3145_v56 = vpop.permute.xlu0 %3144 }
0x1c1f   :  { %3095 = vrot.lane.b32.xlu1 %v3081_v31, %s5119_s23  ;;  %v3151_v17 = vmul.f32 %v5397_v43, %v3145_v56 }
0x1c22   :  { %v3090_v11 = vpop.permute.xlu0 %3089 }
0x1c23   :  { %3107 = vrot.lane.b32.xlu1 %v3081_v31, %s5118_s22  ;;  %v3130_v22 = vsel %vm429_vm3, %v3081_v31, %v3090_v11 }
0x1c26   :  { %v3102_v38 = vpop.permute.xlu0 %3101 }
0x1c27   :  { %3119 = vrot.lane.b32.xlu1 %v3081_v31, %s5122_s26 }
0x1c2a   :  { %v3155_v62 = vpop.permute.xlu1 %3154  ;;  %v3114_v58 = vpop.permute.xlu0 %3113 }
0x1c2b   :  { %v3161_v51 = vadd.f32 %v3155_v62, %v3151_v17 }
0x1c2e   :  { %v3126_v37 = vpop.permute.xlu0 %3125 }
0x1c32   :  { %v3149_v55 = vpop.permute.xlu0 %3148 }
0x1c37   :  { %v3159_v7 = vpop.permute.xlu0 %3158 }
0x1c8d   :  { %v3169_v13 = vpop.permute.xlu1 %3168 }
0x1c8e   :  { %v3212_v27 = vadd.f32 %v3211_v61, %v3169_v13  ;;  %v3152_v61 = vmul.f32 %v5420_v26, %v3149_v55 }
0x1c90   :  { %v3271_v19 = vadd.f32 %v3212_v27, %v3161_v51  ;;  %v3162_v30 = vadd.f32 %v3159_v7, %v3152_v61 }
0x1c91   :  { %v3096_v33 = vpop.permute.xlu1 %3095 }
0x1c92   :  { %v3273_v10 = vmul.f32 0.35355338, %v3271_v19  ;;  %v3132_v9 = vsel %vm432_vm4, %v3130_v22, %v3096_v33 }
0x1c93   :  { %v3134_v63 = vsel %vm435_vm5, %v3132_v9, %v3102_v38 }
0x1c94   :  { %v3275_v48 = vadd.f32 %v3273_v10, %v5403_v57 }
0x1c95   :  { %v3108_v3 = vpop.permute.xlu1 %3107 }
0x1c96   :  { %v3136_v28 = vsel %vm438_vm6, %v3134_v63, %v3108_v3  ;;  %v3277_v49 = vsel %vm337_vm2, %v3275_v48, -inf }
0x1c97   :  { %3278 = vmax.xlane.f32.xlu1 %v3277_v49  ;;  %v3138_v53 = vsel %vm441_vm7, %v3136_v28, %v3114_v58 }
0x1c99   :  { %v3120_v54 = vpop.permute.xlu1 %3119 }
0x1c9a   :  { %v3140_v31 = vsel %vm444_vm8, %v3138_v53, %v3120_v54 }
0x1c9b   :  { %v3142_v44 = vsel %vm447_vm9, %v3140_v31, %v3126_v37 }
0x1c9c   :  { %3222 = vrot.lane.b32.xlu0 %v3142_v44, %s5125_s3 }
0x1ca8   :  { %3301 = vrot.lane.b32.xlu1 %v5857_v42, %s6421_s5 }
0x1d0e   :  { %v3223_v12 = vpop.permute.xlu0 %3222 }
0x1d0f   :  { %v3266_v0 = vadd.f32 %v6093_v20, %v3223_v12 }
0x1d11   :  { %v3272_v50 = vadd.f32 %v3266_v0, %v3162_v30 }
0x1d13   :  { %v3274_v14 = vmul.f32 0.35355338, %v3272_v50 }
0x1d15   :  { %v3276_v6 = vadd.f32 %v3274_v14, %v5425_v39 }
0x1d17   :  { %v3280_v41 = vsel %vm337_vm2, %v3276_v6, -inf }
0x1d18   :  { %3281 = vmax.xlane.f32.xlu1 %v3280_v41 }
0x1d24   :  { %v3279_v56 = vpop.xlane.xlu1 %3278 }
0x1d25   :  { %v3283_v11 = vsub.f32 %v3275_v48, %v3279_v56 }
0x1d27   :  { %v3285_v62 = vmul.f32 1.442695, %v3283_v11 }
0x1d28   :  { %v3302_v17 = vpop.permute.xlu1 %3301 }
0x1d29   :  { %5051 = vpow2.f32 %v3285_v62  ;;  %v3307_v13 = vsel %vm438_vm6, %v3302_v17, 0  ;;  %3349 = vrot.lane.b32.xlu1 %v5861_v25, %s6421_s5 }
0x1d2a   :  { %4784 = vmatpush3.bf16.msra.mxu1 %v3307_v13 }
0x1d2b   :  { %4795 = vmatprep.subr.bf16.mxu1 %v5113_v1 }
0x1d2d   :  { %3528 = vrot.lane.b32.xlu1 %v5857_v42, %s6422_s29 }
0x1d31   :  { %3526 = vrot.lane.b32.xlu1 %v5885_v46, %s6423_s19 }
0x1d33   :  { %v5052_v20 = vpop.eup %5051 }
0x1d34   :  { %v3289_v38 = vsel %vm337_vm2, %v5052_v20, 0.0 }
0x1d35   :  { %3580 = vrot.lane.b32.xlu1 %v5889_v29, %s6423_s19  ;;  %3290 = vadd.xlane.f32.xlu0 %v3289_v38 }
0x1d4b   :  { %3399 = vrot.lane.b32.xlu0 %v5871_v47, %s6423_s19 }
0x1d4f   :  { %3397 = vrot.lane.b32.xlu0 %v5865_v24, %s6423_s19 }
0x1da5   :  { %v3282_v51 = vpop.xlane.xlu1 %3281 }
0x1da6   :  { %v3284_v27 = vsub.f32 %v3276_v6, %v3282_v51 }
0x1da8   :  { %v3287_v19 = vmul.f32 1.442695, %v3284_v27 }
0x1da9   :  { %v3350_v22 = vpop.permute.xlu1 %3349 }
0x1daa   :  { %5053 = vpow2.f32 %v3287_v19  ;;  %v3355_v46 = vsel %vm438_vm6, %v3350_v22, 0 }
0x1dab   :  { %4790 = vmatpush3.bf16.msra.mxu0 %v3355_v46 }
0x1dac   :  { %4801 = vmatprep.subr.bf16.mxu0 %v5113_v1 }
0x1dad   :  { %v3529_v3 = vpop.permute.xlu1 %3528 }
0x1dae   :  { %v3538_v7 = vsel %vm337_vm2, %v3529_v3, 0 }
0x1db1   :  { %v3527_v54 = vpop.permute.xlu1 %3526 }
0x1db4   :  { %v5054_v33 = vpop.eup %5053 }
0x1db5   :  { %v3292_v29 = vsel %vm337_vm2, %v5054_v33, 0.0  ;;  %v3581_v31 = vpop.permute.xlu1 %3580 }
0x1db6   :  { %3293 = vadd.xlane.f32.xlu0 %v3292_v29 }
0x1dc2   :  { %v3291_v10 = vpop.xlane.xlu0 %3290 }
0x1dc3   :  { %5055 = vrcp.f32 %v3291_v10 }
0x1dc6   :  { %v3400_v9 = vpop.permute.xlu0 %3399 }
0x1dc7   :  { %v3405_v48 = vsel %vm337_vm2, %v3400_v9, 0 }
0x1dca   :  { %v3398_v63 = vpop.permute.xlu0 %3397 }
0x1dcc   :  { %3582 = vrot.lane.b32.xlu0 %v5861_v25, %s6422_s29 }
0x1dcd   :  { %v5056_v24 = vpop.eup %5055 }
0x1dce   :  { %v3297_v47 = vmul.f32 %v5056_v24, %v5052_v20 }
0x1dd0   :  { %v3299_v58 = vpack.c.bf16 %v3297_v47, %v3297_v47 }
0x1dd2   :  { %4786 = vmatmul.mubr.msk.bf16.vlgmr.msra.gmra.mrb[80].mxu1 %vm337_vm2, %v3299_v58 }
0x1dd3   :  { %4796 = vmatpush3.bf16.xpose.msra.mxu1 %v3405_v48  ;;  %4797 = vmatprep.mubr.msk.bf16.mxu1 %vm5114_vm0, %v5113_v1 }
0x1dd4   :  { %4807 = vmatprep.subr.bf16.mxu1 %v5113_v1 }
0x1dda   :  { %4798 = vmatmul.mubr.msk.bf16.vlgmr.msra.gmra.mrb[84].mxu1 %vm337_vm2, %v3398_v63 }
0x1ddb   :  { %4809 = vmatprep.mubr.msk.bf16.mxu1 %vm5114_vm0, %v5113_v1 }
0x1e43   :  { %v3294_v28 = vpop.xlane.xlu0 %3293 }
0x1e44   :  { %5057 = vrcp.f32 %v3294_v28 }
0x1e47   :  { %v3583_v49 = vpop.permute.xlu0 %3582 }
0x1e48   :  { %v3592_v53 = vsel %vm337_vm2, %v3583_v49, 0 }
0x1e49   :  { %4808 = vmatpush3.bf16.xpose.msra.mxu1 %v3592_v53 }
0x1e4a   :  { %4819 = vmatprep.subr.bf16.mxu1 %v5113_v1 }
0x1e4e   :  { %v5058_v37 = vpop.eup %5057 }
0x1e4f   :  { %v3298_v44 = vmul.f32 %v5058_v37, %v5054_v33 }
0x1e50   :  { %4810 = vmatmul.mubr.msk.bf16.vlgmr.msra.gmra.mrb[88].mxu1 %vm337_vm2, %v3581_v31 }
0x1e51   :  { %v3300_v55 = vpack.c.bf16 %v3298_v44, %v3298_v44  ;;  %4821 = vmatprep.mubr.msk.bf16.mxu1 %vm5114_vm0, %v5113_v1 }
0x1e53   :  { %4792 = vmatmul.mubr.msk.bf16.vlgmr.msra.gmra.mrb[80].mxu0 %vm337_vm2, %v3300_v55 }
0x1e54   :  { %4802 = vmatpush3.bf16.xpose.msra.mxu0 %v3538_v7  ;;  %4803 = vmatprep.mubr.msk.bf16.mxu0 %vm5114_vm0, %v5113_v1 }
0x1e55   :  { %4813 = vmatprep.subr.bf16.mxu0 %v5113_v1 }
0x1e5b   :  { %4804 = vmatmul.mubr.msk.bf16.vlgmr.msra.gmra.mrb[84].mxu0 %vm337_vm2, %v3527_v54 }
0x1e5c   :  { %4815 = vmatprep.mubr.msk.bf16.mxu0 %vm5114_vm0, %v5113_v1 }
0x1ea5   :  { %v6182_v61 = vpop.f32.mrb[80].mxu1 }
0x1ea6   :  { %v4787_v12 = vpop.f32.mrb[81].mxu1 }
0x1ea7   :  { %v3346_v30 = vpop.f32.mrb[82].mxu1 }
0x1ea8   :  { %v4788_v0 = vpop.f32.mrb[83].mxu1 }
0x1ead   :  { %v3441_v50 = vpop.f32.mrb[84].mxu1 }
0x1eae   :  { %3450 = vrot.lane.b32.xlu1 %v3441_v50, %s5120_s24  ;;  %v4799_v14 = vpop.f32.mrb[85].mxu1 }
0x1eaf   :  { %v3444_v6 = vpop.f32.mrb[86].mxu1 }
0x1eb0   :  { %3458 = vrot.lane.b32.xlu0 %v3444_v6, %s5119_s23  ;;  %v4800_v41 = vpop.f32.mrb[87].mxu1 }
0x1eb2   :  { %3456 = vrot.lane.b32.xlu1 %v3441_v50, %s5119_s23  ;;  %s6425_s23 = smov 8  }
0x1eb4   :  { %3464 = vrot.lane.b32.xlu0 %v3444_v6, %s5121_s25 }
0x1eb6   :  { %3462 = vrot.lane.b32.xlu1 %v3441_v50, %s5121_s25  ;;  %s6426_s25 = smov 16  }
0x1eb8   :  { %3470 = vrot.lane.b32.xlu0 %v3444_v6, %s5118_s22 }
0x1eba   :  { %3468 = vrot.lane.b32.xlu1 %v3441_v50, %s5118_s22  ;;  %s6424_s22 = smov 40  }
0x1ebc   :  { %3476 = vrot.lane.b32.xlu0 %v3444_v6, %s5123_s27 }
0x1ebe   :  { %3474 = vrot.lane.b32.xlu1 %v3441_v50, %s5123_s27 }
0x1ec0   :  { %3482 = vrot.lane.b32.xlu0 %v3444_v6, %s5122_s26 }
0x1ec2   :  { %3452 = vrot.lane.b32.xlu1 %v3444_v6, %s5120_s24 }
0x1ec4   :  { %3488 = vrot.lane.b32.xlu0 %v3444_v6, %s5124_s28 }
0x1ec6   :  { %3480 = vrot.lane.b32.xlu1 %v3441_v50, %s5122_s26 }
0x1ec8   :  { %3511 = vperm.xlu0 %4942, %v5931_v15  }
0x1eca   :  { %3486 = vrot.lane.b32.xlu1 %v3441_v50, %s5124_s28 }
0x1ecc   :  { %4959 = vset.pattern.permute.xlu0 %v5140_v2 }
0x1ece   :  { %3507 = vperm.xlu1 %4941, %v5904_v60  }
0x1ed2   :  { %4943 = vset.pattern.permute.xlu1 %v5140_v2 }
0x1ed3   :  { %3517 = vperm.xlu1 %4943, %v5863_v35  }
0x1ed7   :  { %3521 = vperm.xlu1 %4943, %v5908_v21  }
0x1f20   :  { %v3451_v56 = vpop.permute.xlu1 %3450 }
0x1f21   :  { %v3492_v3 = vsel %vm429_vm3, %v3441_v50, %v3451_v56 }
0x1f22   :  { %v3459_v11 = vpop.permute.xlu0 %3458 }
0x1f23   :  { %v3628_v62 = vpop.f32.mrb[88].mxu1 }
0x1f24   :  { %v3457_v17 = vpop.permute.xlu1 %3456  ;;  %v4811_v13 = vpop.f32.mrb[89].mxu1 }
0x1f25   :  { %v3631_v20 = vpop.f32.mrb[90].mxu1  ;;  %v3494_v49 = vsel %vm432_vm4, %v3492_v3, %v3457_v17 }
0x1f26   :  { %v3391_v38 = vpop.f32.mrb[80].mxu0  ;;  %v3465_v15 = vpop.permute.xlu0 %3464 }
0x1f27   :  { %v4949_v51 = vpack.i.bf16 %v3391_v38, %v6182_v61  ;;  %v4812_v27 = vpop.f32.mrb[91].mxu1  ;;  %v4793_v19 = vpop.f32.mrb[81].mxu0 }
0x1f28   :  { %v3394_v22 = vpop.f32.mrb[82].mxu0  ;;  %v3463_v60 = vpop.permute.xlu1 %3462 }
0x1f29   :  { %v4794_v46 = vpop.f32.mrb[83].mxu0  ;;  %v3496_v37 = vsel %vm435_vm5, %v3494_v49, %v3463_v60 }
0x1f2a   :  { %v3471_v2 = vpop.permute.xlu0 %3470 }
0x1f2c   :  { %v3469_v33 = vpop.permute.xlu1 %3468 }
0x1f2d   :  { %v3498_v44 = vsel %vm438_vm6, %v3496_v37, %v3469_v33  ;;  %v4979_v37 = vld [vmem:[%s6385_s7 + $0x18] sm:$0xff]  }
0x1f2e   :  { %v3574_v35 = vpop.f32.mrb[84].mxu0  ;;  %v3477_v29 = vpop.permute.xlu0 %3476 }
0x1f2f   :  { %v4805_v21 = vpop.f32.mrb[85].mxu0 }
0x1f30   :  { %v3577_v10 = vpop.f32.mrb[86].mxu0  ;;  %v3475_v24 = vpop.permute.xlu1 %3474 }
0x1f31   :  { %v4806_v47 = vpop.f32.mrb[87].mxu0  ;;  %v3500_v61 = vsel %vm441_vm7, %v3498_v44, %v3475_v24 }
0x1f32   :  { %v3483_v9 = vpop.permute.xlu0 %3482 }
0x1f34   :  { %v3453_v58 = vpop.permute.xlu1 %3452 }
0x1f35   :  { %v3493_v48 = vsel %vm429_vm3, %v3444_v6, %v3453_v58  ;;  %vm4234_vm3 = vcmask 1024  }
0x1f36   :  { %v3495_v63 = vsel %vm432_vm4, %v3493_v48, %v3459_v11  ;;  %v3489_v55 = vpop.permute.xlu0 %3488 }
0x1f37   :  { %v3497_v28 = vsel %vm435_vm5, %v3495_v63, %v3465_v15  ;;  %vm4265_vm5 = vcmask 0  }
0x1f38   :  { %v3499_v53 = vsel %vm438_vm6, %v3497_v28, %v3471_v2  ;;  %v3481_v54 = vpop.permute.xlu1 %3480 }
0x1f39   :  { %v3501_v31 = vsel %vm441_vm7, %v3499_v53, %v3477_v29  ;;  %v3502_v30 = vsel %vm444_vm8, %v3500_v61, %v3481_v54  ;;  %v4978_v54 = vld [vmem:[%s6385_s7 + $0x10] sm:$0xff]  }
0x1f3a   :  { %v3503_v7 = vsel %vm444_vm8, %v3501_v31, %v3483_v9 }
0x1f3b   :  { %v3505_v12 = vsel %vm447_vm9, %v3503_v7, %v3489_v55 }
0x1f3c   :  { %3585 = vrot.lane.b32.xlu1 %v3505_v12, %s5125_s3  ;;  %v3487_v0 = vpop.permute.xlu1 %3486 }
0x1f3d   :  { %v3504_v50 = vsel %vm447_vm9, %v3502_v30, %v3487_v0 }
0x1f3e   :  { %3531 = vrot.lane.b32.xlu0 %v3504_v50, %s5125_s3 }
0x1f47   :  { %v3512_v41 = vpop.permute.xlu0 %3511 }
0x1f48   :  { %v3515_v11 = vmul.f32 %v5420_v26, %v3512_v41 }
0x1f4d   :  { %v3508_v14 = vpop.permute.xlu1 %3507 }
0x1f4e   :  { %v3514_v13 = vmul.f32 %v5397_v43, %v3508_v14 }
0x1f52   :  { %v3518_v6 = vpop.permute.xlu1 %3517 }
0x1f53   :  { %v3524_v27 = vadd.f32 %v3518_v6, %v3514_v13 }
0x1f56   :  { %v3522_v56 = vpop.permute.xlu1 %3521 }
0x1f57   :  { %v3525_v20 = vadd.f32 %v3522_v56, %v3515_v11 }
0x1fae   :  { %v3586_v17 = vpop.permute.xlu1 %3585 }
0x1faf   :  { %v3629_v38 = vadd.f32 %v3628_v62, %v3586_v17 }
0x1fb0   :  { %v3532_v15 = vpop.permute.xlu0 %3531 }
0x1fb1   :  { %v3635_v19 = vadd.f32 %v3629_v38, %v3525_v20  ;;  %v3575_v22 = vadd.f32 %v3574_v35, %v3532_v15 }
0x1fb3   :  { %v3637_v60 = vmul.f32 0.35355338, %v3635_v19  ;;  %v3634_v46 = vadd.f32 %v3575_v22, %v3524_v27 }
0x1fb5   :  { %v3636_v2 = vmul.f32 0.35355338, %v3634_v46  ;;  %v3639_v33 = vadd.f32 %v3637_v60, %v5425_v39 }
0x1fb7   :  { %v3643_v29 = vsel %vm337_vm2, %v3639_v33, -inf  ;;  %v3638_v21 = vadd.f32 %v3636_v2, %v5403_v57 }
0x1fb8   :  { %3644 = vmax.xlane.f32.xlu1 %v3643_v29 }
0x1fb9   :  { %v3640_v26 = vsel %vm337_vm2, %v3638_v21, -inf }
0x1fba   :  { %3641 = vmax.xlane.f32.xlu0 %v3640_v26 }
0x1fc9   :  { %3664 = vrot.lane.b32.xlu1 %v5857_v42, %s6424_s22 }
0x1fcd   :  { %4945 = vrot.lane.b32.xlu1 %v4944_v23, %s6425_s23 }
0x1fd1   :  { %4950 = vrot.lane.b32.xlu1 %v4949_v51, %s6426_s25 }
0x2045   :  { %v3645_v43 = vpop.xlane.xlu1 %3644 }
0x2046   :  { %v3647_v39 = vsub.f32 %v3639_v33, %v3645_v43 }
0x2047   :  { %v3642_v62 = vpop.xlane.xlu0 %3641 }
0x2048   :  { %v3646_v35 = vsub.f32 %v3638_v21, %v3642_v62  ;;  %v3650_v57 = vmul.f32 1.442695, %v3647_v39 }
0x2049   :  { %v3665_v10 = vpop.permute.xlu1 %3664 }
0x204a   :  { %v3648_v24 = vmul.f32 1.442695, %v3646_v35  ;;  %v3670_v47 = vsel %vm438_vm6, %v3665_v10, 0 }
0x204b   :  { %4814 = vmatpush3.bf16.msra.mxu0 %v3670_v47 }
0x204c   :  { %5059 = vpow2.f32 %v3648_v24  ;;  %4825 = vmatprep.subr.bf16.mxu0 %v5113_v1 }
0x204d   :  { %5061 = vpow2.f32 %v3650_v57  ;;  %v4946_v14 = vpop.permute.xlu1 %4945 }
0x204e   :  { %v4948_v41 = vunpack.i.h.bf16 %v4946_v14  ;;  %v4947_v56 = vunpack.i.l.bf16 %v4946_v14 }
0x2050   :  { %v3785_v20 = vsel %vm337_vm2, %v6020_v52, %v4948_v41  ;;  %v3784_v38 = vsel %vm337_vm2, %v5994_v34, %v4947_v56 }
0x2051   :  { %v4951_v6 = vpop.permute.xlu1 %4950 }
0x2052   :  { %v4953_v11 = vunpack.i.h.bf16 %v4951_v6  ;;  %v4952_v17 = vunpack.i.l.bf16 %v4951_v6 }
0x2054   :  { %v3786_v19 = vsel %vm1833_vm14, %v3784_v38, %v4952_v17  ;;  %v3787_v22 = vsel %vm1833_vm14, %v3785_v20, %v4953_v11 }
0x2056   :  { %v5060_v42 = vpop.eup %5059 }
0x2057   :  { %v3652_v16 = vsel %vm337_vm2, %v5060_v42, 0.0  ;;  %v5062_v5 = vpop.eup %5061 }
0x2058   :  { %3653 = vadd.xlane.f32.xlu0 %v3652_v16  ;;  %v3655_v23 = vsel %vm337_vm2, %v5062_v5, 0.0 }
0x205c   :  { %3656 = vadd.xlane.f32.xlu0 %v3655_v23  ;;  %v4981_v23 = vld [vmem:[%s6386_s8 + $0x18] sm:$0xff]  }
0x2072   :  { %3712 = vrot.lane.b32.xlu0 %v5861_v25, %s6424_s22 }
0x20e5   :  { %v3654_v51 = vpop.xlane.xlu0 %3653 }
0x20e6   :  { %5063 = vrcp.f32 %v3654_v51 }
0x20e9   :  { %v3657_v9 = vpop.xlane.xlu0 %3656 }
0x20ea   :  { %5065 = vrcp.f32 %v3657_v9 }
0x20ed   :  { %v3713_v58 = vpop.permute.xlu0 %3712 }
0x20ee   :  { %v3718_v48 = vsel %vm438_vm6, %v3713_v58, 0 }
0x20ef   :  { %4820 = vmatpush3.bf16.msra.mxu1 %v3718_v48 }
0x20f0   :  { %v5064_v63 = vpop.eup %5063  ;;  %4833 = vmatprep.subr.bf16.mxu1 %v5113_v1 }
0x20f1   :  { %v3660_v3 = vmul.f32 %v5064_v63, %v5060_v42 }
0x20f3   :  { %v3662_v28 = vpack.c.bf16 %v3660_v3, %v3660_v3 }
0x20f4   :  { %v5066_v49 = vpop.eup %5065 }
0x20f5   :  { %v3661_v53 = vmul.f32 %v5066_v49, %v5062_v5  ;;  %4816 = vmatmul.mubr.msk.bf16.vlgmr.msra.gmra.mrb[88].mxu0 %vm337_vm2, %v3662_v28  ;;  %v4980_v5 = vld [vmem:[%s6386_s8 + $0x10] sm:$0xff]  }
0x20f6   :  { %4829 = vmatprep.mubr.msk.bf16.mxu0 %vm5114_vm0, %v5113_v1  ;;  %4826 = vmatpush3.bf16.msra.mxu0 %v4978_v54  ;;  %v6285_v28 = vld [vmem:[%s6388_s10 + $0x10] sm:$0xff] }
0x20f7   :  { %v3663_v25 = vpack.c.bf16 %v3661_v53, %v3661_v53  ;;  %4827 = vmatprep.subr.bf16.mxu0 %v5113_v1  ;;  %v3876_v49 = vrot.slane %v6285_v28, %v1925_v36  ;;  %v4982_v36 = vld [vmem:[%s6387_s9 + $0x20] sm:$0xff]  }
0x20f9   :  { %4822 = vmatmul.mubr.msk.bf16.vlgmr.msra.gmra.mrb[92].mxu1 %vm337_vm2, %v3663_v25  ;;  %vm4095_vm2 = vcmask 1041409  }
0x20fa   :  { %4837 = vmatprep.mubr.msk.bf16.mxu1 %vm5114_vm0, %v5113_v1  ;;  %4828 = vmatpush3.bf16.msra.mxu0 %v4979_v37 }
0x20fb   :  { %4841 = vmatprep.subr.bf16.mxu0 %v5113_v1  ;;  %4834 = vmatpush3.bf16.msra.mxu1 %v4980_v5 }
0x20fc   :  { %4835 = vmatprep.subr.bf16.mxu1 %v5113_v1 }
0x20ff   :  { %4836 = vmatpush3.bf16.msra.mxu1 %v4981_v23 }
0x2100   :  { %4853 = vmatprep.subr.bf16.mxu1 %v5113_v1 }
0x21c8   :  { %v3706_v31 = vpop.f32.mrb[88].mxu0 }
0x21c9   :  { %v4817_v44 = vpop.f32.mrb[89].mxu0 }
0x21ca   :  { %v3709_v55 = vpop.f32.mrb[90].mxu0  ;;  %v3882_v44 = vrot.slane %v6285_v28, %v1931_v40  ;;  %v4983_v40 = vld [vmem:[%s6387_s9 + $0x28] sm:$0xff]  }
0x21cb   :  { %v4818_v7 = vpop.f32.mrb[91].mxu0 }
0x21cc   :  { %v3754_v61 = vpop.f32.mrb[92].mxu1 }
0x21cd   :  { %v4954_v12 = vpack.i.bf16 %v3754_v61, %v3706_v31  ;;  %v4823_v30 = vpop.f32.mrb[93].mxu1 }
0x21ce   :  { %v3757_v0 = vpop.f32.mrb[94].mxu1  ;;  %v4984_v30 = vld [vmem:[%s6387_s9 + $0x30] sm:$0xff]  }
0x21cf   :  { %4955 = vrot.lane.b32.xlu0 %v4954_v12, %s6427_s20  ;;  %v4824_v50 = vpop.f32.mrb[95].mxu1  ;;  %v4985_v0 = vld [vmem:[%s6387_s9 + $0x38] sm:$0xff]  }
0x21d0   :  { %v3889_v50 = vrot.slane %v6285_v28, %v1938_v32 }
0x2241   :  { %v4956_v13 = vpop.permute.xlu0 %4955 }
0x2242   :  { %v4958_v15 = vunpack.i.h.bf16 %v4956_v13  ;;  %v4957_v27 = vunpack.i.l.bf16 %v4956_v13 }
0x2244   :  { %v3789_v60 = vsel %vm1836_vm15, %v3787_v22, %v4958_v15  ;;  %v3788_v46 = vsel %vm1836_vm15, %v3786_v19, %v4957_v27 }
0x2245   :  { %v3790_v2 = vpack.c.bf16 %v3789_v60, %v3788_v46 }
0x2247   :  { %4830 = vmatmul.mubr.msk.bf16.vlgmr.msra.gmra.mrb[92].mxu0 %vm203_vm1, %v3790_v2 }
0x2248   :  { %4849 = vmatprep.mubr.msk.bf16.mxu0 %vm5114_vm0, %v5113_v1  ;;  %4842 = vmatpush3.bf16.msra.mxu0 %v4982_v36 }
0x2249   :  { %4843 = vmatprep.subr.bf16.mxu0 %v5113_v1 }
0x224c   :  { %4844 = vmatpush3.bf16.msra.mxu0 %v4983_v40 }
0x224d   :  { %4845 = vmatprep.subr.bf16.mxu0 %v5113_v1 }
0x2250   :  { %4846 = vmatpush3.bf16.msra.mxu0 %v4984_v30 }
0x2251   :  { %4847 = vmatprep.subr.bf16.mxu0 %v5113_v1 }
0x2254   :  { %4848 = vmatpush3.bf16.msra.mxu0 %v4985_v0  ;;  %v4396_v0 = vld [vmem:[%s6388_s10 + $0x18] ss:$0 sm:$0xff] }
0x231a   :  { %v3840_v52 = vpop.f32.mrb[92].mxu0 }
0x231b   :  { %v3841_v33 = vadd.f32 %v3840_v52, %v5833_v4  ;;  %v4831_v34 = vpop.f32.mrb[93].mxu0 }
0x231c   :  { %v3843_v29 = vpop.f32.mrb[94].mxu0 }
0x231d   :  { %v3844_v21 = vadd.f32 %v3843_v29, %v5835_v18  ;;  %v4832_v26 = vpop.f32.mrb[95].mxu0  ;;  %v3847_v43 = vsel %vm203_vm1, %v3841_v33, 0.0 }
0x231e   :  { %3848 = vadd.xlane.f32.xlu1 %v3847_v43 }
0x231f   :  { %v3850_v39 = vsel %vm203_vm1, %v3844_v21, 0.0 }
0x2320   :  { %3851 = vadd.xlane.f32.xlu0 %v3850_v39 }
0x23ab   :  { %v3849_v62 = vpop.xlane.xlu1 %3848 }
0x23ac   :  { %v3853_v35 = vmul.f32 0.03125, %v3849_v62  ;;  %v3968_v62 = vrot.slane %v6285_v28, %v2017_v45 }
0x23ad   :  { %v3852_v10 = vpop.xlane.xlu0 %3851 }
0x23ae   :  { %v3855_v57 = vsub.f32 %v3841_v33, %v3853_v35  ;;  %v3854_v24 = vmul.f32 0.03125, %v3852_v10 }
0x23b0   :  { %v3856_v47 = vsub.f32 %v3844_v21, %v3854_v24  ;;  %v3857_v42 = vmul.f32 %v3855_v57, %v3855_v57 }
0x23b2   :  { %v3859_v4 = vsel %vm203_vm1, %v3857_v42, 0.0  ;;  %v3858_v16 = vmul.f32 %v3856_v47, %v3856_v47 }
0x23b3   :  { %3860 = vadd.xlane.f32.xlu0 %v3859_v4 }
0x23b4   :  { %v3862_v18 = vsel %vm203_vm1, %v3858_v16, 0.0 }
0x23b5   :  { %3863 = vadd.xlane.f32.xlu1 %v3862_v18 }
0x2440   :  { %v3861_v51 = vpop.xlane.xlu0 %3860 }
0x2441   :  { %v3865_v9 = vmul.f32 0.03125, %v3861_v51 }
0x2442   :  { %v3864_v58 = vpop.xlane.xlu1 %3863 }
0x2443   :  { %v3867_v48 = vadd.f32 1e-12, %v3865_v9  ;;  %v3866_v63 = vmul.f32 0.03125, %v3864_v58 }
0x2445   :  { %5067 = vrsqrt.f32 %v3867_v48  ;;  %v3868_v3 = vadd.f32 1e-12, %v3866_v63 }
0x2447   :  { %5069 = vrsqrt.f32 %v3868_v3 }
0x244f   :  { %v5068_v53 = vpop.eup %5067 }
0x2450   :  { %v3871_v25 = vmul.f32 %v5068_v53, %v3855_v57 }
0x2451   :  { %v5070_v54 = vpop.eup %5069 }
0x2452   :  { %v3877_v37 = vmul.f32 %v3876_v49, %v3871_v25  ;;  %v3872_v31 = vmul.f32 %v5070_v54, %v3856_v47  ;;  %v4986_v25 = vld [vmem:[%s6389_s11] sm:$0xff]   ;;  %v4987_v54 = vld [vmem:[%s6389_s11 + $0x8] sm:$0xff]  }
0x2454   :  { %v3878_v55 = vmul.f32 %v3876_v49, %v3872_v31  ;;  %v3883_v7 = vadd.f32 %v3882_v44, %v3877_v37 }
0x2456   :  { %v3884_v61 = vadd.f32 %v3882_v44, %v3878_v55 }
0x2458   :  { %v3885_v12 = vpack.c.bf16 %v3884_v61, %v3883_v7 }
0x245a   :  { %4838 = vmatmul.mubr.msk.bf16.vlgmr.msra.gmra.mrb[96].mxu1 %vm203_vm1, %v3885_v12  ;;  %v4068_v12 = vrot.slane %v6285_v28, %v2118_v59 }
0x245b   :  { %4857 = vmatprep.mubr.msk.bf16.mxu1 %vm5114_vm0, %v5113_v1  ;;  %4854 = vmatpush3.bf16.msra.mxu1 %v4986_v25 }
0x245c   :  { %4855 = vmatprep.subr.bf16.mxu1 %v5113_v1 }
0x245f   :  { %4856 = vmatpush3.bf16.msra.mxu1 %v4987_v54  ;;  %v5146_v54 = vmov 0  }
0x2460   :  { %4861 = vmatprep.subr.bf16.mxu1 %v5113_v1 }
0x252d   :  { %v3939_v14 = vpop.f32.mrb[96].mxu1 }
0x252e   :  { %v3940_v6 = vadd.f32 %v3939_v14, %v3889_v50  ;;  %v4839_v41 = vpop.f32.mrb[97].mxu1 }
0x252f   :  { %v3942_v56 = vpop.f32.mrb[98].mxu1 }
0x2530   :  { %v3946_v11 = vmul.f32 %v3940_v6, %v3940_v6  ;;  %v3943_v17 = vadd.f32 %v3942_v56, %v3889_v50  ;;  %v4840_v13 = vpop.f32.mrb[99].mxu1 }
0x2532   :  { %v3948_v20 = vmul.f32 %v3946_v11, %v3940_v6  ;;  %v3947_v38 = vmul.f32 %v3943_v17, %v3943_v17 }
0x2534   :  { %v3950_v15 = vmul.f32 0.044715, %v3948_v20  ;;  %v3949_v27 = vmul.f32 %v3947_v38, %v3943_v17 }
0x2536   :  { %v3952_v19 = vadd.f32 %v3950_v15, %v3940_v6  ;;  %v3951_v22 = vmul.f32 0.044715, %v3949_v27  ;;  %v4988_v15 = vld [vmem:[%s6390_s12] sm:$0xff]   ;;  %v4989_v27 = vld [vmem:[%s6390_s12 + $0x8] sm:$0xff]  }
0x2538   :  { %v3954_v60 = vmul.f32 0.7978846, %v3952_v19  ;;  %v3953_v46 = vadd.f32 %v3951_v22, %v3943_v17  ;;  %v4397_v19 = vld [vmem:[%s6391_s13] ss:$0 sm:$0xff] }
0x253a   :  { %5071 = vtanh.f32 %v3954_v60  ;;  %v3955_v2 = vmul.f32 0.7978846, %v3953_v46 }
0x253c   :  { %5073 = vtanh.f32 %v3955_v2 }
0x2544   :  { %v5072_v52 = vpop.eup %5071 }
0x2545   :  { %v3958_v32 = vadd.f32 1.0, %v5072_v52 }
0x2546   :  { %v5074_v33 = vpop.eup %5073 }
0x2547   :  { %v3960_v34 = vmul.f32 0.5, %v3958_v32  ;;  %v3959_v29 = vadd.f32 1.0, %v5074_v33 }
0x2549   :  { %v3961_v21 = vmul.f32 0.5, %v3959_v29  ;;  %v3962_v26 = vmul.f32 %v3960_v34, %v3940_v6 }
0x254b   :  { %v3963_v43 = vmul.f32 %v3961_v21, %v3943_v17 }
0x254d   :  { %v3964_v39 = vpack.c.bf16 %v3963_v43, %v3962_v26 }
0x254f   :  { %4850 = vmatmul.mubr.msk.bf16.vlgmr.msra.gmra.mrb[96].mxu0 %vm2043_vm10, %v3964_v39 }
0x2622   :  { %v4030_v35 = vpop.f32.mrb[96].mxu0 }
0x2623   :  { %v4031_v10 = vadd.f32 %v4030_v35, %v3968_v62  ;;  %v4851_v57 = vpop.f32.mrb[97].mxu0 }
0x2624   :  { %v4033_v24 = vpop.f32.mrb[98].mxu0 }
0x2625   :  { %v4037_v47 = vadd.f32 %v4031_v10, %v3883_v7  ;;  %v4034_v42 = vadd.f32 %v4033_v24, %v3968_v62  ;;  %v4852_v4 = vpop.f32.mrb[99].mxu0  ;;  %v4244_v62 = vld [vmem:[%s6382_s4] sm:$0x3] }
0x2627   :  { %v4038_v16 = vadd.f32 %v4034_v42, %v3884_v61  ;;  %v4039_v18 = vsel %vm203_vm1, %v4037_v47, 0.0 }
0x2628   :  { %4040 = vadd.xlane.f32.xlu0 %v4039_v18 }
0x2629   :  { %v4042_v5 = vsel %vm203_vm1, %v4038_v16, 0.0 }
0x262a   :  { %4043 = vadd.xlane.f32.xlu1 %v4042_v5 }
0x26b5   :  { %v4041_v23 = vpop.xlane.xlu0 %4040 }
0x26b6   :  { %v4045_v51 = vmul.f32 0.03125, %v4041_v23 }
0x26b7   :  { %v4044_v9 = vpop.xlane.xlu1 %4043 }
0x26b8   :  { %v4047_v58 = vsub.f32 %v4037_v47, %v4045_v51  ;;  %v4046_v48 = vmul.f32 0.03125, %v4044_v9 }
0x26ba   :  { %v4048_v45 = vsub.f32 %v4038_v16, %v4046_v48  ;;  %v4049_v63 = vmul.f32 %v4047_v58, %v4047_v58 }
0x26bc   :  { %v4051_v3 = vsel %vm203_vm1, %v4049_v63, 0.0  ;;  %v4050_v49 = vmul.f32 %v4048_v45, %v4048_v45 }
0x26bd   :  { %4052 = vadd.xlane.f32.xlu0 %v4051_v3 }
0x26be   :  { %v4054_v53 = vsel %vm203_vm1, %v4050_v49, 0.0 }
0x26bf   :  { %4055 = vadd.xlane.f32.xlu1 %v4054_v53 }
0x274a   :  { %v4053_v37 = vpop.xlane.xlu0 %4052 }
0x274b   :  { %v4057_v31 = vmul.f32 0.03125, %v4053_v37 }
0x274c   :  { %v4056_v44 = vpop.xlane.xlu1 %4055 }
0x274d   :  { %v4059_v55 = vadd.f32 1e-12, %v4057_v31  ;;  %v4058_v7 = vmul.f32 0.03125, %v4056_v44 }
0x274f   :  { %5075 = vrsqrt.f32 %v4059_v55  ;;  %v4060_v61 = vadd.f32 1e-12, %v4058_v7 }
0x2751   :  { %5077 = vrsqrt.f32 %v4060_v61 }
0x2759   :  { %v5076_v36 = vpop.eup %5075 }
0x275a   :  { %v4063_v40 = vmul.f32 %v5076_v36, %v4047_v58 }
0x275b   :  { %v5078_v30 = vpop.eup %5077 }
0x275c   :  { %v4069_v50 = vmul.f32 %v4068_v12, %v4063_v40  ;;  %v4064_v14 = vmul.f32 %v5078_v30, %v4048_v45 }
0x275e   :  { %v4075_v6 = vadd.f32 %v4396_v0, %v4069_v50  ;;  %v4070_v41 = vmul.f32 %v4068_v12, %v4064_v14 }
0x2760   :  { %v4079_v56 = vpack.c.bf16 %v4075_v6, %v4075_v6  ;;  %v4076_v11 = vadd.f32 %v4396_v0, %v4070_v41 }
0x2762   :  { %v4080_v17 = vpack.c.bf16 %v4076_v11, %v4076_v11  ;;  %v4091_v13 = vunpack.c.l.b16 %v4079_v56 }
0x2764   :  { %v4092_v20 = vunpack.c.l.b16 %v4080_v17  ;;  %v4093_v8 = vrot.slane %v4091_v13, 7 }
0x2766   :  { %v4094_v38 = vrot.slane %v4092_v20, 6 }
0x2768   :  { %v4096_v59 = vsel %vm4095_vm2, %v4094_v38, %v4093_v8 }
0x2769   :  { %v4097_v28 = vpack.c.b16 %v4096_v59, %v4096_v59 }
0x276b   :  { %4858 = vmatmul.mubr.msk.bf16.vlgmr.msra.gmra.mrb[100].mxu1 %vm203_vm1, %v4097_v28 }
0x276c   :  { %4865 = vmatprep.mubr.msk.bf16.mxu1 %vm5114_vm0, %v5113_v1  ;;  %4862 = vmatpush3.bf16.msra.mxu1 %v4988_v15  ;;  %vm4218_vm0 = vcmask 9216  }
0x276d   :  { %4863 = vmatprep.subr.bf16.mxu1 %v5113_v1  ;;  %v4401_v1 = vld [vmem:[%s6391_s13 + $0x1] ss:$0 sm:$0xff]  ;;  %s5145_s13 = smov 127  }
0x2770   :  { %4864 = vmatpush3.bf16.msra.mxu1 %v4989_v27 }
0x283e   :  { %v4147_v22 = vpop.f32.mrb[100].mxu1 }
0x283f   :  { %v4148_v60 = vadd.f32 %v4397_v19, %v4147_v22  ;;  %v4859_v46 = vpop.f32.mrb[101].mxu1 }
0x2840   :  { %v4150_v2 = vpop.f32.mrb[102].mxu1 }
0x2841   :  { %5079 = vtanh.f32 %v4148_v60  ;;  %v4860_v52 = vpop.f32.mrb[103].mxu1 }
0x284b   :  { %v5080_v32 = vpop.eup %5079 }
0x284c   :  { %v4154_v33 = vpack.c.bf16 %v5080_v32, %v5080_v32 }
0x284e   :  { %4866 = vmatmul.mubr.msk.bf16.vlgmr.msra.gmra.mrb[104].mxu1 %vm203_vm1, %v4154_v33  ;;  %vm4251_vm1 = vcmask 9224  }
0x2921   :  { %v4212_v34 = vpop.f32.mrb[104].mxu1 }
0x2922   :  { %v4213_v29 = vadd.f32 %v4401_v1, %v4212_v34  ;;  %v4867_v21 = vpop.f32.mrb[105].mxu1 }
0x2923   :  { %v4215_v26 = vpop.f32.mrb[106].mxu1 }
0x2924   :  { %v4868_v43 = vpop.f32.mrb[107].mxu1  ;;  %v4219_v39 = vsel %vm4218_vm0, %v4213_v29, -inf }
0x2925   :  { %4220 = vmax.xlane.f32.xlu0 %v4219_v39 }
0x293b   :  { %4246 = vrot.lane.b32.xlu0 %v4244_v62, %s5120_s24 }
0x29b2   :  { %v4221_v35 = vpop.xlane.xlu0 %4220 }
0x29b3   :  { %v4222_v10 = vsub.f32 %v4213_v29, %v4221_v35 }
0x29b5   :  { %v4223_v57 = vmul.f32 1.442695, %v4222_v10 }
0x29b6   :  { %v4247_v16 = vpop.permute.xlu0 %4246 }
0x29b7   :  { %5081 = vpow2.f32 %v4223_v57 }
0x29c1   :  { %v5082_v24 = vpop.eup %5081 }
0x29c2   :  { %v4225_v47 = vsel %vm4218_vm0, %v5082_v24, 0.0 }
0x29c3   :  { %4226 = vadd.xlane.f32.xlu1 %v4225_v47 }
0x2a50   :  { %v4227_v42 = vpop.xlane.xlu1 %4226 }
0x2a51   :  { %5083 = vrcp.f32 %v4227_v42 }
0x2a5b   :  { %v5084_v4 = vpop.eup %5083 }
0x2a5c   :  { %v4229_v18 = vmul.f32 %v5084_v4, %v5082_v24 }
0x2a5e   :  { %v4249_v5 = vsub.f32 %v4229_v18, %v4247_v16  ;;  %4231 = vrot.lane.b32.xlu0 %v4229_v18, %s5145_s13  ;;  %4236 = vrot.lane.b32.xlu1 %v4229_v18, %s5120_s24  ;;  %s5147_s24 = smov [#allocation2]  }
0x2a5f   :  { %s4277_s8 = sshll.u32 %s5147_s24, 4  ;;  %s4278_s8 = int_to_ptr.vmem [resolvable:$true] %s4277_s8 }
0x2a60   :  { %v4250_v23 = vmul.f32 %v4249_v5, %v4249_v5  ;;  %s5089_s6 = scalar_lea.vmem %s4278_s8, 16  ;;  %s5093_s21 = scalar_lea.vmem %s4278_s8, 32 }
0x2a61   :  { %p5090_p0 = scmp.ne.s32.totalorder %s4278_s8, %s5089_s6  ;;  %p5094_p1 = scmp.lt.s32.totalorder %s4278_s8, %s4278_s8 }
0x2a62   :  { %v4252_v51 = vsel %vm4251_vm1, %v4250_v23, 0.0  ;;  %p5095_p2 = scmp.lt.s32.totalorder %s5093_s21, %s5089_s6 }
0x2a63   :  { %v4253_v9 = vrot.slane %v4252_v51, 4 }
0x2a64   :  { %p5096_p3 = por %p5095_p2, %p5094_p1 }
0x2a65   :  { %v4254_v58 = vadd.f32 %v4253_v9, %v4252_v51 }
0x2a66   :  { %p5097_p4 = pnand %p5096_p3, %p5090_p0 }
0x2a67   :  { %v4255_v48 = vrot.slane %v4254_v58, 2 }
0x2a69   :  { %v4256_v45 = vadd.f32 %v4255_v48, %v4254_v58 }
0x2a6b   :  { %v4257_v63 = vrot.slane %v4256_v45, 1 }
0x2a6d   :  { %v4258_v3 = vadd.f32 %v4257_v63, %v4256_v45 }
0x2a6f   :  { %v4260_v49 = vmul.f32 0.5, %v4258_v3 }
0x2a71   :  { %4262 = vrot.lane.b32.xlu1 %v4260_v49, %s5145_s13 }
0x2ad0   :  { %v4237_v53 = vpop.permute.xlu1 %4236  ;;  %v4232_v25 = vpop.permute.xlu0 %4231 }
0x2ad1   :  { %vm4239_vm4 = vcmp.gt.f32.partialorder %v4229_v18, %v4237_v53  ;;  %4235 = vst.msk [vmem:[%s6392_s14] sm:$0x3] %vm4234_vm3, %v4232_v25 }
0x2ad2   :  { %v4240_v37 = vsel %vm4239_vm4, 1, %v5146_v54 }
0x2ad3   :  { %4241 = vrot.lane.b32.xlu1 %v4240_v37, %s5145_s13 }
0x2ae3   :  { %v4263_v31 = vpop.permute.xlu1 %4262 }
0x2ae4   :  { %4266 = vst.msk [vmem:[#allocation2] sm:$0x1] %vm4265_vm5, %v4263_v31 }
0x2ae5   :  { %5100 = shalt.err (!%p5097_p4)
}
0x2ae6   :  { %s5101_s14 = scalar_lea.hbm %s6394_s16, 16 }
0x2ae7   :  { %p5102_p5 = scmp.ne.s32.totalorder %s6394_s16, %s5101_s14  ;;  %p5105_p6 = scmp.lt.u32.totalorder %s5101_s14, %s6394_s16 }
0x2ae9   :  { %p5107_p7 = pnand %p5105_p6, %p5102_p5 }
0x2aeb   :  { %5110 = shalt.err (!%p5107_p7)
}
0x2aec   :  { %4280 = dma.vmem_to_hbm [thread:$0]  %s4278_s8, 16, %s6394_s16, [#allocation3]  }
0x2b45   :  { %v4242_v44 = vpop.permute.xlu1 %4241 }
0x2b46   :  { %4243 = vst.msk [vmem:[%s6393_s15] sm:$0x3] %vm4234_vm3, %v4242_v44 }
0x2b47   :  { %5111 = dma.done.wait [#allocation3], 16  }
0x2b48   :  { %5112 = vsyncadd [#allocation3], 4294967280 }
0x2b49   :  { %4288 = vsyncpa [#allocation3], 1 }

</bundles_post_ra>
